<compile_context>
chip_gen: v6e
topology: v6e:2x2x1
jax: 0.10.0
libtpu: 0.0.40
codegen_flags: <defaults>
</compile_context>

<pallas_src>
from functools import lru_cache

import numpy as np
import jax
import jax.numpy as jnp
from jax.experimental import pallas as pl
from jax.experimental.pallas import tpu as pltpu

_EPS = 1e-5


# ----------------------------------------------------------------------------
# Constant operands (built once per shape, cached across forward calls)
# ----------------------------------------------------------------------------
@lru_cache(maxsize=None)
def _tap_masks(H, W):
    """(9, 1, H*W) f32 0/1 boundary masks for the 9 flattened-spatial shifts of a
    3x3 / pad-1 conv (zero where the shifted source pixel falls off the image)."""
    m = np.zeros((9, 1, H * W), np.float32)
    ii, jj = np.divmod(np.arange(H * W), W)
    for kh in range(3):
        for kw in range(3):
            ok = ((ii + kh - 1 >= 0) & (ii + kh - 1 < H) &
                  (jj + kw - 1 >= 0) & (jj + kw - 1 < W))
            m[kh * 3 + kw, 0, :] = ok.astype(np.float32)
    return jnp.asarray(m)


@lru_cache(maxsize=None)
def _stride2_selector(H, W):
    """(H*W, Ho*Wo) bf16 0/1 matrix selecting the even-(row,col) positions:
    one small matmul implements the stride-2 subsample (also reused for the
    2x2 avg-pool shortcut)."""
    Ho, Wo = H // 2, W // 2
    S = np.zeros((H * W, Ho * Wo), np.float32)
    for i in range(Ho):
        for j in range(Wo):
            S[(2 * i) * W + 2 * j, i * Wo + j] = 1.0
    return jnp.asarray(S, dtype=jnp.bfloat16)


@lru_cache(maxsize=None)
def _channel_dup(cin, cout):
    """(Cout, Cin) bf16 duplication matrix == concat([I]* (cout//cin), axis=0)."""
    reps = cout // cin
    D = np.concatenate([np.eye(cin, dtype=np.float32)] * reps, axis=0)
    return jnp.asarray(D, dtype=jnp.bfloat16)


# ----------------------------------------------------------------------------
# In-kernel building blocks (all traced inline, operate on (C, H*W) tiles)
# ----------------------------------------------------------------------------
def _conv3x3(a, w_ref, mask_ref, W):
    """3x3 conv, pad=1, stride=1 on flattened spatial.
    a: (Cin, P) f32, w_ref: (9, Cout, Cin) bf16, mask_ref: (9, 1, P) f32.
    Returns (Cout, P) f32 (f32 MXU accumulation, bf16 operands)."""
    P = a.shape[-1]
    out = None
    for kh in range(3):
        for kw in range(3):
            t = kh * 3 + kw
            delta = (kh - 1) * W + (kw - 1)
            if delta == 0:
                tap = a                                   # centre tap: mask is all-ones
            else:
                shifted = pltpu.roll(a, (-delta) % P, 1)  # XLU lane rotate
                tap = shifted * mask_ref[t]               # zero the wrapped rows/cols
            prod = jnp.dot(w_ref[t], tap.astype(jnp.bfloat16),
                           preferred_element_type=jnp.float32)
            out = prod if out is None else out + prod     # init from first tap product
    return out


def _unit_fwd(x, cfg, s1_ref, b1_ref, w1_ref, s2_ref, b2_ref, w2_ref,
              mask_refs, sub_refs, dup_refs):
    """One pre-activation residual unit on a single image: (Cin,H*W)->(Cout,Ho*Wo)."""
    H, W, Wo = cfg["H"], cfg["W"], cfg["Wo"]
    ds = cfg["downsample"]
    mask_in = mask_refs[cfg["mask_in"]]
    mask_out = mask_refs[cfg["mask_out"]]

    # BN1 (folded) + ReLU, conv1 evaluated at the *input* resolution.
    a1 = jnp.maximum(x * s1_ref[...] + b1_ref[...], 0.0)
    h1 = _conv3x3(a1, w1_ref, mask_in, W)                        # (Cout, H*W)
    if ds:
        sub = sub_refs[cfg["sub"]][...]                          # (H*W, Ho*Wo) bf16
        h1 = jnp.dot(h1.astype(jnp.bfloat16), sub,               # stride-2 subsample
                     preferred_element_type=jnp.float32)         # (Cout, Ho*Wo)

    # BN2 + ReLU, conv2 at the output resolution (stride 1).
    a2 = jnp.maximum(h1 * s2_ref[...] + b2_ref[...], 0.0)
    h2 = _conv3x3(a2, w2_ref, mask_out, Wo)                      # (Cout, Ho*Wo)

    if ds:
        # 2x2 / stride-2 avg-pool shortcut: 3 lane rolls + the shared subsample
        # matmul, then channel duplication (== concat([ap, ap], channel)).
        P = H * W
        xp = (x
              + pltpu.roll(x, (P - 1) % P, 1)
              + pltpu.roll(x, (P - W) % P, 1)
              + pltpu.roll(x, (P - W - 1) % P, 1))
        ap = 0.25 * jnp.dot(xp.astype(jnp.bfloat16), sub,
                            preferred_element_type=jnp.float32)  # (Cin, Ho*Wo)
        sc = jnp.dot(dup_refs[cfg["dup"]][...], ap.astype(jnp.bfloat16),
                     preferred_element_type=jnp.float32)         # (Cout, Ho*Wo)
    else:
        sc = x
    return h2 + sc


def _build_block_kernel(cfgs, n_masks, n_subs, n_dups, N):
    """Fused kernel: whole batch, all residual units, one grid step."""
    n_const = 1 + n_masks + n_subs + n_dups

    def kernel(*refs):
        x_ref = refs[0]
        mask_refs = refs[1:1 + n_masks]
        sub_refs = refs[1 + n_masks:1 + n_masks + n_subs]
        dup_refs = refs[1 + n_masks + n_subs:n_const]
        unit_refs = [refs[n_const + 6 * u: n_const + 6 * (u + 1)]
                     for u in range(len(cfgs))]
        o_ref = refs[-1]

        for n in range(N):                       # batch folded into one grid step
            h = x_ref[n]                         # (Cin, H*W) f32
            for cfg, (s1, b1, w1, s2, b2, w2) in zip(cfgs, unit_refs):
                h = _unit_fwd(h, cfg, s1, b1, w1, s2, b2, w2,
                              mask_refs, sub_refs, dup_refs)
            o_ref[n] = h.astype(o_ref.dtype)

    return kernel


def _full_spec(shape):
    zeros = (0,) * len(shape)
    return pl.BlockSpec(tuple(shape), lambda i, _z=zeros: _z)


# ----------------------------------------------------------------------------
# Wrapper: ResidualBlock.forward (sequential units, downsample only in unit 0)
# ----------------------------------------------------------------------------
def residual_block_forward(x_nchw, unit_params, downsample):
    N, C, H, W = x_nchw.shape
    # channels -> sublane, flattened spatial -> lane: pure reshape, no transpose.
    x = x_nchw.reshape(N, C, H * W)

    cfgs, mask_keys, sub_keys, dup_keys = [], [], [], []

    def _idx(lst, key):
        if key not in lst:
            lst.append(key)
        return lst.index(key)

    h, w = H, W
    for i, p in enumerate(unit_params):
        ds = bool(downsample and i == 0)
        ho, wo = (h // 2, w // 2) if ds else (h, w)
        cfgs.append(dict(
            H=h, W=w, Ho=ho, Wo=wo, downsample=ds,
            mask_in=_idx(mask_keys, (h, w)),
            mask_out=_idx(mask_keys, (ho, wo)),
            sub=_idx(sub_keys, (h, w)) if ds else None,
            dup=_idx(dup_keys, (p["cin"], p["cout"])) if ds else None))
        h, w = ho, wo

    masks = [_tap_masks(*k) for k in mask_keys]
    subs = [_stride2_selector(*k) for k in sub_keys]
    dups = [_channel_dup(*k) for k in dup_keys]

    args = [x] + masks + subs + dups
    for p in unit_params:
        args += [p["s1"], p["b1"], p["w1k"], p["s2"], p["b2"], p["w2k"]]

    Cout = unit_params[-1]["cout"]
    out_shape = (N, Cout, h * w)

    out = pl.pallas_call(
        _build_block_kernel(cfgs, len(masks), len(subs), len(dups), N),
        out_shape=jax.ShapeDtypeStruct(out_shape, jnp.float32),
        grid=(1,),
        in_specs=[_full_spec(a.shape) for a in args],
        out_specs=_full_spec(out_shape),
        compiler_params=pltpu.CompilerParams(dimension_semantics=("arbitrary",)),
    )(*args)
    return out.reshape(N, Cout, h, w)


# ----------------------------------------------------------------------------
# Deterministic synthetic parameters (nn.Conv2d / nn.BatchNorm2d shapes)
# ----------------------------------------------------------------------------
def _init_unit_params(key, cin, cout):
    ks = jax.random.split(key, 10)
    g1 = jax.random.uniform(ks[0], (cin,), jnp.float32, 0.5, 1.5)
    be1 = 0.1 * jax.random.normal(ks[1], (cin,), jnp.float32)
    m1 = 0.1 * jax.random.normal(ks[2], (cin,), jnp.float32)
    v1 = jax.random.uniform(ks[3], (cin,), jnp.float32, 0.5, 1.5)
    g2 = jax.random.uniform(ks[4], (cout,), jnp.float32, 0.5, 1.5)
    be2 = 0.1 * jax.random.normal(ks[5], (cout,), jnp.float32)
    m2 = 0.1 * jax.random.normal(ks[6], (cout,), jnp.float32)
    v2 = jax.random.uniform(ks[7], (cout,), jnp.float32, 0.5, 1.5)
    # conv weights stored as (9, Cin, Cout), tap index t = kh*3 + kw
    w1 = 0.1 * jax.random.normal(ks[8], (9, cin, cout), jnp.float32)
    w2 = 0.1 * jax.random.normal(ks[9], (9, cout, cout), jnp.float32)
    s1 = g1 / jnp.sqrt(v1 + _EPS)
    b1 = be1 - m1 * s1
    s2 = g2 / jnp.sqrt(v2 + _EPS)
    b2 = be2 - m2 * s2
    return dict(
        cin=cin, cout=cout,
        w1=w1, w2=w2,                                   # reference layout (f32)
        s1=s1.reshape(cin, 1), b1=b1.reshape(cin, 1),
        s2=s2.reshape(cout, 1), b2=b2.reshape(cout, 1),
        # kernel layout: per-tap (Cout, Cin) in bf16, built once and reused
        w1k=jnp.transpose(w1, (0, 2, 1)).astype(jnp.bfloat16),
        w2k=jnp.transpose(w2, (0, 2, 1)).astype(jnp.bfloat16),
    )


# ----------------------------------------------------------------------------
# Pure-JAX reference (correctness check only)
# ----------------------------------------------------------------------------
def _ref_unit(x, p, downsample):
    cin, cout = p["cin"], p["cout"]

    def bn_relu(z, s, b):
        return jnp.maximum(z * s.reshape(1, -1, 1, 1) + b.reshape(1, -1, 1, 1), 0.0)

    a1 = bn_relu(x, p["s1"], p["b1"])
    stride = (2, 2) if downsample else (1, 1)
    h1 = jax.lax.conv_general_dilated(
        a1, p["w1"].reshape(3, 3, cin, cout), stride, ((1, 1), (1, 1)),
        dimension_numbers=("NCHW", "HWIO", "NCHW"),
        precision=jax.lax.Precision.HIGHEST)
    a2 = bn_relu(h1, p["s2"], p["b2"])
    h2 = jax.lax.conv_general_dilated(
        a2, p["w2"].reshape(3, 3, cout, cout), (1, 1), ((1, 1), (1, 1)),
        dimension_numbers=("NCHW", "HWIO", "NCHW"),
        precision=jax.lax.Precision.HIGHEST)
    if downsample:
        N, C, H, W = x.shape
        ap = x.reshape(N, C, H // 2, 2, W // 2, 2).mean(axis=(3, 5))
        sc = jnp.concatenate([ap, ap], axis=1)
    else:
        sc = x
    return h2 + sc


if __name__ == "__main__":
    # ResidualBlock(in_channels=4, out_channels=8, num_units=2, downsample=True)
    N, Cin, Cout, H, W = 2, 4, 8, 16, 16
    num_units, downsample = 2, True

    key = jax.random.PRNGKey(0)
    kx, kp = jax.random.split(key)
    x = jax.random.normal(kx, (N, Cin, H, W), jnp.float32)   # NCHW, as in PyTorch

    unit_keys = jax.random.split(kp, num_units)
    params = [_init_unit_params(unit_keys[i], Cin if i == 0 else Cout, Cout)
              for i in range(num_units)]

    out = residual_block_forward(x, params, downsample)
    out = jax.block_until_ready(out)
    assert out.shape == (N, Cout, H // 2, W // 2), out.shape

    ref = x
    for i, p in enumerate(params):
        ref = _ref_unit(ref, p, downsample and i == 0)
    ref = jax.block_until_ready(ref)

    # bf16 matmul operands vs the f32 HIGHEST-precision reference
    np.testing.assert_allclose(np.asarray(out), np.asarray(ref), rtol=2e-2, atol=2e-2)
    print("KERNEL_OK")
</pallas_src>

<mosaic_0001>
module attributes {stable_mosaic.version = 11 : i64} {
  func.func @kernel(%arg0: i32, %arg1: memref<2x4x256xf32, #tpu.memory_space<vmem>>, %arg2: memref<9x1x256xf32, #tpu.memory_space<vmem>>, %arg3: memref<9x1x64xf32, #tpu.memory_space<vmem>>, %arg4: memref<256x64xbf16, #tpu.memory_space<vmem>>, %arg5: memref<8x4xbf16, #tpu.memory_space<vmem>>, %arg6: memref<4x1xf32, #tpu.memory_space<vmem>>, %arg7: memref<4x1xf32, #tpu.memory_space<vmem>>, %arg8: memref<9x8x4xbf16, #tpu.memory_space<vmem>>, %arg9: memref<8x1xf32, #tpu.memory_space<vmem>>, %arg10: memref<8x1xf32, #tpu.memory_space<vmem>>, %arg11: memref<9x8x8xbf16, #tpu.memory_space<vmem>>, %arg12: memref<8x1xf32, #tpu.memory_space<vmem>>, %arg13: memref<8x1xf32, #tpu.memory_space<vmem>>, %arg14: memref<9x8x8xbf16, #tpu.memory_space<vmem>>, %arg15: memref<8x1xf32, #tpu.memory_space<vmem>>, %arg16: memref<8x1xf32, #tpu.memory_space<vmem>>, %arg17: memref<9x8x8xbf16, #tpu.memory_space<vmem>>, %arg18: memref<2x8x64xf32, #tpu.memory_space<vmem>>) attributes {dimension_semantics = [#tpu.dimension_semantics<arbitrary>], iteration_bounds = array<i64: 1>, scalar_prefetch = 0 : i64, scratch_operands = 0 : i64, tpu.core_type = #tpu.core_type<tc>, window_params = [{pipeline_mode = #tpu.pipeline_mode<synchronous>, transform_indices = @transform_0, window_bounds = array<i64: 2, 4, 256>}, {pipeline_mode = #tpu.pipeline_mode<synchronous>, transform_indices = @transform_1, window_bounds = array<i64: 9, 1, 256>}, {pipeline_mode = #tpu.pipeline_mode<synchronous>, transform_indices = @transform_2, window_bounds = array<i64: 9, 1, 64>}, {pipeline_mode = #tpu.pipeline_mode<synchronous>, transform_indices = @transform_3, window_bounds = array<i64: 256, 64>}, {pipeline_mode = #tpu.pipeline_mode<synchronous>, transform_indices = @transform_4, window_bounds = array<i64: 8, 4>}, {pipeline_mode = #tpu.pipeline_mode<synchronous>, transform_indices = @transform_5, window_bounds = array<i64: 4, 1>}, {pipeline_mode = #tpu.pipeline_mode<synchronous>, transform_indices = @transform_6, window_bounds = array<i64: 4, 1>}, {pipeline_mode = #tpu.pipeline_mode<synchronous>, transform_indices = @transform_7, window_bounds = array<i64: 9, 8, 4>}, {pipeline_mode = #tpu.pipeline_mode<synchronous>, transform_indices = @transform_8, window_bounds = array<i64: 8, 1>}, {pipeline_mode = #tpu.pipeline_mode<synchronous>, transform_indices = @transform_9, window_bounds = array<i64: 8, 1>}, {pipeline_mode = #tpu.pipeline_mode<synchronous>, transform_indices = @transform_10, window_bounds = array<i64: 9, 8, 8>}, {pipeline_mode = #tpu.pipeline_mode<synchronous>, transform_indices = @transform_11, window_bounds = array<i64: 8, 1>}, {pipeline_mode = #tpu.pipeline_mode<synchronous>, transform_indices = @transform_12, window_bounds = array<i64: 8, 1>}, {pipeline_mode = #tpu.pipeline_mode<synchronous>, transform_indices = @transform_13, window_bounds = array<i64: 9, 8, 8>}, {pipeline_mode = #tpu.pipeline_mode<synchronous>, transform_indices = @transform_14, window_bounds = array<i64: 8, 1>}, {pipeline_mode = #tpu.pipeline_mode<synchronous>, transform_indices = @transform_15, window_bounds = array<i64: 8, 1>}, {pipeline_mode = #tpu.pipeline_mode<synchronous>, transform_indices = @transform_16, window_bounds = array<i64: 9, 8, 8>}, {pipeline_mode = #tpu.pipeline_mode<synchronous>, transform_indices = @transform_17, window_bounds = array<i64: 2, 8, 64>}]} {
    %c0 = arith.constant 0 : index
    %c0_0 = arith.constant 0 : index
    %c0_1 = arith.constant 0 : index
    %0 = vector.load %arg1[%c0, %c0_0, %c0_1] : memref<2x4x256xf32, #tpu.memory_space<vmem>>, vector<1x4x256xf32>
    %1 = vector.shape_cast %0 : vector<1x4x256xf32> to vector<4x256xf32>
    %c0_2 = arith.constant 0 : index
    %c0_3 = arith.constant 0 : index
    %2 = vector.load %arg6[%c0_2, %c0_3] : memref<4x1xf32, #tpu.memory_space<vmem>>, vector<4x1xf32>
    %3 = vector.broadcast %2 : vector<4x1xf32> to vector<4x256xf32>
    %4 = arith.mulf %1, %3 : vector<4x256xf32>
    %c0_4 = arith.constant 0 : index
    %c0_5 = arith.constant 0 : index
    %5 = vector.load %arg7[%c0_4, %c0_5] : memref<4x1xf32, #tpu.memory_space<vmem>>, vector<4x1xf32>
    %6 = vector.broadcast %5 : vector<4x1xf32> to vector<4x256xf32>
    %7 = arith.addf %4, %6 : vector<4x256xf32>
    %cst = arith.constant 0.000000e+00 : f32
    %8 = vector.broadcast %cst : f32 to vector<4x256xf32>
    %9 = arith.maximumf %7, %8 : vector<4x256xf32>
    %c17_i32 = arith.constant 17 : i32
    %10 = tpu.dynamic_rotate %9 by %c17_i32 dim 1 : vector<4x256xf32>, i32 -> vector<4x256xf32>
    %c0_6 = arith.constant 0 : index
    %c0_7 = arith.constant 0 : index
    %c0_8 = arith.constant 0 : index
    %11 = vector.load %arg2[%c0_6, %c0_7, %c0_8] : memref<9x1x256xf32, #tpu.memory_space<vmem>>, vector<1x1x256xf32>
    %12 = vector.shape_cast %11 : vector<1x1x256xf32> to vector<1x256xf32>
    %13 = vector.broadcast %12 : vector<1x256xf32> to vector<4x256xf32>
    %14 = arith.mulf %10, %13 : vector<4x256xf32>
    %c0_9 = arith.constant 0 : index
    %c0_10 = arith.constant 0 : index
    %c0_11 = arith.constant 0 : index
    %15 = vector.load %arg8[%c0_9, %c0_10, %c0_11] : memref<9x8x4xbf16, #tpu.memory_space<vmem>>, vector<1x8x4xbf16>
    %16 = vector.shape_cast %15 : vector<1x8x4xbf16> to vector<8x4xbf16>
    %17 = arith.truncf %14 : vector<4x256xf32> to vector<4x256xbf16>
    %cst_12 = arith.constant dense<0.000000e+00> : vector<8x256xf32>
    %18 = tpu.matmul %16, %17, %cst_12 {dimension_numbers = #tpu.dot_dimension_numbers<[1], [0], [0], [1], [0, 0, 1, 1], [], []>} : vector<8x4xbf16>, vector<4x256xbf16>, vector<8x256xf32> -> vector<8x256xf32>
    %c16_i32 = arith.constant 16 : i32
    %19 = tpu.dynamic_rotate %9 by %c16_i32 dim 1 : vector<4x256xf32>, i32 -> vector<4x256xf32>
    %c1 = arith.constant 1 : index
    %c0_13 = arith.constant 0 : index
    %c0_14 = arith.constant 0 : index
    %20 = vector.load %arg2[%c1, %c0_13, %c0_14] : memref<9x1x256xf32, #tpu.memory_space<vmem>>, vector<1x1x256xf32>
    %21 = vector.shape_cast %20 : vector<1x1x256xf32> to vector<1x256xf32>
    %22 = vector.broadcast %21 : vector<1x256xf32> to vector<4x256xf32>
    %23 = arith.mulf %19, %22 : vector<4x256xf32>
    %c1_15 = arith.constant 1 : index
    %c0_16 = arith.constant 0 : index
    %c0_17 = arith.constant 0 : index
    %24 = vector.load %arg8[%c1_15, %c0_16, %c0_17] : memref<9x8x4xbf16, #tpu.memory_space<vmem>>, vector<1x8x4xbf16>
    %25 = vector.shape_cast %24 : vector<1x8x4xbf16> to vector<8x4xbf16>
    %26 = arith.truncf %23 : vector<4x256xf32> to vector<4x256xbf16>
    %cst_18 = arith.constant dense<0.000000e+00> : vector<8x256xf32>
    %27 = tpu.matmul %25, %26, %cst_18 {dimension_numbers = #tpu.dot_dimension_numbers<[1], [0], [0], [1], [0, 0, 1, 1], [], []>} : vector<8x4xbf16>, vector<4x256xbf16>, vector<8x256xf32> -> vector<8x256xf32>
    %28 = arith.addf %18, %27 : vector<8x256xf32>
    %c15_i32 = arith.constant 15 : i32
    %29 = tpu.dynamic_rotate %9 by %c15_i32 dim 1 : vector<4x256xf32>, i32 -> vector<4x256xf32>
    %c2 = arith.constant 2 : index
    %c0_19 = arith.constant 0 : index
    %c0_20 = arith.constant 0 : index
    %30 = vector.load %arg2[%c2, %c0_19, %c0_20] : memref<9x1x256xf32, #tpu.memory_space<vmem>>, vector<1x1x256xf32>
    %31 = vector.shape_cast %30 : vector<1x1x256xf32> to vector<1x256xf32>
    %32 = vector.broadcast %31 : vector<1x256xf32> to vector<4x256xf32>
    %33 = arith.mulf %29, %32 : vector<4x256xf32>
    %c2_21 = arith.constant 2 : index
    %c0_22 = arith.constant 0 : index
    %c0_23 = arith.constant 0 : index
    %34 = vector.load %arg8[%c2_21, %c0_22, %c0_23] : memref<9x8x4xbf16, #tpu.memory_space<vmem>>, vector<1x8x4xbf16>
    %35 = vector.shape_cast %34 : vector<1x8x4xbf16> to vector<8x4xbf16>
    %36 = arith.truncf %33 : vector<4x256xf32> to vector<4x256xbf16>
    %cst_24 = arith.constant dense<0.000000e+00> : vector<8x256xf32>
    %37 = tpu.matmul %35, %36, %cst_24 {dimension_numbers = #tpu.dot_dimension_numbers<[1], [0], [0], [1], [0, 0, 1, 1], [], []>} : vector<8x4xbf16>, vector<4x256xbf16>, vector<8x256xf32> -> vector<8x256xf32>
    %38 = arith.addf %28, %37 : vector<8x256xf32>
    %c1_i32 = arith.constant 1 : i32
    %39 = tpu.dynamic_rotate %9 by %c1_i32 dim 1 : vector<4x256xf32>, i32 -> vector<4x256xf32>
    %c3 = arith.constant 3 : index
    %c0_25 = arith.constant 0 : index
    %c0_26 = arith.constant 0 : index
    %40 = vector.load %arg2[%c3, %c0_25, %c0_26] : memref<9x1x256xf32, #tpu.memory_space<vmem>>, vector<1x1x256xf32>
    %41 = vector.shape_cast %40 : vector<1x1x256xf32> to vector<1x256xf32>
    %42 = vector.broadcast %41 : vector<1x256xf32> to vector<4x256xf32>
    %43 = arith.mulf %39, %42 : vector<4x256xf32>
    %c3_27 = arith.constant 3 : index
    %c0_28 = arith.constant 0 : index
    %c0_29 = arith.constant 0 : index
    %44 = vector.load %arg8[%c3_27, %c0_28, %c0_29] : memref<9x8x4xbf16, #tpu.memory_space<vmem>>, vector<1x8x4xbf16>
    %45 = vector.shape_cast %44 : vector<1x8x4xbf16> to vector<8x4xbf16>
    %46 = arith.truncf %43 : vector<4x256xf32> to vector<4x256xbf16>
    %cst_30 = arith.constant dense<0.000000e+00> : vector<8x256xf32>
    %47 = tpu.matmul %45, %46, %cst_30 {dimension_numbers = #tpu.dot_dimension_numbers<[1], [0], [0], [1], [0, 0, 1, 1], [], []>} : vector<8x4xbf16>, vector<4x256xbf16>, vector<8x256xf32> -> vector<8x256xf32>
    %48 = arith.addf %38, %47 : vector<8x256xf32>
    %c4 = arith.constant 4 : index
    %c0_31 = arith.constant 0 : index
    %c0_32 = arith.constant 0 : index
    %49 = vector.load %arg8[%c4, %c0_31, %c0_32] : memref<9x8x4xbf16, #tpu.memory_space<vmem>>, vector<1x8x4xbf16>
    %50 = vector.shape_cast %49 : vector<1x8x4xbf16> to vector<8x4xbf16>
    %51 = arith.truncf %9 : vector<4x256xf32> to vector<4x256xbf16>
    %cst_33 = arith.constant dense<0.000000e+00> : vector<8x256xf32>
    %52 = tpu.matmul %50, %51, %cst_33 {dimension_numbers = #tpu.dot_dimension_numbers<[1], [0], [0], [1], [0, 0, 1, 1], [], []>} : vector<8x4xbf16>, vector<4x256xbf16>, vector<8x256xf32> -> vector<8x256xf32>
    %53 = arith.addf %48, %52 : vector<8x256xf32>
    %c255_i32 = arith.constant 255 : i32
    %54 = tpu.dynamic_rotate %9 by %c255_i32 dim 1 : vector<4x256xf32>, i32 -> vector<4x256xf32>
    %c5 = arith.constant 5 : index
    %c0_34 = arith.constant 0 : index
    %c0_35 = arith.constant 0 : index
    %55 = vector.load %arg2[%c5, %c0_34, %c0_35] : memref<9x1x256xf32, #tpu.memory_space<vmem>>, vector<1x1x256xf32>
    %56 = vector.shape_cast %55 : vector<1x1x256xf32> to vector<1x256xf32>
    %57 = vector.broadcast %56 : vector<1x256xf32> to vector<4x256xf32>
    %58 = arith.mulf %54, %57 : vector<4x256xf32>
    %c5_36 = arith.constant 5 : index
    %c0_37 = arith.constant 0 : index
    %c0_38 = arith.constant 0 : index
    %59 = vector.load %arg8[%c5_36, %c0_37, %c0_38] : memref<9x8x4xbf16, #tpu.memory_space<vmem>>, vector<1x8x4xbf16>
    %60 = vector.shape_cast %59 : vector<1x8x4xbf16> to vector<8x4xbf16>
    %61 = arith.truncf %58 : vector<4x256xf32> to vector<4x256xbf16>
    %cst_39 = arith.constant dense<0.000000e+00> : vector<8x256xf32>
    %62 = tpu.matmul %60, %61, %cst_39 {dimension_numbers = #tpu.dot_dimension_numbers<[1], [0], [0], [1], [0, 0, 1, 1], [], []>} : vector<8x4xbf16>, vector<4x256xbf16>, vector<8x256xf32> -> vector<8x256xf32>
    %63 = arith.addf %53, %62 : vector<8x256xf32>
    %c241_i32 = arith.constant 241 : i32
    %64 = tpu.dynamic_rotate %9 by %c241_i32 dim 1 : vector<4x256xf32>, i32 -> vector<4x256xf32>
    %c6 = arith.constant 6 : index
    %c0_40 = arith.constant 0 : index
    %c0_41 = arith.constant 0 : index
    %65 = vector.load %arg2[%c6, %c0_40, %c0_41] : memref<9x1x256xf32, #tpu.memory_space<vmem>>, vector<1x1x256xf32>
    %66 = vector.shape_cast %65 : vector<1x1x256xf32> to vector<1x256xf32>
    %67 = vector.broadcast %66 : vector<1x256xf32> to vector<4x256xf32>
    %68 = arith.mulf %64, %67 : vector<4x256xf32>
    %c6_42 = arith.constant 6 : index
    %c0_43 = arith.constant 0 : index
    %c0_44 = arith.constant 0 : index
    %69 = vector.load %arg8[%c6_42, %c0_43, %c0_44] : memref<9x8x4xbf16, #tpu.memory_space<vmem>>, vector<1x8x4xbf16>
    %70 = vector.shape_cast %69 : vector<1x8x4xbf16> to vector<8x4xbf16>
    %71 = arith.truncf %68 : vector<4x256xf32> to vector<4x256xbf16>
    %cst_45 = arith.constant dense<0.000000e+00> : vector<8x256xf32>
    %72 = tpu.matmul %70, %71, %cst_45 {dimension_numbers = #tpu.dot_dimension_numbers<[1], [0], [0], [1], [0, 0, 1, 1], [], []>} : vector<8x4xbf16>, vector<4x256xbf16>, vector<8x256xf32> -> vector<8x256xf32>
    %73 = arith.addf %63, %72 : vector<8x256xf32>
    %c240_i32 = arith.constant 240 : i32
    %74 = tpu.dynamic_rotate %9 by %c240_i32 dim 1 : vector<4x256xf32>, i32 -> vector<4x256xf32>
    %c7 = arith.constant 7 : index
    %c0_46 = arith.constant 0 : index
    %c0_47 = arith.constant 0 : index
    %75 = vector.load %arg2[%c7, %c0_46, %c0_47] : memref<9x1x256xf32, #tpu.memory_space<vmem>>, vector<1x1x256xf32>
    %76 = vector.shape_cast %75 : vector<1x1x256xf32> to vector<1x256xf32>
    %77 = vector.broadcast %76 : vector<1x256xf32> to vector<4x256xf32>
    %78 = arith.mulf %74, %77 : vector<4x256xf32>
    %c7_48 = arith.constant 7 : index
    %c0_49 = arith.constant 0 : index
    %c0_50 = arith.constant 0 : index
    %79 = vector.load %arg8[%c7_48, %c0_49, %c0_50] : memref<9x8x4xbf16, #tpu.memory_space<vmem>>, vector<1x8x4xbf16>
    %80 = vector.shape_cast %79 : vector<1x8x4xbf16> to vector<8x4xbf16>
    %81 = arith.truncf %78 : vector<4x256xf32> to vector<4x256xbf16>
    %cst_51 = arith.constant dense<0.000000e+00> : vector<8x256xf32>
    %82 = tpu.matmul %80, %81, %cst_51 {dimension_numbers = #tpu.dot_dimension_numbers<[1], [0], [0], [1], [0, 0, 1, 1], [], []>} : vector<8x4xbf16>, vector<4x256xbf16>, vector<8x256xf32> -> vector<8x256xf32>
    %83 = arith.addf %73, %82 : vector<8x256xf32>
    %c239_i32 = arith.constant 239 : i32
    %84 = tpu.dynamic_rotate %9 by %c239_i32 dim 1 : vector<4x256xf32>, i32 -> vector<4x256xf32>
    %c8 = arith.constant 8 : index
    %c0_52 = arith.constant 0 : index
    %c0_53 = arith.constant 0 : index
    %85 = vector.load %arg2[%c8, %c0_52, %c0_53] : memref<9x1x256xf32, #tpu.memory_space<vmem>>, vector<1x1x256xf32>
    %86 = vector.shape_cast %85 : vector<1x1x256xf32> to vector<1x256xf32>
    %87 = vector.broadcast %86 : vector<1x256xf32> to vector<4x256xf32>
    %88 = arith.mulf %84, %87 : vector<4x256xf32>
    %c8_54 = arith.constant 8 : index
    %c0_55 = arith.constant 0 : index
    %c0_56 = arith.constant 0 : index
    %89 = vector.load %arg8[%c8_54, %c0_55, %c0_56] : memref<9x8x4xbf16, #tpu.memory_space<vmem>>, vector<1x8x4xbf16>
    %90 = vector.shape_cast %89 : vector<1x8x4xbf16> to vector<8x4xbf16>
    %91 = arith.truncf %88 : vector<4x256xf32> to vector<4x256xbf16>
    %cst_57 = arith.constant dense<0.000000e+00> : vector<8x256xf32>
    %92 = tpu.matmul %90, %91, %cst_57 {dimension_numbers = #tpu.dot_dimension_numbers<[1], [0], [0], [1], [0, 0, 1, 1], [], []>} : vector<8x4xbf16>, vector<4x256xbf16>, vector<8x256xf32> -> vector<8x256xf32>
    %93 = arith.addf %83, %92 : vector<8x256xf32>
    %c0_58 = arith.constant 0 : index
    %c0_59 = arith.constant 0 : index
    %94 = vector.load %arg4[%c0_58, %c0_59] : memref<256x64xbf16, #tpu.memory_space<vmem>>, vector<256x64xbf16>
    %95 = arith.truncf %93 : vector<8x256xf32> to vector<8x256xbf16>
    %cst_60 = arith.constant dense<0.000000e+00> : vector<8x64xf32>
    %96 = tpu.matmul %95, %94, %cst_60 {dimension_numbers = #tpu.dot_dimension_numbers<[1], [0], [0], [1], [0, 0, 1, 1], [], []>} : vector<8x256xbf16>, vector<256x64xbf16>, vector<8x64xf32> -> vector<8x64xf32>
    %c0_61 = arith.constant 0 : index
    %c0_62 = arith.constant 0 : index
    %97 = vector.load %arg9[%c0_61, %c0_62] : memref<8x1xf32, #tpu.memory_space<vmem>>, vector<8x1xf32>
    %98 = vector.broadcast %97 : vector<8x1xf32> to vector<8x64xf32>
    %99 = arith.mulf %96, %98 : vector<8x64xf32>
    %c0_63 = arith.constant 0 : index
    %c0_64 = arith.constant 0 : index
    %100 = vector.load %arg10[%c0_63, %c0_64] : memref<8x1xf32, #tpu.memory_space<vmem>>, vector<8x1xf32>
    %101 = vector.broadcast %100 : vector<8x1xf32> to vector<8x64xf32>
    %102 = arith.addf %99, %101 : vector<8x64xf32>
    %cst_65 = arith.constant 0.000000e+00 : f32
    %103 = vector.broadcast %cst_65 : f32 to vector<8x64xf32>
    %104 = arith.maximumf %102, %103 : vector<8x64xf32>
    %c9_i32 = arith.constant 9 : i32
    %105 = tpu.dynamic_rotate %104 by %c9_i32 dim 1 : vector<8x64xf32>, i32 -> vector<8x64xf32>
    %c0_66 = arith.constant 0 : index
    %c0_67 = arith.constant 0 : index
    %c0_68 = arith.constant 0 : index
    %106 = vector.load %arg3[%c0_66, %c0_67, %c0_68] : memref<9x1x64xf32, #tpu.memory_space<vmem>>, vector<1x1x64xf32>
    %107 = vector.shape_cast %106 : vector<1x1x64xf32> to vector<1x64xf32>
    %108 = vector.broadcast %107 : vector<1x64xf32> to vector<8x64xf32>
    %109 = arith.mulf %105, %108 : vector<8x64xf32>
    %c0_69 = arith.constant 0 : index
    %c0_70 = arith.constant 0 : index
    %c0_71 = arith.constant 0 : index
    %110 = vector.load %arg11[%c0_69, %c0_70, %c0_71] : memref<9x8x8xbf16, #tpu.memory_space<vmem>>, vector<1x8x8xbf16>
    %111 = vector.shape_cast %110 : vector<1x8x8xbf16> to vector<8x8xbf16>
    %112 = arith.truncf %109 : vector<8x64xf32> to vector<8x64xbf16>
    %cst_72 = arith.constant dense<0.000000e+00> : vector<8x64xf32>
    %113 = tpu.matmul %111, %112, %cst_72 {dimension_numbers = #tpu.dot_dimension_numbers<[1], [0], [0], [1], [0, 0, 1, 1], [], []>} : vector<8x8xbf16>, vector<8x64xbf16>, vector<8x64xf32> -> vector<8x64xf32>
    %c8_i32 = arith.constant 8 : i32
    %114 = tpu.dynamic_rotate %104 by %c8_i32 dim 1 : vector<8x64xf32>, i32 -> vector<8x64xf32>
    %c1_73 = arith.constant 1 : index
    %c0_74 = arith.constant 0 : index
    %c0_75 = arith.constant 0 : index
    %115 = vector.load %arg3[%c1_73, %c0_74, %c0_75] : memref<9x1x64xf32, #tpu.memory_space<vmem>>, vector<1x1x64xf32>
    %116 = vector.shape_cast %115 : vector<1x1x64xf32> to vector<1x64xf32>
    %117 = vector.broadcast %116 : vector<1x64xf32> to vector<8x64xf32>
    %118 = arith.mulf %114, %117 : vector<8x64xf32>
    %c1_76 = arith.constant 1 : index
    %c0_77 = arith.constant 0 : index
    %c0_78 = arith.constant 0 : index
    %119 = vector.load %arg11[%c1_76, %c0_77, %c0_78] : memref<9x8x8xbf16, #tpu.memory_space<vmem>>, vector<1x8x8xbf16>
    %120 = vector.shape_cast %119 : vector<1x8x8xbf16> to vector<8x8xbf16>
    %121 = arith.truncf %118 : vector<8x64xf32> to vector<8x64xbf16>
    %cst_79 = arith.constant dense<0.000000e+00> : vector<8x64xf32>
    %122 = tpu.matmul %120, %121, %cst_79 {dimension_numbers = #tpu.dot_dimension_numbers<[1], [0], [0], [1], [0, 0, 1, 1], [], []>} : vector<8x8xbf16>, vector<8x64xbf16>, vector<8x64xf32> -> vector<8x64xf32>
    %123 = arith.addf %113, %122 : vector<8x64xf32>
    %c7_i32 = arith.constant 7 : i32
    %124 = tpu.dynamic_rotate %104 by %c7_i32 dim 1 : vector<8x64xf32>, i32 -> vector<8x64xf32>
    %c2_80 = arith.constant 2 : index
    %c0_81 = arith.constant 0 : index
    %c0_82 = arith.constant 0 : index
    %125 = vector.load %arg3[%c2_80, %c0_81, %c0_82] : memref<9x1x64xf32, #tpu.memory_space<vmem>>, vector<1x1x64xf32>
    %126 = vector.shape_cast %125 : vector<1x1x64xf32> to vector<1x64xf32>
    %127 = vector.broadcast %126 : vector<1x64xf32> to vector<8x64xf32>
    %128 = arith.mulf %124, %127 : vector<8x64xf32>
    %c2_83 = arith.constant 2 : index
    %c0_84 = arith.constant 0 : index
    %c0_85 = arith.constant 0 : index
    %129 = vector.load %arg11[%c2_83, %c0_84, %c0_85] : memref<9x8x8xbf16, #tpu.memory_space<vmem>>, vector<1x8x8xbf16>
    %130 = vector.shape_cast %129 : vector<1x8x8xbf16> to vector<8x8xbf16>
    %131 = arith.truncf %128 : vector<8x64xf32> to vector<8x64xbf16>
    %cst_86 = arith.constant dense<0.000000e+00> : vector<8x64xf32>
    %132 = tpu.matmul %130, %131, %cst_86 {dimension_numbers = #tpu.dot_dimension_numbers<[1], [0], [0], [1], [0, 0, 1, 1], [], []>} : vector<8x8xbf16>, vector<8x64xbf16>, vector<8x64xf32> -> vector<8x64xf32>
    %133 = arith.addf %123, %132 : vector<8x64xf32>
    %c1_i32_87 = arith.constant 1 : i32
    %134 = tpu.dynamic_rotate %104 by %c1_i32_87 dim 1 : vector<8x64xf32>, i32 -> vector<8x64xf32>
    %c3_88 = arith.constant 3 : index
    %c0_89 = arith.constant 0 : index
    %c0_90 = arith.constant 0 : index
    %135 = vector.load %arg3[%c3_88, %c0_89, %c0_90] : memref<9x1x64xf32, #tpu.memory_space<vmem>>, vector<1x1x64xf32>
    %136 = vector.shape_cast %135 : vector<1x1x64xf32> to vector<1x64xf32>
    %137 = vector.broadcast %136 : vector<1x64xf32> to vector<8x64xf32>
    %138 = arith.mulf %134, %137 : vector<8x64xf32>
    %c3_91 = arith.constant 3 : index
    %c0_92 = arith.constant 0 : index
    %c0_93 = arith.constant 0 : index
    %139 = vector.load %arg11[%c3_91, %c0_92, %c0_93] : memref<9x8x8xbf16, #tpu.memory_space<vmem>>, vector<1x8x8xbf16>
    %140 = vector.shape_cast %139 : vector<1x8x8xbf16> to vector<8x8xbf16>
    %141 = arith.truncf %138 : vector<8x64xf32> to vector<8x64xbf16>
    %cst_94 = arith.constant dense<0.000000e+00> : vector<8x64xf32>
    %142 = tpu.matmul %140, %141, %cst_94 {dimension_numbers = #tpu.dot_dimension_numbers<[1], [0], [0], [1], [0, 0, 1, 1], [], []>} : vector<8x8xbf16>, vector<8x64xbf16>, vector<8x64xf32> -> vector<8x64xf32>
    %143 = arith.addf %133, %142 : vector<8x64xf32>
    %c4_95 = arith.constant 4 : index
    %c0_96 = arith.constant 0 : index
    %c0_97 = arith.constant 0 : index
    %144 = vector.load %arg11[%c4_95, %c0_96, %c0_97] : memref<9x8x8xbf16, #tpu.memory_space<vmem>>, vector<1x8x8xbf16>
    %145 = vector.shape_cast %144 : vector<1x8x8xbf16> to vector<8x8xbf16>
    %146 = arith.truncf %104 : vector<8x64xf32> to vector<8x64xbf16>
    %cst_98 = arith.constant dense<0.000000e+00> : vector<8x64xf32>
    %147 = tpu.matmul %145, %146, %cst_98 {dimension_numbers = #tpu.dot_dimension_numbers<[1], [0], [0], [1], [0, 0, 1, 1], [], []>} : vector<8x8xbf16>, vector<8x64xbf16>, vector<8x64xf32> -> vector<8x64xf32>
    %148 = arith.addf %143, %147 : vector<8x64xf32>
    %c63_i32 = arith.constant 63 : i32
    %149 = tpu.dynamic_rotate %104 by %c63_i32 dim 1 : vector<8x64xf32>, i32 -> vector<8x64xf32>
    %c5_99 = arith.constant 5 : index
    %c0_100 = arith.constant 0 : index
    %c0_101 = arith.constant 0 : index
    %150 = vector.load %arg3[%c5_99, %c0_100, %c0_101] : memref<9x1x64xf32, #tpu.memory_space<vmem>>, vector<1x1x64xf32>
    %151 = vector.shape_cast %150 : vector<1x1x64xf32> to vector<1x64xf32>
    %152 = vector.broadcast %151 : vector<1x64xf32> to vector<8x64xf32>
    %153 = arith.mulf %149, %152 : vector<8x64xf32>
    %c5_102 = arith.constant 5 : index
    %c0_103 = arith.constant 0 : index
    %c0_104 = arith.constant 0 : index
    %154 = vector.load %arg11[%c5_102, %c0_103, %c0_104] : memref<9x8x8xbf16, #tpu.memory_space<vmem>>, vector<1x8x8xbf16>
    %155 = vector.shape_cast %154 : vector<1x8x8xbf16> to vector<8x8xbf16>
    %156 = arith.truncf %153 : vector<8x64xf32> to vector<8x64xbf16>
    %cst_105 = arith.constant dense<0.000000e+00> : vector<8x64xf32>
    %157 = tpu.matmul %155, %156, %cst_105 {dimension_numbers = #tpu.dot_dimension_numbers<[1], [0], [0], [1], [0, 0, 1, 1], [], []>} : vector<8x8xbf16>, vector<8x64xbf16>, vector<8x64xf32> -> vector<8x64xf32>
    %158 = arith.addf %148, %157 : vector<8x64xf32>
    %c57_i32 = arith.constant 57 : i32
    %159 = tpu.dynamic_rotate %104 by %c57_i32 dim 1 : vector<8x64xf32>, i32 -> vector<8x64xf32>
    %c6_106 = arith.constant 6 : index
    %c0_107 = arith.constant 0 : index
    %c0_108 = arith.constant 0 : index
    %160 = vector.load %arg3[%c6_106, %c0_107, %c0_108] : memref<9x1x64xf32, #tpu.memory_space<vmem>>, vector<1x1x64xf32>
    %161 = vector.shape_cast %160 : vector<1x1x64xf32> to vector<1x64xf32>
    %162 = vector.broadcast %161 : vector<1x64xf32> to vector<8x64xf32>
    %163 = arith.mulf %159, %162 : vector<8x64xf32>
    %c6_109 = arith.constant 6 : index
    %c0_110 = arith.constant 0 : index
    %c0_111 = arith.constant 0 : index
    %164 = vector.load %arg11[%c6_109, %c0_110, %c0_111] : memref<9x8x8xbf16, #tpu.memory_space<vmem>>, vector<1x8x8xbf16>
    %165 = vector.shape_cast %164 : vector<1x8x8xbf16> to vector<8x8xbf16>
    %166 = arith.truncf %163 : vector<8x64xf32> to vector<8x64xbf16>
    %cst_112 = arith.constant dense<0.000000e+00> : vector<8x64xf32>
    %167 = tpu.matmul %165, %166, %cst_112 {dimension_numbers = #tpu.dot_dimension_numbers<[1], [0], [0], [1], [0, 0, 1, 1], [], []>} : vector<8x8xbf16>, vector<8x64xbf16>, vector<8x64xf32> -> vector<8x64xf32>
    %168 = arith.addf %158, %167 : vector<8x64xf32>
    %c56_i32 = arith.constant 56 : i32
    %169 = tpu.dynamic_rotate %104 by %c56_i32 dim 1 : vector<8x64xf32>, i32 -> vector<8x64xf32>
    %c7_113 = arith.constant 7 : index
    %c0_114 = arith.constant 0 : index
    %c0_115 = arith.constant 0 : index
    %170 = vector.load %arg3[%c7_113, %c0_114, %c0_115] : memref<9x1x64xf32, #tpu.memory_space<vmem>>, vector<1x1x64xf32>
    %171 = vector.shape_cast %170 : vector<1x1x64xf32> to vector<1x64xf32>
    %172 = vector.broadcast %171 : vector<1x64xf32> to vector<8x64xf32>
    %173 = arith.mulf %169, %172 : vector<8x64xf32>
    %c7_116 = arith.constant 7 : index
    %c0_117 = arith.constant 0 : index
    %c0_118 = arith.constant 0 : index
    %174 = vector.load %arg11[%c7_116, %c0_117, %c0_118] : memref<9x8x8xbf16, #tpu.memory_space<vmem>>, vector<1x8x8xbf16>
    %175 = vector.shape_cast %174 : vector<1x8x8xbf16> to vector<8x8xbf16>
    %176 = arith.truncf %173 : vector<8x64xf32> to vector<8x64xbf16>
    %cst_119 = arith.constant dense<0.000000e+00> : vector<8x64xf32>
    %177 = tpu.matmul %175, %176, %cst_119 {dimension_numbers = #tpu.dot_dimension_numbers<[1], [0], [0], [1], [0, 0, 1, 1], [], []>} : vector<8x8xbf16>, vector<8x64xbf16>, vector<8x64xf32> -> vector<8x64xf32>
    %178 = arith.addf %168, %177 : vector<8x64xf32>
    %c55_i32 = arith.constant 55 : i32
    %179 = tpu.dynamic_rotate %104 by %c55_i32 dim 1 : vector<8x64xf32>, i32 -> vector<8x64xf32>
    %c8_120 = arith.constant 8 : index
    %c0_121 = arith.constant 0 : index
    %c0_122 = arith.constant 0 : index
    %180 = vector.load %arg3[%c8_120, %c0_121, %c0_122] : memref<9x1x64xf32, #tpu.memory_space<vmem>>, vector<1x1x64xf32>
    %181 = vector.shape_cast %180 : vector<1x1x64xf32> to vector<1x64xf32>
    %182 = vector.broadcast %181 : vector<1x64xf32> to vector<8x64xf32>
    %183 = arith.mulf %179, %182 : vector<8x64xf32>
    %c8_123 = arith.constant 8 : index
    %c0_124 = arith.constant 0 : index
    %c0_125 = arith.constant 0 : index
    %184 = vector.load %arg11[%c8_123, %c0_124, %c0_125] : memref<9x8x8xbf16, #tpu.memory_space<vmem>>, vector<1x8x8xbf16>
    %185 = vector.shape_cast %184 : vector<1x8x8xbf16> to vector<8x8xbf16>
    %186 = arith.truncf %183 : vector<8x64xf32> to vector<8x64xbf16>
    %cst_126 = arith.constant dense<0.000000e+00> : vector<8x64xf32>
    %187 = tpu.matmul %185, %186, %cst_126 {dimension_numbers = #tpu.dot_dimension_numbers<[1], [0], [0], [1], [0, 0, 1, 1], [], []>} : vector<8x8xbf16>, vector<8x64xbf16>, vector<8x64xf32> -> vector<8x64xf32>
    %188 = arith.addf %178, %187 : vector<8x64xf32>
    %c255_i32_127 = arith.constant 255 : i32
    %189 = tpu.dynamic_rotate %1 by %c255_i32_127 dim 1 : vector<4x256xf32>, i32 -> vector<4x256xf32>
    %190 = arith.addf %1, %189 : vector<4x256xf32>
    %c240_i32_128 = arith.constant 240 : i32
    %191 = tpu.dynamic_rotate %1 by %c240_i32_128 dim 1 : vector<4x256xf32>, i32 -> vector<4x256xf32>
    %192 = arith.addf %190, %191 : vector<4x256xf32>
    %c239_i32_129 = arith.constant 239 : i32
    %193 = tpu.dynamic_rotate %1 by %c239_i32_129 dim 1 : vector<4x256xf32>, i32 -> vector<4x256xf32>
    %194 = arith.addf %192, %193 : vector<4x256xf32>
    %195 = arith.truncf %194 : vector<4x256xf32> to vector<4x256xbf16>
    %cst_130 = arith.constant dense<0.000000e+00> : vector<4x64xf32>
    %196 = tpu.matmul %195, %94, %cst_130 {dimension_numbers = #tpu.dot_dimension_numbers<[1], [0], [0], [1], [0, 0, 1, 1], [], []>} : vector<4x256xbf16>, vector<256x64xbf16>, vector<4x64xf32> -> vector<4x64xf32>
    %cst_131 = arith.constant 2.500000e-01 : f32
    %197 = vector.broadcast %cst_131 : f32 to vector<4x64xf32>
    %198 = arith.mulf %197, %196 : vector<4x64xf32>
    %c0_132 = arith.constant 0 : index
    %c0_133 = arith.constant 0 : index
    %199 = vector.load %arg5[%c0_132, %c0_133] : memref<8x4xbf16, #tpu.memory_space<vmem>>, vector<8x4xbf16>
    %200 = arith.truncf %198 : vector<4x64xf32> to vector<4x64xbf16>
    %cst_134 = arith.constant dense<0.000000e+00> : vector<8x64xf32>
    %201 = tpu.matmul %199, %200, %cst_134 {dimension_numbers = #tpu.dot_dimension_numbers<[1], [0], [0], [1], [0, 0, 1, 1], [], []>} : vector<8x4xbf16>, vector<4x64xbf16>, vector<8x64xf32> -> vector<8x64xf32>
    %202 = arith.addf %188, %201 : vector<8x64xf32>
    %c0_135 = arith.constant 0 : index
    %c0_136 = arith.constant 0 : index
    %203 = vector.load %arg12[%c0_135, %c0_136] : memref<8x1xf32, #tpu.memory_space<vmem>>, vector<8x1xf32>
    %204 = vector.broadcast %203 : vector<8x1xf32> to vector<8x64xf32>
    %205 = arith.mulf %202, %204 : vector<8x64xf32>
    %c0_137 = arith.constant 0 : index
    %c0_138 = arith.constant 0 : index
    %206 = vector.load %arg13[%c0_137, %c0_138] : memref<8x1xf32, #tpu.memory_space<vmem>>, vector<8x1xf32>
    %207 = vector.broadcast %206 : vector<8x1xf32> to vector<8x64xf32>
    %208 = arith.addf %205, %207 : vector<8x64xf32>
    %cst_139 = arith.constant 0.000000e+00 : f32
    %209 = vector.broadcast %cst_139 : f32 to vector<8x64xf32>
    %210 = arith.maximumf %208, %209 : vector<8x64xf32>
    %c9_i32_140 = arith.constant 9 : i32
    %211 = tpu.dynamic_rotate %210 by %c9_i32_140 dim 1 : vector<8x64xf32>, i32 -> vector<8x64xf32>
    %c0_141 = arith.constant 0 : index
    %c0_142 = arith.constant 0 : index
    %c0_143 = arith.constant 0 : index
    %212 = vector.load %arg3[%c0_141, %c0_142, %c0_143] : memref<9x1x64xf32, #tpu.memory_space<vmem>>, vector<1x1x64xf32>
    %213 = vector.shape_cast %212 : vector<1x1x64xf32> to vector<1x64xf32>
    %214 = vector.broadcast %213 : vector<1x64xf32> to vector<8x64xf32>
    %215 = arith.mulf %211, %214 : vector<8x64xf32>
    %c0_144 = arith.constant 0 : index
    %c0_145 = arith.constant 0 : index
    %c0_146 = arith.constant 0 : index
    %216 = vector.load %arg14[%c0_144, %c0_145, %c0_146] : memref<9x8x8xbf16, #tpu.memory_space<vmem>>, vector<1x8x8xbf16>
    %217 = vector.shape_cast %216 : vector<1x8x8xbf16> to vector<8x8xbf16>
    %218 = arith.truncf %215 : vector<8x64xf32> to vector<8x64xbf16>
    %cst_147 = arith.constant dense<0.000000e+00> : vector<8x64xf32>
    %219 = tpu.matmul %217, %218, %cst_147 {dimension_numbers = #tpu.dot_dimension_numbers<[1], [0], [0], [1], [0, 0, 1, 1], [], []>} : vector<8x8xbf16>, vector<8x64xbf16>, vector<8x64xf32> -> vector<8x64xf32>
    %c8_i32_148 = arith.constant 8 : i32
    %220 = tpu.dynamic_rotate %210 by %c8_i32_148 dim 1 : vector<8x64xf32>, i32 -> vector<8x64xf32>
    %c1_149 = arith.constant 1 : index
    %c0_150 = arith.constant 0 : index
    %c0_151 = arith.constant 0 : index
    %221 = vector.load %arg3[%c1_149, %c0_150, %c0_151] : memref<9x1x64xf32, #tpu.memory_space<vmem>>, vector<1x1x64xf32>
    %222 = vector.shape_cast %221 : vector<1x1x64xf32> to vector<1x64xf32>
    %223 = vector.broadcast %222 : vector<1x64xf32> to vector<8x64xf32>
    %224 = arith.mulf %220, %223 : vector<8x64xf32>
    %c1_152 = arith.constant 1 : index
    %c0_153 = arith.constant 0 : index
    %c0_154 = arith.constant 0 : index
    %225 = vector.load %arg14[%c1_152, %c0_153, %c0_154] : memref<9x8x8xbf16, #tpu.memory_space<vmem>>, vector<1x8x8xbf16>
    %226 = vector.shape_cast %225 : vector<1x8x8xbf16> to vector<8x8xbf16>
    %227 = arith.truncf %224 : vector<8x64xf32> to vector<8x64xbf16>
    %cst_155 = arith.constant dense<0.000000e+00> : vector<8x64xf32>
    %228 = tpu.matmul %226, %227, %cst_155 {dimension_numbers = #tpu.dot_dimension_numbers<[1], [0], [0], [1], [0, 0, 1, 1], [], []>} : vector<8x8xbf16>, vector<8x64xbf16>, vector<8x64xf32> -> vector<8x64xf32>
    %229 = arith.addf %219, %228 : vector<8x64xf32>
    %c7_i32_156 = arith.constant 7 : i32
    %230 = tpu.dynamic_rotate %210 by %c7_i32_156 dim 1 : vector<8x64xf32>, i32 -> vector<8x64xf32>
    %c2_157 = arith.constant 2 : index
    %c0_158 = arith.constant 0 : index
    %c0_159 = arith.constant 0 : index
    %231 = vector.load %arg3[%c2_157, %c0_158, %c0_159] : memref<9x1x64xf32, #tpu.memory_space<vmem>>, vector<1x1x64xf32>
    %232 = vector.shape_cast %231 : vector<1x1x64xf32> to vector<1x64xf32>
    %233 = vector.broadcast %232 : vector<1x64xf32> to vector<8x64xf32>
    %234 = arith.mulf %230, %233 : vector<8x64xf32>
    %c2_160 = arith.constant 2 : index
    %c0_161 = arith.constant 0 : index
    %c0_162 = arith.constant 0 : index
    %235 = vector.load %arg14[%c2_160, %c0_161, %c0_162] : memref<9x8x8xbf16, #tpu.memory_space<vmem>>, vector<1x8x8xbf16>
    %236 = vector.shape_cast %235 : vector<1x8x8xbf16> to vector<8x8xbf16>
    %237 = arith.truncf %234 : vector<8x64xf32> to vector<8x64xbf16>
    %cst_163 = arith.constant dense<0.000000e+00> : vector<8x64xf32>
    %238 = tpu.matmul %236, %237, %cst_163 {dimension_numbers = #tpu.dot_dimension_numbers<[1], [0], [0], [1], [0, 0, 1, 1], [], []>} : vector<8x8xbf16>, vector<8x64xbf16>, vector<8x64xf32> -> vector<8x64xf32>
    %239 = arith.addf %229, %238 : vector<8x64xf32>
    %c1_i32_164 = arith.constant 1 : i32
    %240 = tpu.dynamic_rotate %210 by %c1_i32_164 dim 1 : vector<8x64xf32>, i32 -> vector<8x64xf32>
    %c3_165 = arith.constant 3 : index
    %c0_166 = arith.constant 0 : index
    %c0_167 = arith.constant 0 : index
    %241 = vector.load %arg3[%c3_165, %c0_166, %c0_167] : memref<9x1x64xf32, #tpu.memory_space<vmem>>, vector<1x1x64xf32>
    %242 = vector.shape_cast %241 : vector<1x1x64xf32> to vector<1x64xf32>
    %243 = vector.broadcast %242 : vector<1x64xf32> to vector<8x64xf32>
    %244 = arith.mulf %240, %243 : vector<8x64xf32>
    %c3_168 = arith.constant 3 : index
    %c0_169 = arith.constant 0 : index
    %c0_170 = arith.constant 0 : index
    %245 = vector.load %arg14[%c3_168, %c0_169, %c0_170] : memref<9x8x8xbf16, #tpu.memory_space<vmem>>, vector<1x8x8xbf16>
    %246 = vector.shape_cast %245 : vector<1x8x8xbf16> to vector<8x8xbf16>
    %247 = arith.truncf %244 : vector<8x64xf32> to vector<8x64xbf16>
    %cst_171 = arith.constant dense<0.000000e+00> : vector<8x64xf32>
    %248 = tpu.matmul %246, %247, %cst_171 {dimension_numbers = #tpu.dot_dimension_numbers<[1], [0], [0], [1], [0, 0, 1, 1], [], []>} : vector<8x8xbf16>, vector<8x64xbf16>, vector<8x64xf32> -> vector<8x64xf32>
    %249 = arith.addf %239, %248 : vector<8x64xf32>
    %c4_172 = arith.constant 4 : index
    %c0_173 = arith.constant 0 : index
    %c0_174 = arith.constant 0 : index
    %250 = vector.load %arg14[%c4_172, %c0_173, %c0_174] : memref<9x8x8xbf16, #tpu.memory_space<vmem>>, vector<1x8x8xbf16>
    %251 = vector.shape_cast %250 : vector<1x8x8xbf16> to vector<8x8xbf16>
    %252 = arith.truncf %210 : vector<8x64xf32> to vector<8x64xbf16>
    %cst_175 = arith.constant dense<0.000000e+00> : vector<8x64xf32>
    %253 = tpu.matmul %251, %252, %cst_175 {dimension_numbers = #tpu.dot_dimension_numbers<[1], [0], [0], [1], [0, 0, 1, 1], [], []>} : vector<8x8xbf16>, vector<8x64xbf16>, vector<8x64xf32> -> vector<8x64xf32>
    %254 = arith.addf %249, %253 : vector<8x64xf32>
    %c63_i32_176 = arith.constant 63 : i32
    %255 = tpu.dynamic_rotate %210 by %c63_i32_176 dim 1 : vector<8x64xf32>, i32 -> vector<8x64xf32>
    %c5_177 = arith.constant 5 : index
    %c0_178 = arith.constant 0 : index
    %c0_179 = arith.constant 0 : index
    %256 = vector.load %arg3[%c5_177, %c0_178, %c0_179] : memref<9x1x64xf32, #tpu.memory_space<vmem>>, vector<1x1x64xf32>
    %257 = vector.shape_cast %256 : vector<1x1x64xf32> to vector<1x64xf32>
    %258 = vector.broadcast %257 : vector<1x64xf32> to vector<8x64xf32>
    %259 = arith.mulf %255, %258 : vector<8x64xf32>
    %c5_180 = arith.constant 5 : index
    %c0_181 = arith.constant 0 : index
    %c0_182 = arith.constant 0 : index
    %260 = vector.load %arg14[%c5_180, %c0_181, %c0_182] : memref<9x8x8xbf16, #tpu.memory_space<vmem>>, vector<1x8x8xbf16>
    %261 = vector.shape_cast %260 : vector<1x8x8xbf16> to vector<8x8xbf16>
    %262 = arith.truncf %259 : vector<8x64xf32> to vector<8x64xbf16>
    %cst_183 = arith.constant dense<0.000000e+00> : vector<8x64xf32>
    %263 = tpu.matmul %261, %262, %cst_183 {dimension_numbers = #tpu.dot_dimension_numbers<[1], [0], [0], [1], [0, 0, 1, 1], [], []>} : vector<8x8xbf16>, vector<8x64xbf16>, vector<8x64xf32> -> vector<8x64xf32>
    %264 = arith.addf %254, %263 : vector<8x64xf32>
    %c57_i32_184 = arith.constant 57 : i32
    %265 = tpu.dynamic_rotate %210 by %c57_i32_184 dim 1 : vector<8x64xf32>, i32 -> vector<8x64xf32>
    %c6_185 = arith.constant 6 : index
    %c0_186 = arith.constant 0 : index
    %c0_187 = arith.constant 0 : index
    %266 = vector.load %arg3[%c6_185, %c0_186, %c0_187] : memref<9x1x64xf32, #tpu.memory_space<vmem>>, vector<1x1x64xf32>
    %267 = vector.shape_cast %266 : vector<1x1x64xf32> to vector<1x64xf32>
    %268 = vector.broadcast %267 : vector<1x64xf32> to vector<8x64xf32>
    %269 = arith.mulf %265, %268 : vector<8x64xf32>
    %c6_188 = arith.constant 6 : index
    %c0_189 = arith.constant 0 : index
    %c0_190 = arith.constant 0 : index
    %270 = vector.load %arg14[%c6_188, %c0_189, %c0_190] : memref<9x8x8xbf16, #tpu.memory_space<vmem>>, vector<1x8x8xbf16>
    %271 = vector.shape_cast %270 : vector<1x8x8xbf16> to vector<8x8xbf16>
    %272 = arith.truncf %269 : vector<8x64xf32> to vector<8x64xbf16>
    %cst_191 = arith.constant dense<0.000000e+00> : vector<8x64xf32>
    %273 = tpu.matmul %271, %272, %cst_191 {dimension_numbers = #tpu.dot_dimension_numbers<[1], [0], [0], [1], [0, 0, 1, 1], [], []>} : vector<8x8xbf16>, vector<8x64xbf16>, vector<8x64xf32> -> vector<8x64xf32>
    %274 = arith.addf %264, %273 : vector<8x64xf32>
    %c56_i32_192 = arith.constant 56 : i32
    %275 = tpu.dynamic_rotate %210 by %c56_i32_192 dim 1 : vector<8x64xf32>, i32 -> vector<8x64xf32>
    %c7_193 = arith.constant 7 : index
    %c0_194 = arith.constant 0 : index
    %c0_195 = arith.constant 0 : index
    %276 = vector.load %arg3[%c7_193, %c0_194, %c0_195] : memref<9x1x64xf32, #tpu.memory_space<vmem>>, vector<1x1x64xf32>
    %277 = vector.shape_cast %276 : vector<1x1x64xf32> to vector<1x64xf32>
    %278 = vector.broadcast %277 : vector<1x64xf32> to vector<8x64xf32>
    %279 = arith.mulf %275, %278 : vector<8x64xf32>
    %c7_196 = arith.constant 7 : index
    %c0_197 = arith.constant 0 : index
    %c0_198 = arith.constant 0 : index
    %280 = vector.load %arg14[%c7_196, %c0_197, %c0_198] : memref<9x8x8xbf16, #tpu.memory_space<vmem>>, vector<1x8x8xbf16>
    %281 = vector.shape_cast %280 : vector<1x8x8xbf16> to vector<8x8xbf16>
    %282 = arith.truncf %279 : vector<8x64xf32> to vector<8x64xbf16>
    %cst_199 = arith.constant dense<0.000000e+00> : vector<8x64xf32>
    %283 = tpu.matmul %281, %282, %cst_199 {dimension_numbers = #tpu.dot_dimension_numbers<[1], [0], [0], [1], [0, 0, 1, 1], [], []>} : vector<8x8xbf16>, vector<8x64xbf16>, vector<8x64xf32> -> vector<8x64xf32>
    %284 = arith.addf %274, %283 : vector<8x64xf32>
    %c55_i32_200 = arith.constant 55 : i32
    %285 = tpu.dynamic_rotate %210 by %c55_i32_200 dim 1 : vector<8x64xf32>, i32 -> vector<8x64xf32>
    %c8_201 = arith.constant 8 : index
    %c0_202 = arith.constant 0 : index
    %c0_203 = arith.constant 0 : index
    %286 = vector.load %arg3[%c8_201, %c0_202, %c0_203] : memref<9x1x64xf32, #tpu.memory_space<vmem>>, vector<1x1x64xf32>
    %287 = vector.shape_cast %286 : vector<1x1x64xf32> to vector<1x64xf32>
    %288 = vector.broadcast %287 : vector<1x64xf32> to vector<8x64xf32>
    %289 = arith.mulf %285, %288 : vector<8x64xf32>
    %c8_204 = arith.constant 8 : index
    %c0_205 = arith.constant 0 : index
    %c0_206 = arith.constant 0 : index
    %290 = vector.load %arg14[%c8_204, %c0_205, %c0_206] : memref<9x8x8xbf16, #tpu.memory_space<vmem>>, vector<1x8x8xbf16>
    %291 = vector.shape_cast %290 : vector<1x8x8xbf16> to vector<8x8xbf16>
    %292 = arith.truncf %289 : vector<8x64xf32> to vector<8x64xbf16>
    %cst_207 = arith.constant dense<0.000000e+00> : vector<8x64xf32>
    %293 = tpu.matmul %291, %292, %cst_207 {dimension_numbers = #tpu.dot_dimension_numbers<[1], [0], [0], [1], [0, 0, 1, 1], [], []>} : vector<8x8xbf16>, vector<8x64xbf16>, vector<8x64xf32> -> vector<8x64xf32>
    %294 = arith.addf %284, %293 : vector<8x64xf32>
    %c0_208 = arith.constant 0 : index
    %c0_209 = arith.constant 0 : index
    %295 = vector.load %arg15[%c0_208, %c0_209] : memref<8x1xf32, #tpu.memory_space<vmem>>, vector<8x1xf32>
    %296 = vector.broadcast %295 : vector<8x1xf32> to vector<8x64xf32>
    %297 = arith.mulf %294, %296 : vector<8x64xf32>
    %c0_210 = arith.constant 0 : index
    %c0_211 = arith.constant 0 : index
    %298 = vector.load %arg16[%c0_210, %c0_211] : memref<8x1xf32, #tpu.memory_space<vmem>>, vector<8x1xf32>
    %299 = vector.broadcast %298 : vector<8x1xf32> to vector<8x64xf32>
    %300 = arith.addf %297, %299 : vector<8x64xf32>
    %cst_212 = arith.constant 0.000000e+00 : f32
    %301 = vector.broadcast %cst_212 : f32 to vector<8x64xf32>
    %302 = arith.maximumf %300, %301 : vector<8x64xf32>
    %c9_i32_213 = arith.constant 9 : i32
    %303 = tpu.dynamic_rotate %302 by %c9_i32_213 dim 1 : vector<8x64xf32>, i32 -> vector<8x64xf32>
    %c0_214 = arith.constant 0 : index
    %c0_215 = arith.constant 0 : index
    %c0_216 = arith.constant 0 : index
    %304 = vector.load %arg3[%c0_214, %c0_215, %c0_216] : memref<9x1x64xf32, #tpu.memory_space<vmem>>, vector<1x1x64xf32>
    %305 = vector.shape_cast %304 : vector<1x1x64xf32> to vector<1x64xf32>
    %306 = vector.broadcast %305 : vector<1x64xf32> to vector<8x64xf32>
    %307 = arith.mulf %303, %306 : vector<8x64xf32>
    %c0_217 = arith.constant 0 : index
    %c0_218 = arith.constant 0 : index
    %c0_219 = arith.constant 0 : index
    %308 = vector.load %arg17[%c0_217, %c0_218, %c0_219] : memref<9x8x8xbf16, #tpu.memory_space<vmem>>, vector<1x8x8xbf16>
    %309 = vector.shape_cast %308 : vector<1x8x8xbf16> to vector<8x8xbf16>
    %310 = arith.truncf %307 : vector<8x64xf32> to vector<8x64xbf16>
    %cst_220 = arith.constant dense<0.000000e+00> : vector<8x64xf32>
    %311 = tpu.matmul %309, %310, %cst_220 {dimension_numbers = #tpu.dot_dimension_numbers<[1], [0], [0], [1], [0, 0, 1, 1], [], []>} : vector<8x8xbf16>, vector<8x64xbf16>, vector<8x64xf32> -> vector<8x64xf32>
    %c8_i32_221 = arith.constant 8 : i32
    %312 = tpu.dynamic_rotate %302 by %c8_i32_221 dim 1 : vector<8x64xf32>, i32 -> vector<8x64xf32>
    %c1_222 = arith.constant 1 : index
    %c0_223 = arith.constant 0 : index
    %c0_224 = arith.constant 0 : index
    %313 = vector.load %arg3[%c1_222, %c0_223, %c0_224] : memref<9x1x64xf32, #tpu.memory_space<vmem>>, vector<1x1x64xf32>
    %314 = vector.shape_cast %313 : vector<1x1x64xf32> to vector<1x64xf32>
    %315 = vector.broadcast %314 : vector<1x64xf32> to vector<8x64xf32>
    %316 = arith.mulf %312, %315 : vector<8x64xf32>
    %c1_225 = arith.constant 1 : index
    %c0_226 = arith.constant 0 : index
    %c0_227 = arith.constant 0 : index
    %317 = vector.load %arg17[%c1_225, %c0_226, %c0_227] : memref<9x8x8xbf16, #tpu.memory_space<vmem>>, vector<1x8x8xbf16>
    %318 = vector.shape_cast %317 : vector<1x8x8xbf16> to vector<8x8xbf16>
    %319 = arith.truncf %316 : vector<8x64xf32> to vector<8x64xbf16>
    %cst_228 = arith.constant dense<0.000000e+00> : vector<8x64xf32>
    %320 = tpu.matmul %318, %319, %cst_228 {dimension_numbers = #tpu.dot_dimension_numbers<[1], [0], [0], [1], [0, 0, 1, 1], [], []>} : vector<8x8xbf16>, vector<8x64xbf16>, vector<8x64xf32> -> vector<8x64xf32>
    %321 = arith.addf %311, %320 : vector<8x64xf32>
    %c7_i32_229 = arith.constant 7 : i32
    %322 = tpu.dynamic_rotate %302 by %c7_i32_229 dim 1 : vector<8x64xf32>, i32 -> vector<8x64xf32>
    %c2_230 = arith.constant 2 : index
    %c0_231 = arith.constant 0 : index
    %c0_232 = arith.constant 0 : index
    %323 = vector.load %arg3[%c2_230, %c0_231, %c0_232] : memref<9x1x64xf32, #tpu.memory_space<vmem>>, vector<1x1x64xf32>
    %324 = vector.shape_cast %323 : vector<1x1x64xf32> to vector<1x64xf32>
    %325 = vector.broadcast %324 : vector<1x64xf32> to vector<8x64xf32>
    %326 = arith.mulf %322, %325 : vector<8x64xf32>
    %c2_233 = arith.constant 2 : index
    %c0_234 = arith.constant 0 : index
    %c0_235 = arith.constant 0 : index
    %327 = vector.load %arg17[%c2_233, %c0_234, %c0_235] : memref<9x8x8xbf16, #tpu.memory_space<vmem>>, vector<1x8x8xbf16>
    %328 = vector.shape_cast %327 : vector<1x8x8xbf16> to vector<8x8xbf16>
    %329 = arith.truncf %326 : vector<8x64xf32> to vector<8x64xbf16>
    %cst_236 = arith.constant dense<0.000000e+00> : vector<8x64xf32>
    %330 = tpu.matmul %328, %329, %cst_236 {dimension_numbers = #tpu.dot_dimension_numbers<[1], [0], [0], [1], [0, 0, 1, 1], [], []>} : vector<8x8xbf16>, vector<8x64xbf16>, vector<8x64xf32> -> vector<8x64xf32>
    %331 = arith.addf %321, %330 : vector<8x64xf32>
    %c1_i32_237 = arith.constant 1 : i32
    %332 = tpu.dynamic_rotate %302 by %c1_i32_237 dim 1 : vector<8x64xf32>, i32 -> vector<8x64xf32>
    %c3_238 = arith.constant 3 : index
    %c0_239 = arith.constant 0 : index
    %c0_240 = arith.constant 0 : index
    %333 = vector.load %arg3[%c3_238, %c0_239, %c0_240] : memref<9x1x64xf32, #tpu.memory_space<vmem>>, vector<1x1x64xf32>
    %334 = vector.shape_cast %333 : vector<1x1x64xf32> to vector<1x64xf32>
    %335 = vector.broadcast %334 : vector<1x64xf32> to vector<8x64xf32>
    %336 = arith.mulf %332, %335 : vector<8x64xf32>
    %c3_241 = arith.constant 3 : index
    %c0_242 = arith.constant 0 : index
    %c0_243 = arith.constant 0 : index
    %337 = vector.load %arg17[%c3_241, %c0_242, %c0_243] : memref<9x8x8xbf16, #tpu.memory_space<vmem>>, vector<1x8x8xbf16>
    %338 = vector.shape_cast %337 : vector<1x8x8xbf16> to vector<8x8xbf16>
    %339 = arith.truncf %336 : vector<8x64xf32> to vector<8x64xbf16>
    %cst_244 = arith.constant dense<0.000000e+00> : vector<8x64xf32>
    %340 = tpu.matmul %338, %339, %cst_244 {dimension_numbers = #tpu.dot_dimension_numbers<[1], [0], [0], [1], [0, 0, 1, 1], [], []>} : vector<8x8xbf16>, vector<8x64xbf16>, vector<8x64xf32> -> vector<8x64xf32>
    %341 = arith.addf %331, %340 : vector<8x64xf32>
    %c4_245 = arith.constant 4 : index
    %c0_246 = arith.constant 0 : index
    %c0_247 = arith.constant 0 : index
    %342 = vector.load %arg17[%c4_245, %c0_246, %c0_247] : memref<9x8x8xbf16, #tpu.memory_space<vmem>>, vector<1x8x8xbf16>
    %343 = vector.shape_cast %342 : vector<1x8x8xbf16> to vector<8x8xbf16>
    %344 = arith.truncf %302 : vector<8x64xf32> to vector<8x64xbf16>
    %cst_248 = arith.constant dense<0.000000e+00> : vector<8x64xf32>
    %345 = tpu.matmul %343, %344, %cst_248 {dimension_numbers = #tpu.dot_dimension_numbers<[1], [0], [0], [1], [0, 0, 1, 1], [], []>} : vector<8x8xbf16>, vector<8x64xbf16>, vector<8x64xf32> -> vector<8x64xf32>
    %346 = arith.addf %341, %345 : vector<8x64xf32>
    %c63_i32_249 = arith.constant 63 : i32
    %347 = tpu.dynamic_rotate %302 by %c63_i32_249 dim 1 : vector<8x64xf32>, i32 -> vector<8x64xf32>
    %c5_250 = arith.constant 5 : index
    %c0_251 = arith.constant 0 : index
    %c0_252 = arith.constant 0 : index
    %348 = vector.load %arg3[%c5_250, %c0_251, %c0_252] : memref<9x1x64xf32, #tpu.memory_space<vmem>>, vector<1x1x64xf32>
    %349 = vector.shape_cast %348 : vector<1x1x64xf32> to vector<1x64xf32>
    %350 = vector.broadcast %349 : vector<1x64xf32> to vector<8x64xf32>
    %351 = arith.mulf %347, %350 : vector<8x64xf32>
    %c5_253 = arith.constant 5 : index
    %c0_254 = arith.constant 0 : index
    %c0_255 = arith.constant 0 : index
    %352 = vector.load %arg17[%c5_253, %c0_254, %c0_255] : memref<9x8x8xbf16, #tpu.memory_space<vmem>>, vector<1x8x8xbf16>
    %353 = vector.shape_cast %352 : vector<1x8x8xbf16> to vector<8x8xbf16>
    %354 = arith.truncf %351 : vector<8x64xf32> to vector<8x64xbf16>
    %cst_256 = arith.constant dense<0.000000e+00> : vector<8x64xf32>
    %355 = tpu.matmul %353, %354, %cst_256 {dimension_numbers = #tpu.dot_dimension_numbers<[1], [0], [0], [1], [0, 0, 1, 1], [], []>} : vector<8x8xbf16>, vector<8x64xbf16>, vector<8x64xf32> -> vector<8x64xf32>
    %356 = arith.addf %346, %355 : vector<8x64xf32>
    %c57_i32_257 = arith.constant 57 : i32
    %357 = tpu.dynamic_rotate %302 by %c57_i32_257 dim 1 : vector<8x64xf32>, i32 -> vector<8x64xf32>
    %c6_258 = arith.constant 6 : index
    %c0_259 = arith.constant 0 : index
    %c0_260 = arith.constant 0 : index
    %358 = vector.load %arg3[%c6_258, %c0_259, %c0_260] : memref<9x1x64xf32, #tpu.memory_space<vmem>>, vector<1x1x64xf32>
    %359 = vector.shape_cast %358 : vector<1x1x64xf32> to vector<1x64xf32>
    %360 = vector.broadcast %359 : vector<1x64xf32> to vector<8x64xf32>
    %361 = arith.mulf %357, %360 : vector<8x64xf32>
    %c6_261 = arith.constant 6 : index
    %c0_262 = arith.constant 0 : index
    %c0_263 = arith.constant 0 : index
    %362 = vector.load %arg17[%c6_261, %c0_262, %c0_263] : memref<9x8x8xbf16, #tpu.memory_space<vmem>>, vector<1x8x8xbf16>
    %363 = vector.shape_cast %362 : vector<1x8x8xbf16> to vector<8x8xbf16>
    %364 = arith.truncf %361 : vector<8x64xf32> to vector<8x64xbf16>
    %cst_264 = arith.constant dense<0.000000e+00> : vector<8x64xf32>
    %365 = tpu.matmul %363, %364, %cst_264 {dimension_numbers = #tpu.dot_dimension_numbers<[1], [0], [0], [1], [0, 0, 1, 1], [], []>} : vector<8x8xbf16>, vector<8x64xbf16>, vector<8x64xf32> -> vector<8x64xf32>
    %366 = arith.addf %356, %365 : vector<8x64xf32>
    %c56_i32_265 = arith.constant 56 : i32
    %367 = tpu.dynamic_rotate %302 by %c56_i32_265 dim 1 : vector<8x64xf32>, i32 -> vector<8x64xf32>
    %c7_266 = arith.constant 7 : index
    %c0_267 = arith.constant 0 : index
    %c0_268 = arith.constant 0 : index
    %368 = vector.load %arg3[%c7_266, %c0_267, %c0_268] : memref<9x1x64xf32, #tpu.memory_space<vmem>>, vector<1x1x64xf32>
    %369 = vector.shape_cast %368 : vector<1x1x64xf32> to vector<1x64xf32>
    %370 = vector.broadcast %369 : vector<1x64xf32> to vector<8x64xf32>
    %371 = arith.mulf %367, %370 : vector<8x64xf32>
    %c7_269 = arith.constant 7 : index
    %c0_270 = arith.constant 0 : index
    %c0_271 = arith.constant 0 : index
    %372 = vector.load %arg17[%c7_269, %c0_270, %c0_271] : memref<9x8x8xbf16, #tpu.memory_space<vmem>>, vector<1x8x8xbf16>
    %373 = vector.shape_cast %372 : vector<1x8x8xbf16> to vector<8x8xbf16>
    %374 = arith.truncf %371 : vector<8x64xf32> to vector<8x64xbf16>
    %cst_272 = arith.constant dense<0.000000e+00> : vector<8x64xf32>
    %375 = tpu.matmul %373, %374, %cst_272 {dimension_numbers = #tpu.dot_dimension_numbers<[1], [0], [0], [1], [0, 0, 1, 1], [], []>} : vector<8x8xbf16>, vector<8x64xbf16>, vector<8x64xf32> -> vector<8x64xf32>
    %376 = arith.addf %366, %375 : vector<8x64xf32>
    %c55_i32_273 = arith.constant 55 : i32
    %377 = tpu.dynamic_rotate %302 by %c55_i32_273 dim 1 : vector<8x64xf32>, i32 -> vector<8x64xf32>
    %c8_274 = arith.constant 8 : index
    %c0_275 = arith.constant 0 : index
    %c0_276 = arith.constant 0 : index
    %378 = vector.load %arg3[%c8_274, %c0_275, %c0_276] : memref<9x1x64xf32, #tpu.memory_space<vmem>>, vector<1x1x64xf32>
    %379 = vector.shape_cast %378 : vector<1x1x64xf32> to vector<1x64xf32>
    %380 = vector.broadcast %379 : vector<1x64xf32> to vector<8x64xf32>
    %381 = arith.mulf %377, %380 : vector<8x64xf32>
    %c8_277 = arith.constant 8 : index
    %c0_278 = arith.constant 0 : index
    %c0_279 = arith.constant 0 : index
    %382 = vector.load %arg17[%c8_277, %c0_278, %c0_279] : memref<9x8x8xbf16, #tpu.memory_space<vmem>>, vector<1x8x8xbf16>
    %383 = vector.shape_cast %382 : vector<1x8x8xbf16> to vector<8x8xbf16>
    %384 = arith.truncf %381 : vector<8x64xf32> to vector<8x64xbf16>
    %cst_280 = arith.constant dense<0.000000e+00> : vector<8x64xf32>
    %385 = tpu.matmul %383, %384, %cst_280 {dimension_numbers = #tpu.dot_dimension_numbers<[1], [0], [0], [1], [0, 0, 1, 1], [], []>} : vector<8x8xbf16>, vector<8x64xbf16>, vector<8x64xf32> -> vector<8x64xf32>
    %386 = arith.addf %376, %385 : vector<8x64xf32>
    %387 = arith.addf %386, %202 : vector<8x64xf32>
    %c0_281 = arith.constant 0 : index
    %c0_282 = arith.constant 0 : index
    %c0_283 = arith.constant 0 : index
    %388 = vector.load %arg18[%c0_281, %c0_282, %c0_283] : memref<2x8x64xf32, #tpu.memory_space<vmem>>, vector<1x8x64xf32>
    %389 = vector.shape_cast %388 : vector<1x8x64xf32> to vector<8x64xf32>
    %390 = vector.shape_cast %387 : vector<8x64xf32> to vector<1x8x64xf32>
    tpu.vector_store %arg18[%c0_281, %c0_282, %c0_283], %390 {strides = array<i32>} : memref<2x8x64xf32, #tpu.memory_space<vmem>>, vector<1x8x64xf32>,
    %c1_284 = arith.constant 1 : index
    %c0_285 = arith.constant 0 : index
    %c0_286 = arith.constant 0 : index
    %391 = vector.load %arg1[%c1_284, %c0_285, %c0_286] : memref<2x4x256xf32, #tpu.memory_space<vmem>>, vector<1x4x256xf32>
    %392 = vector.shape_cast %391 : vector<1x4x256xf32> to vector<4x256xf32>
    %c0_287 = arith.constant 0 : index
    %c0_288 = arith.constant 0 : index
    %393 = vector.load %arg6[%c0_287, %c0_288] : memref<4x1xf32, #tpu.memory_space<vmem>>, vector<4x1xf32>
    %394 = vector.broadcast %393 : vector<4x1xf32> to vector<4x256xf32>
    %395 = arith.mulf %392, %394 : vector<4x256xf32>
    %c0_289 = arith.constant 0 : index
    %c0_290 = arith.constant 0 : index
    %396 = vector.load %arg7[%c0_289, %c0_290] : memref<4x1xf32, #tpu.memory_space<vmem>>, vector<4x1xf32>
    %397 = vector.broadcast %396 : vector<4x1xf32> to vector<4x256xf32>
    %398 = arith.addf %395, %397 : vector<4x256xf32>
    %cst_291 = arith.constant 0.000000e+00 : f32
    %399 = vector.broadcast %cst_291 : f32 to vector<4x256xf32>
    %400 = arith.maximumf %398, %399 : vector<4x256xf32>
    %c17_i32_292 = arith.constant 17 : i32
    %401 = tpu.dynamic_rotate %400 by %c17_i32_292 dim 1 : vector<4x256xf32>, i32 -> vector<4x256xf32>
    %c0_293 = arith.constant 0 : index
    %c0_294 = arith.constant 0 : index
    %c0_295 = arith.constant 0 : index
    %402 = vector.load %arg2[%c0_293, %c0_294, %c0_295] : memref<9x1x256xf32, #tpu.memory_space<vmem>>, vector<1x1x256xf32>
    %403 = vector.shape_cast %402 : vector<1x1x256xf32> to vector<1x256xf32>
    %404 = vector.broadcast %403 : vector<1x256xf32> to vector<4x256xf32>
    %405 = arith.mulf %401, %404 : vector<4x256xf32>
    %c0_296 = arith.constant 0 : index
    %c0_297 = arith.constant 0 : index
    %c0_298 = arith.constant 0 : index
    %406 = vector.load %arg8[%c0_296, %c0_297, %c0_298] : memref<9x8x4xbf16, #tpu.memory_space<vmem>>, vector<1x8x4xbf16>
    %407 = vector.shape_cast %406 : vector<1x8x4xbf16> to vector<8x4xbf16>
    %408 = arith.truncf %405 : vector<4x256xf32> to vector<4x256xbf16>
    %cst_299 = arith.constant dense<0.000000e+00> : vector<8x256xf32>
    %409 = tpu.matmul %407, %408, %cst_299 {dimension_numbers = #tpu.dot_dimension_numbers<[1], [0], [0], [1], [0, 0, 1, 1], [], []>} : vector<8x4xbf16>, vector<4x256xbf16>, vector<8x256xf32> -> vector<8x256xf32>
    %c16_i32_300 = arith.constant 16 : i32
    %410 = tpu.dynamic_rotate %400 by %c16_i32_300 dim 1 : vector<4x256xf32>, i32 -> vector<4x256xf32>
    %c1_301 = arith.constant 1 : index
    %c0_302 = arith.constant 0 : index
    %c0_303 = arith.constant 0 : index
    %411 = vector.load %arg2[%c1_301, %c0_302, %c0_303] : memref<9x1x256xf32, #tpu.memory_space<vmem>>, vector<1x1x256xf32>
    %412 = vector.shape_cast %411 : vector<1x1x256xf32> to vector<1x256xf32>
    %413 = vector.broadcast %412 : vector<1x256xf32> to vector<4x256xf32>
    %414 = arith.mulf %410, %413 : vector<4x256xf32>
    %c1_304 = arith.constant 1 : index
    %c0_305 = arith.constant 0 : index
    %c0_306 = arith.constant 0 : index
    %415 = vector.load %arg8[%c1_304, %c0_305, %c0_306] : memref<9x8x4xbf16, #tpu.memory_space<vmem>>, vector<1x8x4xbf16>
    %416 = vector.shape_cast %415 : vector<1x8x4xbf16> to vector<8x4xbf16>
    %417 = arith.truncf %414 : vector<4x256xf32> to vector<4x256xbf16>
    %cst_307 = arith.constant dense<0.000000e+00> : vector<8x256xf32>
    %418 = tpu.matmul %416, %417, %cst_307 {dimension_numbers = #tpu.dot_dimension_numbers<[1], [0], [0], [1], [0, 0, 1, 1], [], []>} : vector<8x4xbf16>, vector<4x256xbf16>, vector<8x256xf32> -> vector<8x256xf32>
    %419 = arith.addf %409, %418 : vector<8x256xf32>
    %c15_i32_308 = arith.constant 15 : i32
    %420 = tpu.dynamic_rotate %400 by %c15_i32_308 dim 1 : vector<4x256xf32>, i32 -> vector<4x256xf32>
    %c2_309 = arith.constant 2 : index
    %c0_310 = arith.constant 0 : index
    %c0_311 = arith.constant 0 : index
    %421 = vector.load %arg2[%c2_309, %c0_310, %c0_311] : memref<9x1x256xf32, #tpu.memory_space<vmem>>, vector<1x1x256xf32>
    %422 = vector.shape_cast %421 : vector<1x1x256xf32> to vector<1x256xf32>
    %423 = vector.broadcast %422 : vector<1x256xf32> to vector<4x256xf32>
    %424 = arith.mulf %420, %423 : vector<4x256xf32>
    %c2_312 = arith.constant 2 : index
    %c0_313 = arith.constant 0 : index
    %c0_314 = arith.constant 0 : index
    %425 = vector.load %arg8[%c2_312, %c0_313, %c0_314] : memref<9x8x4xbf16, #tpu.memory_space<vmem>>, vector<1x8x4xbf16>
    %426 = vector.shape_cast %425 : vector<1x8x4xbf16> to vector<8x4xbf16>
    %427 = arith.truncf %424 : vector<4x256xf32> to vector<4x256xbf16>
    %cst_315 = arith.constant dense<0.000000e+00> : vector<8x256xf32>
    %428 = tpu.matmul %426, %427, %cst_315 {dimension_numbers = #tpu.dot_dimension_numbers<[1], [0], [0], [1], [0, 0, 1, 1], [], []>} : vector<8x4xbf16>, vector<4x256xbf16>, vector<8x256xf32> -> vector<8x256xf32>
    %429 = arith.addf %419, %428 : vector<8x256xf32>
    %c1_i32_316 = arith.constant 1 : i32
    %430 = tpu.dynamic_rotate %400 by %c1_i32_316 dim 1 : vector<4x256xf32>, i32 -> vector<4x256xf32>
    %c3_317 = arith.constant 3 : index
    %c0_318 = arith.constant 0 : index
    %c0_319 = arith.constant 0 : index
    %431 = vector.load %arg2[%c3_317, %c0_318, %c0_319] : memref<9x1x256xf32, #tpu.memory_space<vmem>>, vector<1x1x256xf32>
    %432 = vector.shape_cast %431 : vector<1x1x256xf32> to vector<1x256xf32>
    %433 = vector.broadcast %432 : vector<1x256xf32> to vector<4x256xf32>
    %434 = arith.mulf %430, %433 : vector<4x256xf32>
    %c3_320 = arith.constant 3 : index
    %c0_321 = arith.constant 0 : index
    %c0_322 = arith.constant 0 : index
    %435 = vector.load %arg8[%c3_320, %c0_321, %c0_322] : memref<9x8x4xbf16, #tpu.memory_space<vmem>>, vector<1x8x4xbf16>
    %436 = vector.shape_cast %435 : vector<1x8x4xbf16> to vector<8x4xbf16>
    %437 = arith.truncf %434 : vector<4x256xf32> to vector<4x256xbf16>
    %cst_323 = arith.constant dense<0.000000e+00> : vector<8x256xf32>
    %438 = tpu.matmul %436, %437, %cst_323 {dimension_numbers = #tpu.dot_dimension_numbers<[1], [0], [0], [1], [0, 0, 1, 1], [], []>} : vector<8x4xbf16>, vector<4x256xbf16>, vector<8x256xf32> -> vector<8x256xf32>
    %439 = arith.addf %429, %438 : vector<8x256xf32>
    %c4_324 = arith.constant 4 : index
    %c0_325 = arith.constant 0 : index
    %c0_326 = arith.constant 0 : index
    %440 = vector.load %arg8[%c4_324, %c0_325, %c0_326] : memref<9x8x4xbf16, #tpu.memory_space<vmem>>, vector<1x8x4xbf16>
    %441 = vector.shape_cast %440 : vector<1x8x4xbf16> to vector<8x4xbf16>
    %442 = arith.truncf %400 : vector<4x256xf32> to vector<4x256xbf16>
    %cst_327 = arith.constant dense<0.000000e+00> : vector<8x256xf32>
    %443 = tpu.matmul %441, %442, %cst_327 {dimension_numbers = #tpu.dot_dimension_numbers<[1], [0], [0], [1], [0, 0, 1, 1], [], []>} : vector<8x4xbf16>, vector<4x256xbf16>, vector<8x256xf32> -> vector<8x256xf32>
    %444 = arith.addf %439, %443 : vector<8x256xf32>
    %c255_i32_328 = arith.constant 255 : i32
    %445 = tpu.dynamic_rotate %400 by %c255_i32_328 dim 1 : vector<4x256xf32>, i32 -> vector<4x256xf32>
    %c5_329 = arith.constant 5 : index
    %c0_330 = arith.constant 0 : index
    %c0_331 = arith.constant 0 : index
    %446 = vector.load %arg2[%c5_329, %c0_330, %c0_331] : memref<9x1x256xf32, #tpu.memory_space<vmem>>, vector<1x1x256xf32>
    %447 = vector.shape_cast %446 : vector<1x1x256xf32> to vector<1x256xf32>
    %448 = vector.broadcast %447 : vector<1x256xf32> to vector<4x256xf32>
    %449 = arith.mulf %445, %448 : vector<4x256xf32>
    %c5_332 = arith.constant 5 : index
    %c0_333 = arith.constant 0 : index
    %c0_334 = arith.constant 0 : index
    %450 = vector.load %arg8[%c5_332, %c0_333, %c0_334] : memref<9x8x4xbf16, #tpu.memory_space<vmem>>, vector<1x8x4xbf16>
    %451 = vector.shape_cast %450 : vector<1x8x4xbf16> to vector<8x4xbf16>
    %452 = arith.truncf %449 : vector<4x256xf32> to vector<4x256xbf16>
    %cst_335 = arith.constant dense<0.000000e+00> : vector<8x256xf32>
    %453 = tpu.matmul %451, %452, %cst_335 {dimension_numbers = #tpu.dot_dimension_numbers<[1], [0], [0], [1], [0, 0, 1, 1], [], []>} : vector<8x4xbf16>, vector<4x256xbf16>, vector<8x256xf32> -> vector<8x256xf32>
    %454 = arith.addf %444, %453 : vector<8x256xf32>
    %c241_i32_336 = arith.constant 241 : i32
    %455 = tpu.dynamic_rotate %400 by %c241_i32_336 dim 1 : vector<4x256xf32>, i32 -> vector<4x256xf32>
    %c6_337 = arith.constant 6 : index
    %c0_338 = arith.constant 0 : index
    %c0_339 = arith.constant 0 : index
    %456 = vector.load %arg2[%c6_337, %c0_338, %c0_339] : memref<9x1x256xf32, #tpu.memory_space<vmem>>, vector<1x1x256xf32>
    %457 = vector.shape_cast %456 : vector<1x1x256xf32> to vector<1x256xf32>
    %458 = vector.broadcast %457 : vector<1x256xf32> to vector<4x256xf32>
    %459 = arith.mulf %455, %458 : vector<4x256xf32>
    %c6_340 = arith.constant 6 : index
    %c0_341 = arith.constant 0 : index
    %c0_342 = arith.constant 0 : index
    %460 = vector.load %arg8[%c6_340, %c0_341, %c0_342] : memref<9x8x4xbf16, #tpu.memory_space<vmem>>, vector<1x8x4xbf16>
    %461 = vector.shape_cast %460 : vector<1x8x4xbf16> to vector<8x4xbf16>
    %462 = arith.truncf %459 : vector<4x256xf32> to vector<4x256xbf16>
    %cst_343 = arith.constant dense<0.000000e+00> : vector<8x256xf32>
    %463 = tpu.matmul %461, %462, %cst_343 {dimension_numbers = #tpu.dot_dimension_numbers<[1], [0], [0], [1], [0, 0, 1, 1], [], []>} : vector<8x4xbf16>, vector<4x256xbf16>, vector<8x256xf32> -> vector<8x256xf32>
    %464 = arith.addf %454, %463 : vector<8x256xf32>
    %c240_i32_344 = arith.constant 240 : i32
    %465 = tpu.dynamic_rotate %400 by %c240_i32_344 dim 1 : vector<4x256xf32>, i32 -> vector<4x256xf32>
    %c7_345 = arith.constant 7 : index
    %c0_346 = arith.constant 0 : index
    %c0_347 = arith.constant 0 : index
    %466 = vector.load %arg2[%c7_345, %c0_346, %c0_347] : memref<9x1x256xf32, #tpu.memory_space<vmem>>, vector<1x1x256xf32>
    %467 = vector.shape_cast %466 : vector<1x1x256xf32> to vector<1x256xf32>
    %468 = vector.broadcast %467 : vector<1x256xf32> to vector<4x256xf32>
    %469 = arith.mulf %465, %468 : vector<4x256xf32>
    %c7_348 = arith.constant 7 : index
    %c0_349 = arith.constant 0 : index
    %c0_350 = arith.constant 0 : index
    %470 = vector.load %arg8[%c7_348, %c0_349, %c0_350] : memref<9x8x4xbf16, #tpu.memory_space<vmem>>, vector<1x8x4xbf16>
    %471 = vector.shape_cast %470 : vector<1x8x4xbf16> to vector<8x4xbf16>
    %472 = arith.truncf %469 : vector<4x256xf32> to vector<4x256xbf16>
    %cst_351 = arith.constant dense<0.000000e+00> : vector<8x256xf32>
    %473 = tpu.matmul %471, %472, %cst_351 {dimension_numbers = #tpu.dot_dimension_numbers<[1], [0], [0], [1], [0, 0, 1, 1], [], []>} : vector<8x4xbf16>, vector<4x256xbf16>, vector<8x256xf32> -> vector<8x256xf32>
    %474 = arith.addf %464, %473 : vector<8x256xf32>
    %c239_i32_352 = arith.constant 239 : i32
    %475 = tpu.dynamic_rotate %400 by %c239_i32_352 dim 1 : vector<4x256xf32>, i32 -> vector<4x256xf32>
    %c8_353 = arith.constant 8 : index
    %c0_354 = arith.constant 0 : index
    %c0_355 = arith.constant 0 : index
    %476 = vector.load %arg2[%c8_353, %c0_354, %c0_355] : memref<9x1x256xf32, #tpu.memory_space<vmem>>, vector<1x1x256xf32>
    %477 = vector.shape_cast %476 : vector<1x1x256xf32> to vector<1x256xf32>
    %478 = vector.broadcast %477 : vector<1x256xf32> to vector<4x256xf32>
    %479 = arith.mulf %475, %478 : vector<4x256xf32>
    %c8_356 = arith.constant 8 : index
    %c0_357 = arith.constant 0 : index
    %c0_358 = arith.constant 0 : index
    %480 = vector.load %arg8[%c8_356, %c0_357, %c0_358] : memref<9x8x4xbf16, #tpu.memory_space<vmem>>, vector<1x8x4xbf16>
    %481 = vector.shape_cast %480 : vector<1x8x4xbf16> to vector<8x4xbf16>
    %482 = arith.truncf %479 : vector<4x256xf32> to vector<4x256xbf16>
    %cst_359 = arith.constant dense<0.000000e+00> : vector<8x256xf32>
    %483 = tpu.matmul %481, %482, %cst_359 {dimension_numbers = #tpu.dot_dimension_numbers<[1], [0], [0], [1], [0, 0, 1, 1], [], []>} : vector<8x4xbf16>, vector<4x256xbf16>, vector<8x256xf32> -> vector<8x256xf32>
    %484 = arith.addf %474, %483 : vector<8x256xf32>
    %c0_360 = arith.constant 0 : index
    %c0_361 = arith.constant 0 : index
    %485 = vector.load %arg4[%c0_360, %c0_361] : memref<256x64xbf16, #tpu.memory_space<vmem>>, vector<256x64xbf16>
    %486 = arith.truncf %484 : vector<8x256xf32> to vector<8x256xbf16>
    %cst_362 = arith.constant dense<0.000000e+00> : vector<8x64xf32>
    %487 = tpu.matmul %486, %485, %cst_362 {dimension_numbers = #tpu.dot_dimension_numbers<[1], [0], [0], [1], [0, 0, 1, 1], [], []>} : vector<8x256xbf16>, vector<256x64xbf16>, vector<8x64xf32> -> vector<8x64xf32>
    %c0_363 = arith.constant 0 : index
    %c0_364 = arith.constant 0 : index
    %488 = vector.load %arg9[%c0_363, %c0_364] : memref<8x1xf32, #tpu.memory_space<vmem>>, vector<8x1xf32>
    %489 = vector.broadcast %488 : vector<8x1xf32> to vector<8x64xf32>
    %490 = arith.mulf %487, %489 : vector<8x64xf32>
    %c0_365 = arith.constant 0 : index
    %c0_366 = arith.constant 0 : index
    %491 = vector.load %arg10[%c0_365, %c0_366] : memref<8x1xf32, #tpu.memory_space<vmem>>, vector<8x1xf32>
    %492 = vector.broadcast %491 : vector<8x1xf32> to vector<8x64xf32>
    %493 = arith.addf %490, %492 : vector<8x64xf32>
    %cst_367 = arith.constant 0.000000e+00 : f32
    %494 = vector.broadcast %cst_367 : f32 to vector<8x64xf32>
    %495 = arith.maximumf %493, %494 : vector<8x64xf32>
    %c9_i32_368 = arith.constant 9 : i32
    %496 = tpu.dynamic_rotate %495 by %c9_i32_368 dim 1 : vector<8x64xf32>, i32 -> vector<8x64xf32>
    %c0_369 = arith.constant 0 : index
    %c0_370 = arith.constant 0 : index
    %c0_371 = arith.constant 0 : index
    %497 = vector.load %arg3[%c0_369, %c0_370, %c0_371] : memref<9x1x64xf32, #tpu.memory_space<vmem>>, vector<1x1x64xf32>
    %498 = vector.shape_cast %497 : vector<1x1x64xf32> to vector<1x64xf32>
    %499 = vector.broadcast %498 : vector<1x64xf32> to vector<8x64xf32>
    %500 = arith.mulf %496, %499 : vector<8x64xf32>
    %c0_372 = arith.constant 0 : index
    %c0_373 = arith.constant 0 : index
    %c0_374 = arith.constant 0 : index
    %501 = vector.load %arg11[%c0_372, %c0_373, %c0_374] : memref<9x8x8xbf16, #tpu.memory_space<vmem>>, vector<1x8x8xbf16>
    %502 = vector.shape_cast %501 : vector<1x8x8xbf16> to vector<8x8xbf16>
    %503 = arith.truncf %500 : vector<8x64xf32> to vector<8x64xbf16>
    %cst_375 = arith.constant dense<0.000000e+00> : vector<8x64xf32>
    %504 = tpu.matmul %502, %503, %cst_375 {dimension_numbers = #tpu.dot_dimension_numbers<[1], [0], [0], [1], [0, 0, 1, 1], [], []>} : vector<8x8xbf16>, vector<8x64xbf16>, vector<8x64xf32> -> vector<8x64xf32>
    %c8_i32_376 = arith.constant 8 : i32
    %505 = tpu.dynamic_rotate %495 by %c8_i32_376 dim 1 : vector<8x64xf32>, i32 -> vector<8x64xf32>
    %c1_377 = arith.constant 1 : index
    %c0_378 = arith.constant 0 : index
    %c0_379 = arith.constant 0 : index
    %506 = vector.load %arg3[%c1_377, %c0_378, %c0_379] : memref<9x1x64xf32, #tpu.memory_space<vmem>>, vector<1x1x64xf32>
    %507 = vector.shape_cast %506 : vector<1x1x64xf32> to vector<1x64xf32>
    %508 = vector.broadcast %507 : vector<1x64xf32> to vector<8x64xf32>
    %509 = arith.mulf %505, %508 : vector<8x64xf32>
    %c1_380 = arith.constant 1 : index
    %c0_381 = arith.constant 0 : index
    %c0_382 = arith.constant 0 : index
    %510 = vector.load %arg11[%c1_380, %c0_381, %c0_382] : memref<9x8x8xbf16, #tpu.memory_space<vmem>>, vector<1x8x8xbf16>
    %511 = vector.shape_cast %510 : vector<1x8x8xbf16> to vector<8x8xbf16>
    %512 = arith.truncf %509 : vector<8x64xf32> to vector<8x64xbf16>
    %cst_383 = arith.constant dense<0.000000e+00> : vector<8x64xf32>
    %513 = tpu.matmul %511, %512, %cst_383 {dimension_numbers = #tpu.dot_dimension_numbers<[1], [0], [0], [1], [0, 0, 1, 1], [], []>} : vector<8x8xbf16>, vector<8x64xbf16>, vector<8x64xf32> -> vector<8x64xf32>
    %514 = arith.addf %504, %513 : vector<8x64xf32>
    %c7_i32_384 = arith.constant 7 : i32
    %515 = tpu.dynamic_rotate %495 by %c7_i32_384 dim 1 : vector<8x64xf32>, i32 -> vector<8x64xf32>
    %c2_385 = arith.constant 2 : index
    %c0_386 = arith.constant 0 : index
    %c0_387 = arith.constant 0 : index
    %516 = vector.load %arg3[%c2_385, %c0_386, %c0_387] : memref<9x1x64xf32, #tpu.memory_space<vmem>>, vector<1x1x64xf32>
    %517 = vector.shape_cast %516 : vector<1x1x64xf32> to vector<1x64xf32>
    %518 = vector.broadcast %517 : vector<1x64xf32> to vector<8x64xf32>
    %519 = arith.mulf %515, %518 : vector<8x64xf32>
    %c2_388 = arith.constant 2 : index
    %c0_389 = arith.constant 0 : index
    %c0_390 = arith.constant 0 : index
    %520 = vector.load %arg11[%c2_388, %c0_389, %c0_390] : memref<9x8x8xbf16, #tpu.memory_space<vmem>>, vector<1x8x8xbf16>
    %521 = vector.shape_cast %520 : vector<1x8x8xbf16> to vector<8x8xbf16>
    %522 = arith.truncf %519 : vector<8x64xf32> to vector<8x64xbf16>
    %cst_391 = arith.constant dense<0.000000e+00> : vector<8x64xf32>
    %523 = tpu.matmul %521, %522, %cst_391 {dimension_numbers = #tpu.dot_dimension_numbers<[1], [0], [0], [1], [0, 0, 1, 1], [], []>} : vector<8x8xbf16>, vector<8x64xbf16>, vector<8x64xf32> -> vector<8x64xf32>
    %524 = arith.addf %514, %523 : vector<8x64xf32>
    %c1_i32_392 = arith.constant 1 : i32
    %525 = tpu.dynamic_rotate %495 by %c1_i32_392 dim 1 : vector<8x64xf32>, i32 -> vector<8x64xf32>
    %c3_393 = arith.constant 3 : index
    %c0_394 = arith.constant 0 : index
    %c0_395 = arith.constant 0 : index
    %526 = vector.load %arg3[%c3_393, %c0_394, %c0_395] : memref<9x1x64xf32, #tpu.memory_space<vmem>>, vector<1x1x64xf32>
    %527 = vector.shape_cast %526 : vector<1x1x64xf32> to vector<1x64xf32>
    %528 = vector.broadcast %527 : vector<1x64xf32> to vector<8x64xf32>
    %529 = arith.mulf %525, %528 : vector<8x64xf32>
    %c3_396 = arith.constant 3 : index
    %c0_397 = arith.constant 0 : index
    %c0_398 = arith.constant 0 : index
    %530 = vector.load %arg11[%c3_396, %c0_397, %c0_398] : memref<9x8x8xbf16, #tpu.memory_space<vmem>>, vector<1x8x8xbf16>
    %531 = vector.shape_cast %530 : vector<1x8x8xbf16> to vector<8x8xbf16>
    %532 = arith.truncf %529 : vector<8x64xf32> to vector<8x64xbf16>
    %cst_399 = arith.constant dense<0.000000e+00> : vector<8x64xf32>
    %533 = tpu.matmul %531, %532, %cst_399 {dimension_numbers = #tpu.dot_dimension_numbers<[1], [0], [0], [1], [0, 0, 1, 1], [], []>} : vector<8x8xbf16>, vector<8x64xbf16>, vector<8x64xf32> -> vector<8x64xf32>
    %534 = arith.addf %524, %533 : vector<8x64xf32>
    %c4_400 = arith.constant 4 : index
    %c0_401 = arith.constant 0 : index
    %c0_402 = arith.constant 0 : index
    %535 = vector.load %arg11[%c4_400, %c0_401, %c0_402] : memref<9x8x8xbf16, #tpu.memory_space<vmem>>, vector<1x8x8xbf16>
    %536 = vector.shape_cast %535 : vector<1x8x8xbf16> to vector<8x8xbf16>
    %537 = arith.truncf %495 : vector<8x64xf32> to vector<8x64xbf16>
    %cst_403 = arith.constant dense<0.000000e+00> : vector<8x64xf32>
    %538 = tpu.matmul %536, %537, %cst_403 {dimension_numbers = #tpu.dot_dimension_numbers<[1], [0], [0], [1], [0, 0, 1, 1], [], []>} : vector<8x8xbf16>, vector<8x64xbf16>, vector<8x64xf32> -> vector<8x64xf32>
    %539 = arith.addf %534, %538 : vector<8x64xf32>
    %c63_i32_404 = arith.constant 63 : i32
    %540 = tpu.dynamic_rotate %495 by %c63_i32_404 dim 1 : vector<8x64xf32>, i32 -> vector<8x64xf32>
    %c5_405 = arith.constant 5 : index
    %c0_406 = arith.constant 0 : index
    %c0_407 = arith.constant 0 : index
    %541 = vector.load %arg3[%c5_405, %c0_406, %c0_407] : memref<9x1x64xf32, #tpu.memory_space<vmem>>, vector<1x1x64xf32>
    %542 = vector.shape_cast %541 : vector<1x1x64xf32> to vector<1x64xf32>
    %543 = vector.broadcast %542 : vector<1x64xf32> to vector<8x64xf32>
    %544 = arith.mulf %540, %543 : vector<8x64xf32>
    %c5_408 = arith.constant 5 : index
    %c0_409 = arith.constant 0 : index
    %c0_410 = arith.constant 0 : index
    %545 = vector.load %arg11[%c5_408, %c0_409, %c0_410] : memref<9x8x8xbf16, #tpu.memory_space<vmem>>, vector<1x8x8xbf16>
    %546 = vector.shape_cast %545 : vector<1x8x8xbf16> to vector<8x8xbf16>
    %547 = arith.truncf %544 : vector<8x64xf32> to vector<8x64xbf16>
    %cst_411 = arith.constant dense<0.000000e+00> : vector<8x64xf32>
    %548 = tpu.matmul %546, %547, %cst_411 {dimension_numbers = #tpu.dot_dimension_numbers<[1], [0], [0], [1], [0, 0, 1, 1], [], []>} : vector<8x8xbf16>, vector<8x64xbf16>, vector<8x64xf32> -> vector<8x64xf32>
    %549 = arith.addf %539, %548 : vector<8x64xf32>
    %c57_i32_412 = arith.constant 57 : i32
    %550 = tpu.dynamic_rotate %495 by %c57_i32_412 dim 1 : vector<8x64xf32>, i32 -> vector<8x64xf32>
    %c6_413 = arith.constant 6 : index
    %c0_414 = arith.constant 0 : index
    %c0_415 = arith.constant 0 : index
    %551 = vector.load %arg3[%c6_413, %c0_414, %c0_415] : memref<9x1x64xf32, #tpu.memory_space<vmem>>, vector<1x1x64xf32>
    %552 = vector.shape_cast %551 : vector<1x1x64xf32> to vector<1x64xf32>
    %553 = vector.broadcast %552 : vector<1x64xf32> to vector<8x64xf32>
    %554 = arith.mulf %550, %553 : vector<8x64xf32>
    %c6_416 = arith.constant 6 : index
    %c0_417 = arith.constant 0 : index
    %c0_418 = arith.constant 0 : index
    %555 = vector.load %arg11[%c6_416, %c0_417, %c0_418] : memref<9x8x8xbf16, #tpu.memory_space<vmem>>, vector<1x8x8xbf16>
    %556 = vector.shape_cast %555 : vector<1x8x8xbf16> to vector<8x8xbf16>
    %557 = arith.truncf %554 : vector<8x64xf32> to vector<8x64xbf16>
    %cst_419 = arith.constant dense<0.000000e+00> : vector<8x64xf32>
    %558 = tpu.matmul %556, %557, %cst_419 {dimension_numbers = #tpu.dot_dimension_numbers<[1], [0], [0], [1], [0, 0, 1, 1], [], []>} : vector<8x8xbf16>, vector<8x64xbf16>, vector<8x64xf32> -> vector<8x64xf32>
    %559 = arith.addf %549, %558 : vector<8x64xf32>
    %c56_i32_420 = arith.constant 56 : i32
    %560 = tpu.dynamic_rotate %495 by %c56_i32_420 dim 1 : vector<8x64xf32>, i32 -> vector<8x64xf32>
    %c7_421 = arith.constant 7 : index
    %c0_422 = arith.constant 0 : index
    %c0_423 = arith.constant 0 : index
    %561 = vector.load %arg3[%c7_421, %c0_422, %c0_423] : memref<9x1x64xf32, #tpu.memory_space<vmem>>, vector<1x1x64xf32>
    %562 = vector.shape_cast %561 : vector<1x1x64xf32> to vector<1x64xf32>
    %563 = vector.broadcast %562 : vector<1x64xf32> to vector<8x64xf32>
    %564 = arith.mulf %560, %563 : vector<8x64xf32>
    %c7_424 = arith.constant 7 : index
    %c0_425 = arith.constant 0 : index
    %c0_426 = arith.constant 0 : index
    %565 = vector.load %arg11[%c7_424, %c0_425, %c0_426] : memref<9x8x8xbf16, #tpu.memory_space<vmem>>, vector<1x8x8xbf16>
    %566 = vector.shape_cast %565 : vector<1x8x8xbf16> to vector<8x8xbf16>
    %567 = arith.truncf %564 : vector<8x64xf32> to vector<8x64xbf16>
    %cst_427 = arith.constant dense<0.000000e+00> : vector<8x64xf32>
    %568 = tpu.matmul %566, %567, %cst_427 {dimension_numbers = #tpu.dot_dimension_numbers<[1], [0], [0], [1], [0, 0, 1, 1], [], []>} : vector<8x8xbf16>, vector<8x64xbf16>, vector<8x64xf32> -> vector<8x64xf32>
    %569 = arith.addf %559, %568 : vector<8x64xf32>
    %c55_i32_428 = arith.constant 55 : i32
    %570 = tpu.dynamic_rotate %495 by %c55_i32_428 dim 1 : vector<8x64xf32>, i32 -> vector<8x64xf32>
    %c8_429 = arith.constant 8 : index
    %c0_430 = arith.constant 0 : index
    %c0_431 = arith.constant 0 : index
    %571 = vector.load %arg3[%c8_429, %c0_430, %c0_431] : memref<9x1x64xf32, #tpu.memory_space<vmem>>, vector<1x1x64xf32>
    %572 = vector.shape_cast %571 : vector<1x1x64xf32> to vector<1x64xf32>
    %573 = vector.broadcast %572 : vector<1x64xf32> to vector<8x64xf32>
    %574 = arith.mulf %570, %573 : vector<8x64xf32>
    %c8_432 = arith.constant 8 : index
    %c0_433 = arith.constant 0 : index
    %c0_434 = arith.constant 0 : index
    %575 = vector.load %arg11[%c8_432, %c0_433, %c0_434] : memref<9x8x8xbf16, #tpu.memory_space<vmem>>, vector<1x8x8xbf16>
    %576 = vector.shape_cast %575 : vector<1x8x8xbf16> to vector<8x8xbf16>
    %577 = arith.truncf %574 : vector<8x64xf32> to vector<8x64xbf16>
    %cst_435 = arith.constant dense<0.000000e+00> : vector<8x64xf32>
    %578 = tpu.matmul %576, %577, %cst_435 {dimension_numbers = #tpu.dot_dimension_numbers<[1], [0], [0], [1], [0, 0, 1, 1], [], []>} : vector<8x8xbf16>, vector<8x64xbf16>, vector<8x64xf32> -> vector<8x64xf32>
    %579 = arith.addf %569, %578 : vector<8x64xf32>
    %c255_i32_436 = arith.constant 255 : i32
    %580 = tpu.dynamic_rotate %392 by %c255_i32_436 dim 1 : vector<4x256xf32>, i32 -> vector<4x256xf32>
    %581 = arith.addf %392, %580 : vector<4x256xf32>
    %c240_i32_437 = arith.constant 240 : i32
    %582 = tpu.dynamic_rotate %392 by %c240_i32_437 dim 1 : vector<4x256xf32>, i32 -> vector<4x256xf32>
    %583 = arith.addf %581, %582 : vector<4x256xf32>
    %c239_i32_438 = arith.constant 239 : i32
    %584 = tpu.dynamic_rotate %392 by %c239_i32_438 dim 1 : vector<4x256xf32>, i32 -> vector<4x256xf32>
    %585 = arith.addf %583, %584 : vector<4x256xf32>
    %586 = arith.truncf %585 : vector<4x256xf32> to vector<4x256xbf16>
    %cst_439 = arith.constant dense<0.000000e+00> : vector<4x64xf32>
    %587 = tpu.matmul %586, %485, %cst_439 {dimension_numbers = #tpu.dot_dimension_numbers<[1], [0], [0], [1], [0, 0, 1, 1], [], []>} : vector<4x256xbf16>, vector<256x64xbf16>, vector<4x64xf32> -> vector<4x64xf32>
    %cst_440 = arith.constant 2.500000e-01 : f32
    %588 = vector.broadcast %cst_440 : f32 to vector<4x64xf32>
    %589 = arith.mulf %588, %587 : vector<4x64xf32>
    %c0_441 = arith.constant 0 : index
    %c0_442 = arith.constant 0 : index
    %590 = vector.load %arg5[%c0_441, %c0_442] : memref<8x4xbf16, #tpu.memory_space<vmem>>, vector<8x4xbf16>
    %591 = arith.truncf %589 : vector<4x64xf32> to vector<4x64xbf16>
    %cst_443 = arith.constant dense<0.000000e+00> : vector<8x64xf32>
    %592 = tpu.matmul %590, %591, %cst_443 {dimension_numbers = #tpu.dot_dimension_numbers<[1], [0], [0], [1], [0, 0, 1, 1], [], []>} : vector<8x4xbf16>, vector<4x64xbf16>, vector<8x64xf32> -> vector<8x64xf32>
    %593 = arith.addf %579, %592 : vector<8x64xf32>
    %c0_444 = arith.constant 0 : index
    %c0_445 = arith.constant 0 : index
    %594 = vector.load %arg12[%c0_444, %c0_445] : memref<8x1xf32, #tpu.memory_space<vmem>>, vector<8x1xf32>
    %595 = vector.broadcast %594 : vector<8x1xf32> to vector<8x64xf32>
    %596 = arith.mulf %593, %595 : vector<8x64xf32>
    %c0_446 = arith.constant 0 : index
    %c0_447 = arith.constant 0 : index
    %597 = vector.load %arg13[%c0_446, %c0_447] : memref<8x1xf32, #tpu.memory_space<vmem>>, vector<8x1xf32>
    %598 = vector.broadcast %597 : vector<8x1xf32> to vector<8x64xf32>
    %599 = arith.addf %596, %598 : vector<8x64xf32>
    %cst_448 = arith.constant 0.000000e+00 : f32
    %600 = vector.broadcast %cst_448 : f32 to vector<8x64xf32>
    %601 = arith.maximumf %599, %600 : vector<8x64xf32>
    %c9_i32_449 = arith.constant 9 : i32
    %602 = tpu.dynamic_rotate %601 by %c9_i32_449 dim 1 : vector<8x64xf32>, i32 -> vector<8x64xf32>
    %c0_450 = arith.constant 0 : index
    %c0_451 = arith.constant 0 : index
    %c0_452 = arith.constant 0 : index
    %603 = vector.load %arg3[%c0_450, %c0_451, %c0_452] : memref<9x1x64xf32, #tpu.memory_space<vmem>>, vector<1x1x64xf32>
    %604 = vector.shape_cast %603 : vector<1x1x64xf32> to vector<1x64xf32>
    %605 = vector.broadcast %604 : vector<1x64xf32> to vector<8x64xf32>
    %606 = arith.mulf %602, %605 : vector<8x64xf32>
    %c0_453 = arith.constant 0 : index
    %c0_454 = arith.constant 0 : index
    %c0_455 = arith.constant 0 : index
    %607 = vector.load %arg14[%c0_453, %c0_454, %c0_455] : memref<9x8x8xbf16, #tpu.memory_space<vmem>>, vector<1x8x8xbf16>
    %608 = vector.shape_cast %607 : vector<1x8x8xbf16> to vector<8x8xbf16>
    %609 = arith.truncf %606 : vector<8x64xf32> to vector<8x64xbf16>
    %cst_456 = arith.constant dense<0.000000e+00> : vector<8x64xf32>
    %610 = tpu.matmul %608, %609, %cst_456 {dimension_numbers = #tpu.dot_dimension_numbers<[1], [0], [0], [1], [0, 0, 1, 1], [], []>} : vector<8x8xbf16>, vector<8x64xbf16>, vector<8x64xf32> -> vector<8x64xf32>
    %c8_i32_457 = arith.constant 8 : i32
    %611 = tpu.dynamic_rotate %601 by %c8_i32_457 dim 1 : vector<8x64xf32>, i32 -> vector<8x64xf32>
    %c1_458 = arith.constant 1 : index
    %c0_459 = arith.constant 0 : index
    %c0_460 = arith.constant 0 : index
    %612 = vector.load %arg3[%c1_458, %c0_459, %c0_460] : memref<9x1x64xf32, #tpu.memory_space<vmem>>, vector<1x1x64xf32>
    %613 = vector.shape_cast %612 : vector<1x1x64xf32> to vector<1x64xf32>
    %614 = vector.broadcast %613 : vector<1x64xf32> to vector<8x64xf32>
    %615 = arith.mulf %611, %614 : vector<8x64xf32>
    %c1_461 = arith.constant 1 : index
    %c0_462 = arith.constant 0 : index
    %c0_463 = arith.constant 0 : index
    %616 = vector.load %arg14[%c1_461, %c0_462, %c0_463] : memref<9x8x8xbf16, #tpu.memory_space<vmem>>, vector<1x8x8xbf16>
    %617 = vector.shape_cast %616 : vector<1x8x8xbf16> to vector<8x8xbf16>
    %618 = arith.truncf %615 : vector<8x64xf32> to vector<8x64xbf16>
    %cst_464 = arith.constant dense<0.000000e+00> : vector<8x64xf32>
    %619 = tpu.matmul %617, %618, %cst_464 {dimension_numbers = #tpu.dot_dimension_numbers<[1], [0], [0], [1], [0, 0, 1, 1], [], []>} : vector<8x8xbf16>, vector<8x64xbf16>, vector<8x64xf32> -> vector<8x64xf32>
    %620 = arith.addf %610, %619 : vector<8x64xf32>
    %c7_i32_465 = arith.constant 7 : i32
    %621 = tpu.dynamic_rotate %601 by %c7_i32_465 dim 1 : vector<8x64xf32>, i32 -> vector<8x64xf32>
    %c2_466 = arith.constant 2 : index
    %c0_467 = arith.constant 0 : index
    %c0_468 = arith.constant 0 : index
    %622 = vector.load %arg3[%c2_466, %c0_467, %c0_468] : memref<9x1x64xf32, #tpu.memory_space<vmem>>, vector<1x1x64xf32>
    %623 = vector.shape_cast %622 : vector<1x1x64xf32> to vector<1x64xf32>
    %624 = vector.broadcast %623 : vector<1x64xf32> to vector<8x64xf32>
    %625 = arith.mulf %621, %624 : vector<8x64xf32>
    %c2_469 = arith.constant 2 : index
    %c0_470 = arith.constant 0 : index
    %c0_471 = arith.constant 0 : index
    %626 = vector.load %arg14[%c2_469, %c0_470, %c0_471] : memref<9x8x8xbf16, #tpu.memory_space<vmem>>, vector<1x8x8xbf16>
    %627 = vector.shape_cast %626 : vector<1x8x8xbf16> to vector<8x8xbf16>
    %628 = arith.truncf %625 : vector<8x64xf32> to vector<8x64xbf16>
    %cst_472 = arith.constant dense<0.000000e+00> : vector<8x64xf32>
    %629 = tpu.matmul %627, %628, %cst_472 {dimension_numbers = #tpu.dot_dimension_numbers<[1], [0], [0], [1], [0, 0, 1, 1], [], []>} : vector<8x8xbf16>, vector<8x64xbf16>, vector<8x64xf32> -> vector<8x64xf32>
    %630 = arith.addf %620, %629 : vector<8x64xf32>
    %c1_i32_473 = arith.constant 1 : i32
    %631 = tpu.dynamic_rotate %601 by %c1_i32_473 dim 1 : vector<8x64xf32>, i32 -> vector<8x64xf32>
    %c3_474 = arith.constant 3 : index
    %c0_475 = arith.constant 0 : index
    %c0_476 = arith.constant 0 : index
    %632 = vector.load %arg3[%c3_474, %c0_475, %c0_476] : memref<9x1x64xf32, #tpu.memory_space<vmem>>, vector<1x1x64xf32>
    %633 = vector.shape_cast %632 : vector<1x1x64xf32> to vector<1x64xf32>
    %634 = vector.broadcast %633 : vector<1x64xf32> to vector<8x64xf32>
    %635 = arith.mulf %631, %634 : vector<8x64xf32>
    %c3_477 = arith.constant 3 : index
    %c0_478 = arith.constant 0 : index
    %c0_479 = arith.constant 0 : index
    %636 = vector.load %arg14[%c3_477, %c0_478, %c0_479] : memref<9x8x8xbf16, #tpu.memory_space<vmem>>, vector<1x8x8xbf16>
    %637 = vector.shape_cast %636 : vector<1x8x8xbf16> to vector<8x8xbf16>
    %638 = arith.truncf %635 : vector<8x64xf32> to vector<8x64xbf16>
    %cst_480 = arith.constant dense<0.000000e+00> : vector<8x64xf32>
    %639 = tpu.matmul %637, %638, %cst_480 {dimension_numbers = #tpu.dot_dimension_numbers<[1], [0], [0], [1], [0, 0, 1, 1], [], []>} : vector<8x8xbf16>, vector<8x64xbf16>, vector<8x64xf32> -> vector<8x64xf32>
    %640 = arith.addf %630, %639 : vector<8x64xf32>
    %c4_481 = arith.constant 4 : index
    %c0_482 = arith.constant 0 : index
    %c0_483 = arith.constant 0 : index
    %641 = vector.load %arg14[%c4_481, %c0_482, %c0_483] : memref<9x8x8xbf16, #tpu.memory_space<vmem>>, vector<1x8x8xbf16>
    %642 = vector.shape_cast %641 : vector<1x8x8xbf16> to vector<8x8xbf16>
    %643 = arith.truncf %601 : vector<8x64xf32> to vector<8x64xbf16>
    %cst_484 = arith.constant dense<0.000000e+00> : vector<8x64xf32>
    %644 = tpu.matmul %642, %643, %cst_484 {dimension_numbers = #tpu.dot_dimension_numbers<[1], [0], [0], [1], [0, 0, 1, 1], [], []>} : vector<8x8xbf16>, vector<8x64xbf16>, vector<8x64xf32> -> vector<8x64xf32>
    %645 = arith.addf %640, %644 : vector<8x64xf32>
    %c63_i32_485 = arith.constant 63 : i32
    %646 = tpu.dynamic_rotate %601 by %c63_i32_485 dim 1 : vector<8x64xf32>, i32 -> vector<8x64xf32>
    %c5_486 = arith.constant 5 : index
    %c0_487 = arith.constant 0 : index
    %c0_488 = arith.constant 0 : index
    %647 = vector.load %arg3[%c5_486, %c0_487, %c0_488] : memref<9x1x64xf32, #tpu.memory_space<vmem>>, vector<1x1x64xf32>
    %648 = vector.shape_cast %647 : vector<1x1x64xf32> to vector<1x64xf32>
    %649 = vector.broadcast %648 : vector<1x64xf32> to vector<8x64xf32>
    %650 = arith.mulf %646, %649 : vector<8x64xf32>
    %c5_489 = arith.constant 5 : index
    %c0_490 = arith.constant 0 : index
    %c0_491 = arith.constant 0 : index
    %651 = vector.load %arg14[%c5_489, %c0_490, %c0_491] : memref<9x8x8xbf16, #tpu.memory_space<vmem>>, vector<1x8x8xbf16>
    %652 = vector.shape_cast %651 : vector<1x8x8xbf16> to vector<8x8xbf16>
    %653 = arith.truncf %650 : vector<8x64xf32> to vector<8x64xbf16>
    %cst_492 = arith.constant dense<0.000000e+00> : vector<8x64xf32>
    %654 = tpu.matmul %652, %653, %cst_492 {dimension_numbers = #tpu.dot_dimension_numbers<[1], [0], [0], [1], [0, 0, 1, 1], [], []>} : vector<8x8xbf16>, vector<8x64xbf16>, vector<8x64xf32> -> vector<8x64xf32>
    %655 = arith.addf %645, %654 : vector<8x64xf32>
    %c57_i32_493 = arith.constant 57 : i32
    %656 = tpu.dynamic_rotate %601 by %c57_i32_493 dim 1 : vector<8x64xf32>, i32 -> vector<8x64xf32>
    %c6_494 = arith.constant 6 : index
    %c0_495 = arith.constant 0 : index
    %c0_496 = arith.constant 0 : index
    %657 = vector.load %arg3[%c6_494, %c0_495, %c0_496] : memref<9x1x64xf32, #tpu.memory_space<vmem>>, vector<1x1x64xf32>
    %658 = vector.shape_cast %657 : vector<1x1x64xf32> to vector<1x64xf32>
    %659 = vector.broadcast %658 : vector<1x64xf32> to vector<8x64xf32>
    %660 = arith.mulf %656, %659 : vector<8x64xf32>
    %c6_497 = arith.constant 6 : index
    %c0_498 = arith.constant 0 : index
    %c0_499 = arith.constant 0 : index
    %661 = vector.load %arg14[%c6_497, %c0_498, %c0_499] : memref<9x8x8xbf16, #tpu.memory_space<vmem>>, vector<1x8x8xbf16>
    %662 = vector.shape_cast %661 : vector<1x8x8xbf16> to vector<8x8xbf16>
    %663 = arith.truncf %660 : vector<8x64xf32> to vector<8x64xbf16>
    %cst_500 = arith.constant dense<0.000000e+00> : vector<8x64xf32>
    %664 = tpu.matmul %662, %663, %cst_500 {dimension_numbers = #tpu.dot_dimension_numbers<[1], [0], [0], [1], [0, 0, 1, 1], [], []>} : vector<8x8xbf16>, vector<8x64xbf16>, vector<8x64xf32> -> vector<8x64xf32>
    %665 = arith.addf %655, %664 : vector<8x64xf32>
    %c56_i32_501 = arith.constant 56 : i32
    %666 = tpu.dynamic_rotate %601 by %c56_i32_501 dim 1 : vector<8x64xf32>, i32 -> vector<8x64xf32>
    %c7_502 = arith.constant 7 : index
    %c0_503 = arith.constant 0 : index
    %c0_504 = arith.constant 0 : index
    %667 = vector.load %arg3[%c7_502, %c0_503, %c0_504] : memref<9x1x64xf32, #tpu.memory_space<vmem>>, vector<1x1x64xf32>
    %668 = vector.shape_cast %667 : vector<1x1x64xf32> to vector<1x64xf32>
    %669 = vector.broadcast %668 : vector<1x64xf32> to vector<8x64xf32>
    %670 = arith.mulf %666, %669 : vector<8x64xf32>
    %c7_505 = arith.constant 7 : index
    %c0_506 = arith.constant 0 : index
    %c0_507 = arith.constant 0 : index
    %671 = vector.load %arg14[%c7_505, %c0_506, %c0_507] : memref<9x8x8xbf16, #tpu.memory_space<vmem>>, vector<1x8x8xbf16>
    %672 = vector.shape_cast %671 : vector<1x8x8xbf16> to vector<8x8xbf16>
    %673 = arith.truncf %670 : vector<8x64xf32> to vector<8x64xbf16>
    %cst_508 = arith.constant dense<0.000000e+00> : vector<8x64xf32>
    %674 = tpu.matmul %672, %673, %cst_508 {dimension_numbers = #tpu.dot_dimension_numbers<[1], [0], [0], [1], [0, 0, 1, 1], [], []>} : vector<8x8xbf16>, vector<8x64xbf16>, vector<8x64xf32> -> vector<8x64xf32>
    %675 = arith.addf %665, %674 : vector<8x64xf32>
    %c55_i32_509 = arith.constant 55 : i32
    %676 = tpu.dynamic_rotate %601 by %c55_i32_509 dim 1 : vector<8x64xf32>, i32 -> vector<8x64xf32>
    %c8_510 = arith.constant 8 : index
    %c0_511 = arith.constant 0 : index
    %c0_512 = arith.constant 0 : index
    %677 = vector.load %arg3[%c8_510, %c0_511, %c0_512] : memref<9x1x64xf32, #tpu.memory_space<vmem>>, vector<1x1x64xf32>
    %678 = vector.shape_cast %677 : vector<1x1x64xf32> to vector<1x64xf32>
    %679 = vector.broadcast %678 : vector<1x64xf32> to vector<8x64xf32>
    %680 = arith.mulf %676, %679 : vector<8x64xf32>
    %c8_513 = arith.constant 8 : index
    %c0_514 = arith.constant 0 : index
    %c0_515 = arith.constant 0 : index
    %681 = vector.load %arg14[%c8_513, %c0_514, %c0_515] : memref<9x8x8xbf16, #tpu.memory_space<vmem>>, vector<1x8x8xbf16>
    %682 = vector.shape_cast %681 : vector<1x8x8xbf16> to vector<8x8xbf16>
    %683 = arith.truncf %680 : vector<8x64xf32> to vector<8x64xbf16>
    %cst_516 = arith.constant dense<0.000000e+00> : vector<8x64xf32>
    %684 = tpu.matmul %682, %683, %cst_516 {dimension_numbers = #tpu.dot_dimension_numbers<[1], [0], [0], [1], [0, 0, 1, 1], [], []>} : vector<8x8xbf16>, vector<8x64xbf16>, vector<8x64xf32> -> vector<8x64xf32>
    %685 = arith.addf %675, %684 : vector<8x64xf32>
    %c0_517 = arith.constant 0 : index
    %c0_518 = arith.constant 0 : index
    %686 = vector.load %arg15[%c0_517, %c0_518] : memref<8x1xf32, #tpu.memory_space<vmem>>, vector<8x1xf32>
    %687 = vector.broadcast %686 : vector<8x1xf32> to vector<8x64xf32>
    %688 = arith.mulf %685, %687 : vector<8x64xf32>
    %c0_519 = arith.constant 0 : index
    %c0_520 = arith.constant 0 : index
    %689 = vector.load %arg16[%c0_519, %c0_520] : memref<8x1xf32, #tpu.memory_space<vmem>>, vector<8x1xf32>
    %690 = vector.broadcast %689 : vector<8x1xf32> to vector<8x64xf32>
    %691 = arith.addf %688, %690 : vector<8x64xf32>
    %cst_521 = arith.constant 0.000000e+00 : f32
    %692 = vector.broadcast %cst_521 : f32 to vector<8x64xf32>
    %693 = arith.maximumf %691, %692 : vector<8x64xf32>
    %c9_i32_522 = arith.constant 9 : i32
    %694 = tpu.dynamic_rotate %693 by %c9_i32_522 dim 1 : vector<8x64xf32>, i32 -> vector<8x64xf32>
    %c0_523 = arith.constant 0 : index
    %c0_524 = arith.constant 0 : index
    %c0_525 = arith.constant 0 : index
    %695 = vector.load %arg3[%c0_523, %c0_524, %c0_525] : memref<9x1x64xf32, #tpu.memory_space<vmem>>, vector<1x1x64xf32>
    %696 = vector.shape_cast %695 : vector<1x1x64xf32> to vector<1x64xf32>
    %697 = vector.broadcast %696 : vector<1x64xf32> to vector<8x64xf32>
    %698 = arith.mulf %694, %697 : vector<8x64xf32>
    %c0_526 = arith.constant 0 : index
    %c0_527 = arith.constant 0 : index
    %c0_528 = arith.constant 0 : index
    %699 = vector.load %arg17[%c0_526, %c0_527, %c0_528] : memref<9x8x8xbf16, #tpu.memory_space<vmem>>, vector<1x8x8xbf16>
    %700 = vector.shape_cast %699 : vector<1x8x8xbf16> to vector<8x8xbf16>
    %701 = arith.truncf %698 : vector<8x64xf32> to vector<8x64xbf16>
    %cst_529 = arith.constant dense<0.000000e+00> : vector<8x64xf32>
    %702 = tpu.matmul %700, %701, %cst_529 {dimension_numbers = #tpu.dot_dimension_numbers<[1], [0], [0], [1], [0, 0, 1, 1], [], []>} : vector<8x8xbf16>, vector<8x64xbf16>, vector<8x64xf32> -> vector<8x64xf32>
    %c8_i32_530 = arith.constant 8 : i32
    %703 = tpu.dynamic_rotate %693 by %c8_i32_530 dim 1 : vector<8x64xf32>, i32 -> vector<8x64xf32>
    %c1_531 = arith.constant 1 : index
    %c0_532 = arith.constant 0 : index
    %c0_533 = arith.constant 0 : index
    %704 = vector.load %arg3[%c1_531, %c0_532, %c0_533] : memref<9x1x64xf32, #tpu.memory_space<vmem>>, vector<1x1x64xf32>
    %705 = vector.shape_cast %704 : vector<1x1x64xf32> to vector<1x64xf32>
    %706 = vector.broadcast %705 : vector<1x64xf32> to vector<8x64xf32>
    %707 = arith.mulf %703, %706 : vector<8x64xf32>
    %c1_534 = arith.constant 1 : index
    %c0_535 = arith.constant 0 : index
    %c0_536 = arith.constant 0 : index
    %708 = vector.load %arg17[%c1_534, %c0_535, %c0_536] : memref<9x8x8xbf16, #tpu.memory_space<vmem>>, vector<1x8x8xbf16>
    %709 = vector.shape_cast %708 : vector<1x8x8xbf16> to vector<8x8xbf16>
    %710 = arith.truncf %707 : vector<8x64xf32> to vector<8x64xbf16>
    %cst_537 = arith.constant dense<0.000000e+00> : vector<8x64xf32>
    %711 = tpu.matmul %709, %710, %cst_537 {dimension_numbers = #tpu.dot_dimension_numbers<[1], [0], [0], [1], [0, 0, 1, 1], [], []>} : vector<8x8xbf16>, vector<8x64xbf16>, vector<8x64xf32> -> vector<8x64xf32>
    %712 = arith.addf %702, %711 : vector<8x64xf32>
    %c7_i32_538 = arith.constant 7 : i32
    %713 = tpu.dynamic_rotate %693 by %c7_i32_538 dim 1 : vector<8x64xf32>, i32 -> vector<8x64xf32>
    %c2_539 = arith.constant 2 : index
    %c0_540 = arith.constant 0 : index
    %c0_541 = arith.constant 0 : index
    %714 = vector.load %arg3[%c2_539, %c0_540, %c0_541] : memref<9x1x64xf32, #tpu.memory_space<vmem>>, vector<1x1x64xf32>
    %715 = vector.shape_cast %714 : vector<1x1x64xf32> to vector<1x64xf32>
    %716 = vector.broadcast %715 : vector<1x64xf32> to vector<8x64xf32>
    %717 = arith.mulf %713, %716 : vector<8x64xf32>
    %c2_542 = arith.constant 2 : index
    %c0_543 = arith.constant 0 : index
    %c0_544 = arith.constant 0 : index
    %718 = vector.load %arg17[%c2_542, %c0_543, %c0_544] : memref<9x8x8xbf16, #tpu.memory_space<vmem>>, vector<1x8x8xbf16>
    %719 = vector.shape_cast %718 : vector<1x8x8xbf16> to vector<8x8xbf16>
    %720 = arith.truncf %717 : vector<8x64xf32> to vector<8x64xbf16>
    %cst_545 = arith.constant dense<0.000000e+00> : vector<8x64xf32>
    %721 = tpu.matmul %719, %720, %cst_545 {dimension_numbers = #tpu.dot_dimension_numbers<[1], [0], [0], [1], [0, 0, 1, 1], [], []>} : vector<8x8xbf16>, vector<8x64xbf16>, vector<8x64xf32> -> vector<8x64xf32>
    %722 = arith.addf %712, %721 : vector<8x64xf32>
    %c1_i32_546 = arith.constant 1 : i32
    %723 = tpu.dynamic_rotate %693 by %c1_i32_546 dim 1 : vector<8x64xf32>, i32 -> vector<8x64xf32>
    %c3_547 = arith.constant 3 : index
    %c0_548 = arith.constant 0 : index
    %c0_549 = arith.constant 0 : index
    %724 = vector.load %arg3[%c3_547, %c0_548, %c0_549] : memref<9x1x64xf32, #tpu.memory_space<vmem>>, vector<1x1x64xf32>
    %725 = vector.shape_cast %724 : vector<1x1x64xf32> to vector<1x64xf32>
    %726 = vector.broadcast %725 : vector<1x64xf32> to vector<8x64xf32>
    %727 = arith.mulf %723, %726 : vector<8x64xf32>
    %c3_550 = arith.constant 3 : index
    %c0_551 = arith.constant 0 : index
    %c0_552 = arith.constant 0 : index
    %728 = vector.load %arg17[%c3_550, %c0_551, %c0_552] : memref<9x8x8xbf16, #tpu.memory_space<vmem>>, vector<1x8x8xbf16>
    %729 = vector.shape_cast %728 : vector<1x8x8xbf16> to vector<8x8xbf16>
    %730 = arith.truncf %727 : vector<8x64xf32> to vector<8x64xbf16>
    %cst_553 = arith.constant dense<0.000000e+00> : vector<8x64xf32>
    %731 = tpu.matmul %729, %730, %cst_553 {dimension_numbers = #tpu.dot_dimension_numbers<[1], [0], [0], [1], [0, 0, 1, 1], [], []>} : vector<8x8xbf16>, vector<8x64xbf16>, vector<8x64xf32> -> vector<8x64xf32>
    %732 = arith.addf %722, %731 : vector<8x64xf32>
    %c4_554 = arith.constant 4 : index
    %c0_555 = arith.constant 0 : index
    %c0_556 = arith.constant 0 : index
    %733 = vector.load %arg17[%c4_554, %c0_555, %c0_556] : memref<9x8x8xbf16, #tpu.memory_space<vmem>>, vector<1x8x8xbf16>
    %734 = vector.shape_cast %733 : vector<1x8x8xbf16> to vector<8x8xbf16>
    %735 = arith.truncf %693 : vector<8x64xf32> to vector<8x64xbf16>
    %cst_557 = arith.constant dense<0.000000e+00> : vector<8x64xf32>
    %736 = tpu.matmul %734, %735, %cst_557 {dimension_numbers = #tpu.dot_dimension_numbers<[1], [0], [0], [1], [0, 0, 1, 1], [], []>} : vector<8x8xbf16>, vector<8x64xbf16>, vector<8x64xf32> -> vector<8x64xf32>
    %737 = arith.addf %732, %736 : vector<8x64xf32>
    %c63_i32_558 = arith.constant 63 : i32
    %738 = tpu.dynamic_rotate %693 by %c63_i32_558 dim 1 : vector<8x64xf32>, i32 -> vector<8x64xf32>
    %c5_559 = arith.constant 5 : index
    %c0_560 = arith.constant 0 : index
    %c0_561 = arith.constant 0 : index
    %739 = vector.load %arg3[%c5_559, %c0_560, %c0_561] : memref<9x1x64xf32, #tpu.memory_space<vmem>>, vector<1x1x64xf32>
    %740 = vector.shape_cast %739 : vector<1x1x64xf32> to vector<1x64xf32>
    %741 = vector.broadcast %740 : vector<1x64xf32> to vector<8x64xf32>
    %742 = arith.mulf %738, %741 : vector<8x64xf32>
    %c5_562 = arith.constant 5 : index
    %c0_563 = arith.constant 0 : index
    %c0_564 = arith.constant 0 : index
    %743 = vector.load %arg17[%c5_562, %c0_563, %c0_564] : memref<9x8x8xbf16, #tpu.memory_space<vmem>>, vector<1x8x8xbf16>
    %744 = vector.shape_cast %743 : vector<1x8x8xbf16> to vector<8x8xbf16>
    %745 = arith.truncf %742 : vector<8x64xf32> to vector<8x64xbf16>
    %cst_565 = arith.constant dense<0.000000e+00> : vector<8x64xf32>
    %746 = tpu.matmul %744, %745, %cst_565 {dimension_numbers = #tpu.dot_dimension_numbers<[1], [0], [0], [1], [0, 0, 1, 1], [], []>} : vector<8x8xbf16>, vector<8x64xbf16>, vector<8x64xf32> -> vector<8x64xf32>
    %747 = arith.addf %737, %746 : vector<8x64xf32>
    %c57_i32_566 = arith.constant 57 : i32
    %748 = tpu.dynamic_rotate %693 by %c57_i32_566 dim 1 : vector<8x64xf32>, i32 -> vector<8x64xf32>
    %c6_567 = arith.constant 6 : index
    %c0_568 = arith.constant 0 : index
    %c0_569 = arith.constant 0 : index
    %749 = vector.load %arg3[%c6_567, %c0_568, %c0_569] : memref<9x1x64xf32, #tpu.memory_space<vmem>>, vector<1x1x64xf32>
    %750 = vector.shape_cast %749 : vector<1x1x64xf32> to vector<1x64xf32>
    %751 = vector.broadcast %750 : vector<1x64xf32> to vector<8x64xf32>
    %752 = arith.mulf %748, %751 : vector<8x64xf32>
    %c6_570 = arith.constant 6 : index
    %c0_571 = arith.constant 0 : index
    %c0_572 = arith.constant 0 : index
    %753 = vector.load %arg17[%c6_570, %c0_571, %c0_572] : memref<9x8x8xbf16, #tpu.memory_space<vmem>>, vector<1x8x8xbf16>
    %754 = vector.shape_cast %753 : vector<1x8x8xbf16> to vector<8x8xbf16>
    %755 = arith.truncf %752 : vector<8x64xf32> to vector<8x64xbf16>
    %cst_573 = arith.constant dense<0.000000e+00> : vector<8x64xf32>
    %756 = tpu.matmul %754, %755, %cst_573 {dimension_numbers = #tpu.dot_dimension_numbers<[1], [0], [0], [1], [0, 0, 1, 1], [], []>} : vector<8x8xbf16>, vector<8x64xbf16>, vector<8x64xf32> -> vector<8x64xf32>
    %757 = arith.addf %747, %756 : vector<8x64xf32>
    %c56_i32_574 = arith.constant 56 : i32
    %758 = tpu.dynamic_rotate %693 by %c56_i32_574 dim 1 : vector<8x64xf32>, i32 -> vector<8x64xf32>
    %c7_575 = arith.constant 7 : index
    %c0_576 = arith.constant 0 : index
    %c0_577 = arith.constant 0 : index
    %759 = vector.load %arg3[%c7_575, %c0_576, %c0_577] : memref<9x1x64xf32, #tpu.memory_space<vmem>>, vector<1x1x64xf32>
    %760 = vector.shape_cast %759 : vector<1x1x64xf32> to vector<1x64xf32>
    %761 = vector.broadcast %760 : vector<1x64xf32> to vector<8x64xf32>
    %762 = arith.mulf %758, %761 : vector<8x64xf32>
    %c7_578 = arith.constant 7 : index
    %c0_579 = arith.constant 0 : index
    %c0_580 = arith.constant 0 : index
    %763 = vector.load %arg17[%c7_578, %c0_579, %c0_580] : memref<9x8x8xbf16, #tpu.memory_space<vmem>>, vector<1x8x8xbf16>
    %764 = vector.shape_cast %763 : vector<1x8x8xbf16> to vector<8x8xbf16>
    %765 = arith.truncf %762 : vector<8x64xf32> to vector<8x64xbf16>
    %cst_581 = arith.constant dense<0.000000e+00> : vector<8x64xf32>
    %766 = tpu.matmul %764, %765, %cst_581 {dimension_numbers = #tpu.dot_dimension_numbers<[1], [0], [0], [1], [0, 0, 1, 1], [], []>} : vector<8x8xbf16>, vector<8x64xbf16>, vector<8x64xf32> -> vector<8x64xf32>
    %767 = arith.addf %757, %766 : vector<8x64xf32>
    %c55_i32_582 = arith.constant 55 : i32
    %768 = tpu.dynamic_rotate %693 by %c55_i32_582 dim 1 : vector<8x64xf32>, i32 -> vector<8x64xf32>
    %c8_583 = arith.constant 8 : index
    %c0_584 = arith.constant 0 : index
    %c0_585 = arith.constant 0 : index
    %769 = vector.load %arg3[%c8_583, %c0_584, %c0_585] : memref<9x1x64xf32, #tpu.memory_space<vmem>>, vector<1x1x64xf32>
    %770 = vector.shape_cast %769 : vector<1x1x64xf32> to vector<1x64xf32>
    %771 = vector.broadcast %770 : vector<1x64xf32> to vector<8x64xf32>
    %772 = arith.mulf %768, %771 : vector<8x64xf32>
    %c8_586 = arith.constant 8 : index
    %c0_587 = arith.constant 0 : index
    %c0_588 = arith.constant 0 : index
    %773 = vector.load %arg17[%c8_586, %c0_587, %c0_588] : memref<9x8x8xbf16, #tpu.memory_space<vmem>>, vector<1x8x8xbf16>
    %774 = vector.shape_cast %773 : vector<1x8x8xbf16> to vector<8x8xbf16>
    %775 = arith.truncf %772 : vector<8x64xf32> to vector<8x64xbf16>
    %cst_589 = arith.constant dense<0.000000e+00> : vector<8x64xf32>
    %776 = tpu.matmul %774, %775, %cst_589 {dimension_numbers = #tpu.dot_dimension_numbers<[1], [0], [0], [1], [0, 0, 1, 1], [], []>} : vector<8x8xbf16>, vector<8x64xbf16>, vector<8x64xf32> -> vector<8x64xf32>
    %777 = arith.addf %767, %776 : vector<8x64xf32>
    %778 = arith.addf %777, %593 : vector<8x64xf32>
    %c1_590 = arith.constant 1 : index
    %c0_591 = arith.constant 0 : index
    %c0_592 = arith.constant 0 : index
    %779 = vector.load %arg18[%c1_590, %c0_591, %c0_592] : memref<2x8x64xf32, #tpu.memory_space<vmem>>, vector<1x8x64xf32>
    %780 = vector.shape_cast %779 : vector<1x8x64xf32> to vector<8x64xf32>
    %781 = vector.shape_cast %778 : vector<8x64xf32> to vector<1x8x64xf32>
    tpu.vector_store %arg18[%c1_590, %c0_591, %c0_592], %781 {strides = array<i32>} : memref<2x8x64xf32, #tpu.memory_space<vmem>>, vector<1x8x64xf32>,
    return
  }
  func.func @transform_0(%arg0: i32) -> (i32, i32, i32) {
    %c0_i32 = arith.constant 0 : i32
    %c0_i32_0 = arith.constant 0 : i32
    %c0_i32_1 = arith.constant 0 : i32
    %c0_i32_2 = arith.constant 0 : i32
    return %c0_i32, %c0_i32_0, %c0_i32_1 : i32, i32, i32
  }
  func.func @transform_1(%arg0: i32) -> (i32, i32, i32) {
    %c0_i32 = arith.constant 0 : i32
    %c0_i32_0 = arith.constant 0 : i32
    %c0_i32_1 = arith.constant 0 : i32
    %c0_i32_2 = arith.constant 0 : i32
    return %c0_i32, %c0_i32_0, %c0_i32_1 : i32, i32, i32
  }
  func.func @transform_2(%arg0: i32) -> (i32, i32, i32) {
    %c0_i32 = arith.constant 0 : i32
    %c0_i32_0 = arith.constant 0 : i32
    %c0_i32_1 = arith.constant 0 : i32
    %c0_i32_2 = arith.constant 0 : i32
    return %c0_i32, %c0_i32_0, %c0_i32_1 : i32, i32, i32
  }
  func.func @transform_3(%arg0: i32) -> (i32, i32) {
    %c0_i32 = arith.constant 0 : i32
    %c0_i32_0 = arith.constant 0 : i32
    %c0_i32_1 = arith.constant 0 : i32
    return %c0_i32, %c0_i32_0 : i32, i32
  }
  func.func @transform_4(%arg0: i32) -> (i32, i32) {
    %c0_i32 = arith.constant 0 : i32
    %c0_i32_0 = arith.constant 0 : i32
    %c0_i32_1 = arith.constant 0 : i32
    return %c0_i32, %c0_i32_0 : i32, i32
  }
  func.func @transform_5(%arg0: i32) -> (i32, i32) {
    %c0_i32 = arith.constant 0 : i32
    %c0_i32_0 = arith.constant 0 : i32
    %c0_i32_1 = arith.constant 0 : i32
    return %c0_i32, %c0_i32_0 : i32, i32
  }
  func.func @transform_6(%arg0: i32) -> (i32, i32) {
    %c0_i32 = arith.constant 0 : i32
    %c0_i32_0 = arith.constant 0 : i32
    %c0_i32_1 = arith.constant 0 : i32
    return %c0_i32, %c0_i32_0 : i32, i32
  }
  func.func @transform_7(%arg0: i32) -> (i32, i32, i32) {
    %c0_i32 = arith.constant 0 : i32
    %c0_i32_0 = arith.constant 0 : i32
    %c0_i32_1 = arith.constant 0 : i32
    %c0_i32_2 = arith.constant 0 : i32
    return %c0_i32, %c0_i32_0, %c0_i32_1 : i32, i32, i32
  }
  func.func @transform_8(%arg0: i32) -> (i32, i32) {
    %c0_i32 = arith.constant 0 : i32
    %c0_i32_0 = arith.constant 0 : i32
    %c0_i32_1 = arith.constant 0 : i32
    return %c0_i32, %c0_i32_0 : i32, i32
  }
  func.func @transform_9(%arg0: i32) -> (i32, i32) {
    %c0_i32 = arith.constant 0 : i32
    %c0_i32_0 = arith.constant 0 : i32
    %c0_i32_1 = arith.constant 0 : i32
    return %c0_i32, %c0_i32_0 : i32, i32
  }
  func.func @transform_10(%arg0: i32) -> (i32, i32, i32) {
    %c0_i32 = arith.constant 0 : i32
    %c0_i32_0 = arith.constant 0 : i32
    %c0_i32_1 = arith.constant 0 : i32
    %c0_i32_2 = arith.constant 0 : i32
    return %c0_i32, %c0_i32_0, %c0_i32_1 : i32, i32, i32
  }
  func.func @transform_11(%arg0: i32) -> (i32, i32) {
    %c0_i32 = arith.constant 0 : i32
    %c0_i32_0 = arith.constant 0 : i32
    %c0_i32_1 = arith.constant 0 : i32
    return %c0_i32, %c0_i32_0 : i32, i32
  }
  func.func @transform_12(%arg0: i32) -> (i32, i32) {
    %c0_i32 = arith.constant 0 : i32
    %c0_i32_0 = arith.constant 0 : i32
    %c0_i32_1 = arith.constant 0 : i32
    return %c0_i32, %c0_i32_0 : i32, i32
  }
  func.func @transform_13(%arg0: i32) -> (i32, i32, i32) {
    %c0_i32 = arith.constant 0 : i32
    %c0_i32_0 = arith.constant 0 : i32
    %c0_i32_1 = arith.constant 0 : i32
    %c0_i32_2 = arith.constant 0 : i32
    return %c0_i32, %c0_i32_0, %c0_i32_1 : i32, i32, i32
  }
  func.func @transform_14(%arg0: i32) -> (i32, i32) {
    %c0_i32 = arith.constant 0 : i32
    %c0_i32_0 = arith.constant 0 : i32
    %c0_i32_1 = arith.constant 0 : i32
    return %c0_i32, %c0_i32_0 : i32, i32
  }
  func.func @transform_15(%arg0: i32) -> (i32, i32) {
    %c0_i32 = arith.constant 0 : i32
    %c0_i32_0 = arith.constant 0 : i32
    %c0_i32_1 = arith.constant 0 : i32
    return %c0_i32, %c0_i32_0 : i32, i32
  }
  func.func @transform_16(%arg0: i32) -> (i32, i32, i32) {
    %c0_i32 = arith.constant 0 : i32
    %c0_i32_0 = arith.constant 0 : i32
    %c0_i32_1 = arith.constant 0 : i32
    %c0_i32_2 = arith.constant 0 : i32
    return %c0_i32, %c0_i32_0, %c0_i32_1 : i32, i32, i32
  }
  func.func @transform_17(%arg0: i32) -> (i32, i32, i32) {
    %c0_i32 = arith.constant 0 : i32
    %c0_i32_0 = arith.constant 0 : i32
    %c0_i32_1 = arith.constant 0 : i32
    %c0_i32_2 = arith.constant 0 : i32
    return %c0_i32, %c0_i32_0, %c0_i32_1 : i32, i32, i32
  }
}

</mosaic_0001>

<bundles_post_ra>
// kernel: tpu_custom_call.1
= control target key start
LH: loop header
LB: loop body
LE: loop exit
PB: predicated region body
PF: predicated region fallthrough
CT: control target
= control target key end

     0   :  { %s7610_s0 = inlined_call_operand.vmem [shape: f32[2,4,256], index: 0, kind: input, shape index: {}]   ;;  %s7611_s1 = inlined_call_operand.vmem [shape: f32[9,1,256], index: 1, kind: input, shape index: {}]   ;;  %s7612_s2 = inlined_call_operand.vmem [shape: f32[9,1,64], index: 2, kind: input, shape index: {}]   ;;  %s7613_s3 = inlined_call_operand.vmem [shape: bf16[256,64], index: 3, kind: input, shape index: {}]   ;;  %s7614_s4 = inlined_call_operand.vmem [shape: bf16[8,4], index: 4, kind: input, shape index: {}]   ;;  %s7615_s5 = inlined_call_operand.vmem [shape: f32[4,1], index: 5, kind: input, shape index: {}]   ;;  %s7616_s6 = inlined_call_operand.vmem [shape: f32[4,1], index: 6, kind: input, shape index: {}]   ;;  %s7617_s7 = inlined_call_operand.vmem [shape: bf16[9,8,4], index: 7, kind: input, shape index: {}]   ;;  %s7618_s8 = inlined_call_operand.vmem [shape: f32[8,1], index: 8, kind: input, shape index: {}]   ;;  %s7619_s9 = inlined_call_operand.vmem [shape: f32[8,1], index: 9, kind: input, shape index: {}]   ;;  %s7620_s10 = inlined_call_operand.vmem [shape: bf16[9,8,8], index: 10, kind: input, shape index: {}]   ;;  %s7621_s11 = inlined_call_operand.vmem [shape: f32[8,1], index: 11, kind: input, shape index: {}]   ;;  %s7622_s12 = inlined_call_operand.vmem [shape: f32[8,1], index: 12, kind: input, shape index: {}]   ;;  %s7623_s13 = inlined_call_operand.vmem [shape: bf16[9,8,8], index: 13, kind: input, shape index: {}]   ;;  %s7624_s14 = inlined_call_operand.vmem [shape: f32[8,1], index: 14, kind: input, shape index: {}]   ;;  %s7625_s15 = inlined_call_operand.vmem [shape: f32[8,1], index: 15, kind: input, shape index: {}]   ;;  %s7626_s16 = inlined_call_operand.vmem [shape: bf16[9,8,8], index: 16, kind: input, shape index: {}]   ;;  %s7627_s17 = inlined_call_operand.hbm [shape: f32[2,8,64], index: 17, kind: output, shape index: {}]  }
   0x1   :  { %7666 = sst [smem:[#allocation5_spill]] %s7610_s0 }
   0x2   :  { %7667 = sst [smem:[#allocation6_spill]] %s7611_s1 }
   0x3   :  { %v59_v0 = vld [vmem:[%s7615_s5] sm:$0xf]  ;;  %v6064_v1 = vmov 0  }
   0x4   :  { %6006 = vset.pattern.permute.xlu0 %v6064_v1  ;;  %186 = vmatprep.mubr.bf16.mxu0 %v6064_v1  ;;  %v73_v2 = vld [vmem:[%s7616_s6] sm:$0xf] }
   0x5   :  { %62 = vperm.xlu0 %6006, %v59_v0   ;;  %236 = vmatprep.mubr.bf16.mxu1 %v6064_v1 }
   0x6   :  { %6007 = vset.pattern.permute.xlu1 %v6064_v1 }
   0x9   :  { %76 = vperm.xlu0 %6006, %v73_v2  }
   0xa   :  { %22 = vsyncpa [#allocation3], 0  ;;  %v6065_v3 = vmov 839922192   ;;  %v67_v5 = vlaneseq  ;;  %s7668_s0 = sld [smem:[#allocation5_spill]]  ;;  %s7634_s30 = smov 17  }
   0xb   :  { %v65_v4 = vunpack.c.l.s4 %v6065_v3  ;;  %s7636_s18 = smov 16   ;;  %s7632_s19 = smov 15   ;;  %v939_v18 = vld [vmem:[%s7618_s8] sm:$0xff]  ;;  %vm147_vm2 = vcmask 1041408   ;;  %vm143_vm4 = vcmask 31744   ;;  %vm994_vm10 = vcmask 1043456  }
   0xc   :  { %v68_v7 = vshrl.u32 %v67_v5, 7  ;;  %s7640_s1 = smov 1   ;;  %s7648_s20 = smov 127   ;;  %v6244_v19 = vand.u32 127, %v67_v5  ;;  %v5209_v49 = vld [vmem:[%s7617_s7 + $0x4] sm:$0xf] }
   0xd   :  { %v66_v6 = vunpack.c.0.s8 %v65_v4  ;;  %s7630_s21 = smov 113   ;;  %s7650_s22 = smov 112   ;;  %v114_v62 = vld [vmem:[%s7617_s7] sm:$0xf]  ;;  %vm954_vm11 = vcmask 1048064   ;;  %vm6081_vm12 = vmmov 0  }
   0xe   :  { %s7656_s23 = smov 111   ;;  %v6246_v20 = vsub.s32 0, %v68_v7  ;;  %v6248_v21 = vsub.s32 1, %v68_v7  ;;  %s7669_s28 = sld [smem:[#allocation6_spill]]  ;;  %vm121_vm0 = vcmp.lt.s32.totalorder %v6244_v19, 16  ;;  %vm97_vm1 = vcmp.lt.s32.totalorder %v6244_v19, 17 }
   0xf   :  { %v6193_v8 = vsub.s32 %v66_v6, %v68_v7  ;;  %vm249_vm3 = vcmp.lt.s32.totalorder %v6244_v19, 15  ;;  %vm327_vm5 = vcmp.lt.s32.totalorder %v6244_v19, 1  ;;  %vm461_vm6 = vcmp.lt.s32.totalorder %v6244_v19, 127  ;;  %s7639_s27 = smov 56   ;;  %s7645_s29 = smov 55  }
  0x10   :  { %v6199_v11 = vld [vmem:[%s7668_s0] sm:$0xff]  ;;  %vm539_vm7 = vcmp.lt.s32.totalorder %v6244_v19, 113  ;;  %vm617_vm8 = vcmp.lt.s32.totalorder %v6244_v19, 112  ;;  %vm695_vm9 = vcmp.lt.s32.totalorder %v6244_v19, 111  ;;  %s7660_s25 = smov 71   ;;  %s7652_s26 = smov 65  }
  0x11   :  { %s7646_s24 = smov 120   ;;  %vm990_vm13 = vcmask 64512   ;;  %vm2653_vm14 = vcmask 523264   ;;  %v4205_v19 = vld [vmem:[%s7621_s11] sm:$0xff] }
  0x14   :  { %v5208_v22 = vld [vmem:[%s7669_s28 + $0x2] sm:$0x3]  ;;  %v100_v27 = vld [vmem:[%s7669_s28] sm:$0x3]  ;;  %v5214_v34 = vld [vmem:[%s7669_s28 + $0x4] sm:$0x3] }
  0x15   :  { %v134_v25 = vrot.slane %v5208_v22, %v6248_v21  ;;  %v130_v26 = vrot.slane %v5208_v22, %v6246_v20  ;;  %v109_v35 = vrot.slane %v100_v27, %v6248_v21  ;;  %v105_v36 = vrot.slane %v100_v27, %v6246_v20  ;;  %v5218_v48 = vld [vmem:[%s7669_s28 + $0x6] sm:$0x3]  ;;  %v5225_v61 = vld [vmem:[%s7669_s28 + $0xa] sm:$0x3] }
  0x16   :  { %v258_v42 = vrot.slane %v5214_v34, %v6246_v20  ;;  %v262_v45 = vrot.slane %v5214_v34, %v6248_v21  ;;  %v336_v55 = vrot.slane %v5218_v48, %v6246_v20  ;;  %v340_v60 = vrot.slane %v5218_v48, %v6248_v21 }
  0x17   :  { %v470_v7 = vrot.slane %v5225_v61, %v6246_v20 }
  0x80   :  { %v63_v9 = vpop.permute.xlu0 %62 }
  0x81   :  { %v70_v10 = vrot.slane %v63_v9, %v6193_v8 }
  0x83   :  { %v72_v13 = vmul.f32 %v70_v10, %v6199_v11 }
  0x84   :  { %v77_v12 = vpop.permute.xlu0 %76 }
  0x85   :  { %v84_v14 = vrot.slane %v77_v12, %v6193_v8 }
  0x87   :  { %v86_v15 = vadd.f32 %v84_v14, %v72_v13  ;;  %v474_v13 = vrot.slane %v5225_v61, %v6248_v21  ;;  %v5229_v14 = vld [vmem:[%s7669_s28 + $0xc] sm:$0x3] }
  0x89   :  { %v6203_v16 = vmax.f32 %v86_v15, 0.0  ;;  %v5215_v15 = vld [vmem:[%s7617_s7 + $0x8] sm:$0xf] }
  0x8b   :  { %91 = vrot.lane.b32.xlu0 %v6203_v16, %s7634_s30  ;;  %117 = vrot.lane.b32.xlu1 %v6203_v16, %s7636_s18  ;;  %v6211_v17 = vcombine.high %v6203_v16, %v6203_v16  ;;  %v403_v4 = vpack.c.bf16 %v6203_v16, %v6203_v16 }
  0x8d   :  { %v404_v3 = vpack.c.bf16 %v6211_v17, %v6211_v17 }
  0x8f   :  { %245 = vrot.lane.b32.xlu0 %v6203_v16, %s7632_s19  ;;  %119 = vrot.lane.b32.xlu1 %v6211_v17, %s7636_s18  ;;  %s7644_s18 = smov 63  }
  0x93   :  { %323 = vrot.lane.b32.xlu0 %v6203_v16, %s7640_s1  ;;  %93 = vrot.lane.b32.xlu1 %v6211_v17, %s7634_s30  ;;  %s7638_s30 = smov 57  }
  0x97   :  { %457 = vrot.lane.b32.xlu0 %v6203_v16, %s7648_s20  ;;  %247 = vrot.lane.b32.xlu1 %v6211_v17, %s7632_s19  ;;  %s7679_s19 = smov 113  }
  0x9b   :  { %535 = vrot.lane.b32.xlu0 %v6203_v16, %s7630_s21  ;;  %325 = vrot.lane.b32.xlu1 %v6211_v17, %s7640_s1 }
  0x9f   :  { %613 = vrot.lane.b32.xlu0 %v6203_v16, %s7650_s22  ;;  %459 = vrot.lane.b32.xlu1 %v6211_v17, %s7648_s20 }
  0xa3   :  { %691 = vrot.lane.b32.xlu0 %v6203_v16, %s7656_s23  ;;  %537 = vrot.lane.b32.xlu1 %v6211_v17, %s7630_s21  ;;  %s6075_s21 = smov 64  }
  0xa7   :  { %942 = vperm.xlu0 %6006, %v939_v18   ;;  %615 = vrot.lane.b32.xlu1 %v6211_v17, %s7650_s22 }
  0xab   :  { %693 = vrot.lane.b32.xlu1 %v6211_v17, %s7656_s23 }
  0xfd   :  { %v92_v23 = vpop.permute.xlu0 %91  ;;  %v118_v24 = vpop.permute.xlu1 %117 }
 0x101   :  { %v246_v28 = vpop.permute.xlu0 %245  ;;  %v120_v29 = vpop.permute.xlu1 %119 }
 0x102   :  { %v123_v30 = vsel %vm121_vm0, %v120_v29, %v118_v24  ;;  %v122_v31 = vsel %vm121_vm0, %v118_v24, %v120_v29 }
 0x103   :  { %v138_v32 = vmul.f32 %v134_v25, %v122_v31  ;;  %v137_v33 = vmul.f32 %v130_v26, %v123_v30  ;;  %v548_v26 = vrot.slane %v5229_v14, %v6246_v20  ;;  %v552_v30 = vrot.slane %v5229_v14, %v6248_v21  ;;  %v5233_v31 = vld [vmem:[%s7669_s28 + $0xe] sm:$0x3]  ;;  %v6415_v14 = vld [vmem:[%s7613_s3 + $0x30] sm:$0xff]  }
 0x105   :  { %v324_v37 = vpop.permute.xlu0 %323  ;;  %v94_v38 = vpop.permute.xlu1 %93  ;;  %v142_v39 = vpack.c.bf16 %v138_v32, %v138_v32  ;;  %v141_v40 = vpack.c.bf16 %v137_v33, %v137_v33  ;;  %v5219_v32 = vld [vmem:[%s7617_s7 + $0xc] sm:$0xf] }
 0x106   :  { %v99_v41 = vsel %vm97_vm1, %v94_v38, %v92_v23  ;;  %v98_v43 = vsel %vm97_vm1, %v92_v23, %v94_v38  ;;  %v409_v23 = vsel %vm147_vm2, %v403_v4, 0  ;;  %v626_v38 = vrot.slane %v5233_v31, %v6246_v20 }
 0x107   :  { %5210 = vmatprep.subr.msk.bf16.mxu0 %vm147_vm2, %v142_v39  ;;  %v149_v44 = vsel %vm147_vm2, %v141_v40, 0  ;;  %v113_v46 = vmul.f32 %v109_v35, %v98_v43  ;;  %v112_v47 = vmul.f32 %v105_v36, %v99_v41  ;;  %v630_v43 = vrot.slane %v5233_v31, %v6248_v21 }
 0x108   :  { %169 = vmatpush1.bf16.msra.mxu0 %v149_v44  ;;  %v5237_v44 = vld [vmem:[%s7669_s28 + $0x10] sm:$0x3] }
 0x109   :  { %v248_v50 = vpop.permute.xlu1 %247  ;;  %v116_v51 = vpack.c.bf16 %v113_v46, %v113_v46  ;;  %v115_v52 = vpack.c.bf16 %v112_v47, %v112_v47  ;;  %v458_v56 = vpop.permute.xlu0 %457 }
 0x10a   :  { %v250_v53 = vsel %vm249_vm3, %v246_v28, %v248_v50  ;;  %v251_v54 = vsel %vm249_vm3, %v248_v50, %v246_v28 }
 0x10b   :  { %v265_v57 = vmul.f32 %v258_v42, %v251_v54  ;;  %v266_v58 = vmul.f32 %v262_v45, %v250_v53  ;;  %5211 = vmatmul.mubr.msk.bf16.vlgmr.msra.gmra.mxu0 %vm143_vm4, %v5209_v49  ;;  %5212 = vmatprep.subr.msk.bf16.mxu1 %vm147_vm2, %v116_v51  ;;  %v199_v59 = vsel %vm147_vm2, %v115_v52, 0  ;;  %v5222_v45 = vld [vmem:[%s7617_s7 + $0x10] sm:$0xf]  ;;  %v704_v51 = vrot.slane %v5237_v44, %v6246_v20 }
 0x10c   :  { %219 = vmatpush1.bf16.msra.mxu1 %v199_v59  ;;  %312 = vmatprep.mubr.bf16.mxu0 %v6064_v1 }
 0x10d   :  { %v269_v63 = vpack.c.bf16 %v265_v57, %v265_v57  ;;  %v270_v0 = vpack.c.bf16 %v266_v58, %v266_v58  ;;  %v326_v2 = vpop.permute.xlu1 %325  ;;  %v536_v16 = vpop.permute.xlu0 %535 }
 0x10e   :  { %v328_v5 = vsel %vm327_vm5, %v324_v37, %v326_v2  ;;  %v329_v6 = vsel %vm327_vm5, %v326_v2, %v324_v37 }
 0x10f   :  { %v343_v9 = vmul.f32 %v336_v55, %v329_v6  ;;  %v344_v10 = vmul.f32 %v340_v60, %v328_v5  ;;  %5213 = vmatmul.mubr.msk.bf16.vlgmr.msra.gmra.mxu1 %vm143_vm4, %v114_v62  ;;  %5216 = vmatprep.subr.msk.bf16.mxu0 %vm147_vm2, %v270_v0  ;;  %v275_v12 = vsel %vm147_vm2, %v269_v63, 0  ;;  %v708_v55 = vrot.slane %v5237_v44, %v6248_v21 }
 0x110   :  { %295 = vmatpush1.bf16.msra.mxu0 %v275_v12  ;;  %390 = vmatprep.mubr.bf16.mxu1 %v6064_v1  ;;  %v6403_v12 = vld [vmem:[%s7613_s3 + $0x38] sm:$0xff]  }
 0x111   :  { %v347_v17 = vpack.c.bf16 %v343_v9, %v343_v9  ;;  %v348_v18 = vpack.c.bf16 %v344_v10, %v344_v10  ;;  %v460_v22 = vpop.permute.xlu1 %459  ;;  %5223 = vmatprep.subr.msk.bf16.mxu0 %vm147_vm2, %v404_v3  ;;  %v614_v39 = vpop.permute.xlu0 %613  ;;  %v5230_v3 = vld [vmem:[%s7617_s7 + $0x18] sm:$0xf]  ;;  %v5238_v9 = vld [vmem:[%s7617_s7 + $0x20] sm:$0xf] }
 0x112   :  { %v462_v24 = vsel %vm461_vm6, %v458_v56, %v460_v22  ;;  %v463_v25 = vsel %vm461_vm6, %v460_v22, %v458_v56  ;;  %v5226_v56 = vld [vmem:[%s7617_s7 + $0x14] sm:$0xf]  ;;  %v6398_v10 = vld [vmem:[%s7613_s3 + $0x78] sm:$0xff]  }
 0x113   :  { %v477_v27 = vmul.f32 %v470_v7, %v462_v24  ;;  %v478_v28 = vmul.f32 %v474_v13, %v463_v25  ;;  %5217 = vmatmul.mubr.msk.bf16.vlgmr.msra.gmra.mxu0 %vm143_vm4, %v5215_v15  ;;  %5220 = vmatprep.subr.msk.bf16.mxu1 %vm147_vm2, %v348_v18  ;;  %v353_v29 = vsel %vm147_vm2, %v347_v17, 0  ;;  %v5234_v7 = vld [vmem:[%s7617_s7 + $0x1c] sm:$0xf]  ;;  %v6410_v13 = vld [vmem:[%s7613_s3 + $0x70] sm:$0xff]   ;;  %v6422_v15 = vld [vmem:[%s7613_s3 + $0x68] sm:$0xff]  }
 0x114   :  { %373 = vmatpush1.bf16.msra.mxu1 %v353_v29  ;;  %429 = vmatpush1.bf16.msra.mxu0 %v409_v23  ;;  %v6434_v17 = vld [vmem:[%s7613_s3 + $0x60] sm:$0xff]   ;;  %v6446_v22 = vld [vmem:[%s7613_s3 + $0x58] sm:$0xff]   ;;  %v6458_v24 = vld [vmem:[%s7613_s3 + $0x50] sm:$0xff]  }
 0x115   :  { %v481_v33 = vpack.c.bf16 %v477_v27, %v477_v27  ;;  %v482_v34 = vpack.c.bf16 %v478_v28, %v478_v28  ;;  %v538_v35 = vpop.permute.xlu1 %537  ;;  %446 = vmatprep.mubr.bf16.mxu0 %v6064_v1  ;;  %v692_v57 = vpop.permute.xlu0 %691  ;;  %v6439_v18 = vld [vmem:[%s7613_s3 + $0x20] sm:$0xff]   ;;  %v6451_v23 = vld [vmem:[%s7613_s3 + $0x18] sm:$0xff]   ;;  %v6463_v25 = vld [vmem:[%s7613_s3 + $0x10] sm:$0xff]  }
 0x116   :  { %v540_v36 = vsel %vm539_vm7, %v536_v16, %v538_v35  ;;  %v541_v37 = vsel %vm539_vm7, %v538_v35, %v536_v16  ;;  %v6427_v16 = vld [vmem:[%s7613_s3 + $0x28] sm:$0xff]   ;;  %v6482_v28 = vld [vmem:[%s7613_s3 + $0x40] sm:$0xff]  }
 0x117   :  { %v555_v40 = vmul.f32 %v548_v26, %v540_v36  ;;  %v556_v41 = vmul.f32 %v552_v30, %v541_v37  ;;  %5221 = vmatmul.mubr.msk.bf16.vlgmr.msra.gmra.mxu1 %vm143_vm4, %v5219_v32  ;;  %5227 = vmatprep.subr.msk.bf16.mxu1 %vm147_vm2, %v482_v34  ;;  %v487_v42 = vsel %vm147_vm2, %v481_v33, 0  ;;  %v6470_v26 = vld [vmem:[%s7613_s3 + $0x48] sm:$0xff]   ;;  %v6487_v29 = vld [vmem:[%s7613_s3] sm:$0xff]  }
 0x118   :  { %507 = vmatpush1.bf16.msra.mxu1 %v487_v42  ;;  %524 = vmatprep.mubr.bf16.mxu1 %v6064_v1  ;;  %v6475_v27 = vld [vmem:[%s7613_s3 + $0x8] sm:$0xff]   ;;  %v946_v30 = vld [vmem:[%s7619_s9] sm:$0xff] }
 0x119   :  { %v559_v46 = vpack.c.bf16 %v555_v40, %v555_v40  ;;  %v560_v47 = vpack.c.bf16 %v556_v41, %v556_v41  ;;  %v616_v48 = vpop.permute.xlu1 %615  ;;  %949 = vperm.xlu1 %6007, %v946_v30  }
 0x11a   :  { %v618_v49 = vsel %vm617_vm8, %v614_v39, %v616_v48  ;;  %v619_v50 = vsel %vm617_vm8, %v616_v48, %v614_v39 }
 0x11b   :  { %v633_v52 = vmul.f32 %v626_v38, %v618_v49  ;;  %v634_v53 = vmul.f32 %v630_v43, %v619_v50  ;;  %5224 = vmatmul.mubr.msk.bf16.vlgmr.msra.gmra.mxu0 %vm143_vm4, %v5222_v45  ;;  %5231 = vmatprep.subr.msk.bf16.mxu0 %vm147_vm2, %v560_v47  ;;  %v565_v54 = vsel %vm147_vm2, %v559_v46, 0 }
 0x11c   :  { %585 = vmatpush1.bf16.msra.mxu0 %v565_v54  ;;  %602 = vmatprep.mubr.bf16.mxu0 %v6064_v1 }
 0x11d   :  { %v637_v58 = vpack.c.bf16 %v633_v52, %v633_v52  ;;  %v638_v59 = vpack.c.bf16 %v634_v53, %v634_v53  ;;  %v694_v60 = vpop.permute.xlu1 %693 }
 0x11e   :  { %v696_v61 = vsel %vm695_vm9, %v692_v57, %v694_v60  ;;  %v697_v62 = vsel %vm695_vm9, %v694_v60, %v692_v57 }
 0x11f   :  { %v711_v63 = vmul.f32 %v704_v51, %v696_v61  ;;  %v712_v0 = vmul.f32 %v708_v55, %v697_v62  ;;  %5228 = vmatmul.mubr.msk.bf16.vlgmr.msra.gmra.mxu1 %vm143_vm4, %v5226_v56  ;;  %5235 = vmatprep.subr.msk.bf16.mxu1 %vm147_vm2, %v638_v59  ;;  %v643_v2 = vsel %vm147_vm2, %v637_v58, 0 }
 0x120   :  { %663 = vmatpush1.bf16.msra.mxu1 %v643_v2  ;;  %680 = vmatprep.mubr.bf16.mxu1 %v6064_v1 }
 0x121   :  { %v715_v4 = vpack.c.bf16 %v711_v63, %v711_v63  ;;  %v716_v5 = vpack.c.bf16 %v712_v0, %v712_v0  ;;  %5441 = vmatprep.subr.bf16.mxu1 %v6398_v10 }
 0x123   :  { %5232 = vmatmul.mubr.msk.bf16.vlgmr.msra.gmra.mxu0 %vm143_vm4, %v5230_v3  ;;  %5239 = vmatprep.subr.msk.bf16.mxu0 %vm147_vm2, %v716_v5  ;;  %v721_v6 = vsel %vm147_vm2, %v715_v4, 0 }
 0x124   :  { %741 = vmatpush1.bf16.msra.mxu0 %v721_v6  ;;  %758 = vmatprep.mubr.bf16.mxu0 %v6064_v1 }
 0x127   :  { %5236 = vmatmul.mubr.msk.bf16.vlgmr.msra.gmra.mxu1 %vm143_vm4, %v5234_v7 }
 0x128   :  { %5442 = vmatpush3.bf16.msra.mxu1 %v6403_v12 }
 0x129   :  { %5443 = vmatprep.subr.bf16.mxu1 %v6410_v13 }
 0x12b   :  { %5240 = vmatmul.mubr.msk.bf16.vlgmr.msra.gmra.mxu0 %vm143_vm4, %v5238_v9 }
 0x12c   :  { %5444 = vmatpush3.bf16.msra.mxu1 %v6415_v14 }
 0x12d   :  { %5445 = vmatprep.subr.bf16.mxu1 %v6422_v15 }
 0x130   :  { %5446 = vmatpush3.bf16.msra.mxu1 %v6427_v16 }
 0x131   :  { %5447 = vmatprep.subr.bf16.mxu1 %v6434_v17 }
 0x134   :  { %5448 = vmatpush3.bf16.msra.mxu1 %v6439_v18 }
 0x135   :  { %5449 = vmatprep.subr.bf16.mxu1 %v6446_v22 }
 0x138   :  { %5450 = vmatpush3.bf16.msra.mxu1 %v6451_v23 }
 0x139   :  { %5451 = vmatprep.subr.bf16.mxu1 %v6458_v24 }
 0x13c   :  { %5452 = vmatpush3.bf16.msra.mxu1 %v6463_v25 }
 0x13d   :  { %5453 = vmatprep.subr.bf16.mxu1 %v6470_v26 }
 0x140   :  { %5454 = vmatpush3.bf16.msra.mxu1 %v6475_v27 }
 0x141   :  { %5455 = vmatprep.subr.bf16.mxu1 %v6482_v28 }
 0x144   :  { %5456 = vmatpush3.bf16.msra.mxu1 %v6487_v29 }
 0x1cb   :  { %v188_v31 = vpop.f32.mrf.mxu0 }
 0x1cd   :  { %v190_v32 = vpop.f32.mrf.mxu0 }
 0x1cf   :  { %v192_v33 = vpop.f32.mrf.mxu0  ;;  %v238_v34 = vpop.f32.mrf.mxu1 }
 0x1d0   :  { %v239_v49 = vadd.f32 %v238_v34, %v188_v31 }
 0x1d1   :  { %v193_v35 = vpop.f32.mrf.mxu0  ;;  %v240_v36 = vpop.f32.mrf.mxu1 }
 0x1d2   :  { %v241_v52 = vadd.f32 %v240_v36, %v190_v32 }
 0x1d3   :  { %v242_v37 = vpop.f32.mrf.mxu1  ;;  %v314_v38 = vpop.f32.mrf.mxu0 }
 0x1d4   :  { %v321_v53 = vadd.f32 %v314_v38, %v239_v49  ;;  %v950_v49 = vpop.permute.xlu1 %949 }
 0x1d5   :  { %v243_v39 = vpop.f32.mrf.mxu1  ;;  %v316_v40 = vpop.f32.mrf.mxu0 }
 0x1d6   :  { %v322_v56 = vadd.f32 %v316_v40, %v241_v52 }
 0x1d7   :  { %v318_v41 = vpop.f32.mrf.mxu0  ;;  %v392_v42 = vpop.f32.mrf.mxu1 }
 0x1d8   :  { %v399_v57 = vadd.f32 %v392_v42, %v321_v53 }
 0x1d9   :  { %v319_v43 = vpop.f32.mrf.mxu0  ;;  %v394_v44 = vpop.f32.mrf.mxu1 }
 0x1da   :  { %v400_v60 = vadd.f32 %v394_v44, %v322_v56  ;;  %v6074_v43 = vmov 0.0  }
 0x1db   :  { %v396_v45 = vpop.f32.mrf.mxu1  ;;  %v448_v46 = vpop.f32.mrf.mxu0  ;;  %5665 = vmatprep.subr.bf16.mxu1 %v6074_v43  ;;  %5641 = vmatprep.subr.bf16.mxu0 %v6074_v43 }
 0x1dc   :  { %v455_v61 = vadd.f32 %v448_v46, %v399_v57  ;;  %v943_v46 = vpop.permute.xlu0 %942  ;;  %v5264_v57 = vld [vmem:[%s7612_s2 + $0x2] ss:$0 sm:$0xff]  ;;  %5643 = vmatprep.mubr.msk.bf16.mxu0 %vm6081_vm12, %v6074_v43 }
 0x1dd   :  { %v397_v47 = vpop.f32.mrf.mxu1  ;;  %v450_v48 = vpop.f32.mrf.mxu0 }
 0x1de   :  { %v456_v0 = vadd.f32 %v450_v48, %v400_v60 }
 0x1df   :  { %v452_v50 = vpop.f32.mrf.mxu0  ;;  %v526_v51 = vpop.f32.mrf.mxu1 }
 0x1e0   :  { %v533_v2 = vadd.f32 %v526_v51, %v455_v61  ;;  %v5257_v61 = vld [vmem:[%s7612_s2] ss:$0 sm:$0xff] }
 0x1e1   :  { %v453_v54 = vpop.f32.mrf.mxu0  ;;  %v528_v55 = vpop.f32.mrf.mxu1 }
 0x1e2   :  { %v534_v5 = vadd.f32 %v528_v55, %v456_v0  ;;  %v5259_v55 = vld [vmem:[%s7612_s2 + $0x1] ss:$0 sm:$0xff] }
 0x1e3   :  { %v530_v58 = vpop.f32.mrf.mxu1  ;;  %v604_v59 = vpop.f32.mrf.mxu0 }
 0x1e4   :  { %v611_v6 = vadd.f32 %v604_v59, %v533_v2  ;;  %v5274_v58 = vld [vmem:[%s7612_s2 + $0x5] ss:$0 sm:$0xff] }
 0x1e5   :  { %v531_v62 = vpop.f32.mrf.mxu1  ;;  %v606_v63 = vpop.f32.mrf.mxu0 }
 0x1e6   :  { %v612_v30 = vadd.f32 %v606_v63, %v534_v5  ;;  %v5268_v62 = vld [vmem:[%s7612_s2 + $0x3] ss:$0 sm:$0xff]  ;;  %v5282_v63 = vld [vmem:[%s7612_s2 + $0x7] ss:$0 sm:$0xff] }
 0x1e7   :  { %v608_v3 = vpop.f32.mrf.mxu0  ;;  %v682_v4 = vpop.f32.mrf.mxu1 }
 0x1e8   :  { %v689_v31 = vadd.f32 %v682_v4, %v611_v6 }
 0x1e9   :  { %v609_v7 = vpop.f32.mrf.mxu0  ;;  %v684_v9 = vpop.f32.mrf.mxu1 }
 0x1ea   :  { %v690_v34 = vadd.f32 %v684_v9, %v612_v30 }
 0x1eb   :  { %v686_v32 = vpop.f32.mrf.mxu1  ;;  %v760_v33 = vpop.f32.mrf.mxu0 }
 0x1ec   :  { %v767_v35 = vadd.f32 %v760_v33, %v689_v31 }
 0x1ed   :  { %v687_v36 = vpop.f32.mrf.mxu1  ;;  %v762_v37 = vpop.f32.mrf.mxu0 }
 0x1ee   :  { %v768_v38 = vadd.f32 %v762_v37, %v690_v34  ;;  %v801_v41 = vpack.c.bf16 %v767_v35, %v767_v35 }
 0x1ef   :  { %v764_v39 = vpop.f32.mrf.mxu0 }
 0x1f0   :  { %v802_v40 = vpack.c.bf16 %v768_v38, %v768_v38 }
 0x1f1   :  { %v765_v42 = vpop.f32.mrf.mxu0 }
 0x1f2   :  { %931 = vmatprep.mubr.bf16.mxu1 %v802_v40  ;;  %v1522_v42 = vcombine.high %v6199_v11, %v6199_v11 }
 0x1f3   :  { %932 = vmatmul.mubr.bf16.vlgmr.msra.gmra.mxu1 %v801_v41 }
 0x1f4   :  { %5667 = vmatprep.mubr.msk.bf16.mxu1 %vm6081_vm12, %v6074_v43 }
 0x2b3   :  { %v5457_v44 = vpop.f32.mrf.mxu1 }
 0x2b5   :  { %v5458_v45 = vpop.f32.mrf.mxu1 }
 0x2b6   :  { %v5459_v47 = vadd.f32 %v5458_v45, %v5457_v44  ;;  %v5271_v44 = vld [vmem:[%s7620_s10 + $0x10] sm:$0xf]  ;;  %v5278_v45 = vld [vmem:[%s7612_s2 + $0x6] ss:$0 sm:$0xff] }
 0x2b7   :  { %v5460_v48 = vpop.f32.mrf.mxu1 }
 0x2b8   :  { %v945_v50 = vmul.f32 %v5459_v47, %v943_v46  ;;  %v5286_v46 = vld [vmem:[%s7612_s2 + $0x8] ss:$0 sm:$0xff] }
 0x2b9   :  { %v5461_v51 = vpop.f32.mrf.mxu1 }
 0x2ba   :  { %v952_v52 = vadd.f32 %v950_v49, %v945_v50  ;;  %v5260_v49 = vld [vmem:[%s7620_s10 + $0x4] sm:$0xf] }
 0x2bc   :  { %v953_v53 = vmax.f32 %v952_v52, 0.0 }
 0x2be   :  { %955 = vrot.lane.b32.xlu0 %v953_v53, %s6075_s21  ;;  %v1217_v54 = vpack.c.bf16 %v953_v53, %v953_v53 }
 0x2c0   :  { %v1222_v56 = vsel %vm994_vm10, %v1217_v54, 0 }
 0x2c1   :  { %5666 = vmatpush3.bf16.msra.mxu1 %v1222_v56 }
 0x2c2   :  { %980 = vrot.lane.b32.xlu0 %v5259_v55, %s7639_s27  ;;  %5677 = vmatprep.subr.bf16.mxu1 %v6074_v43  ;;  %s6082_s27 = smov 72   ;;  %v971_v55 = vld [vmem:[%s7620_s10] sm:$0xf] }
 0x2c4   :  { %5668 = vmatmul.mubr.msk.bf16.vlgmr.msra.gmra.mxu1 %vm990_vm13, %v5271_v44 }
 0x2c5   :  { %5679 = vmatprep.mubr.msk.bf16.mxu1 %vm6081_vm12, %v6074_v43 }
 0x2c6   :  { %1094 = vrot.lane.b32.xlu0 %v5264_v57, %s7638_s30  ;;  %s7664_s30 = smov 73  }
 0x2ca   :  { %1272 = vrot.lane.b32.xlu0 %v5274_v58, %s7640_s1  ;;  %s7642_s1 = smov 8  }
 0x330   :  { %v956_v59 = vpop.permute.xlu0 %955 }
 0x331   :  { %v957_v60 = vsel %vm954_vm11, %v956_v59, %v953_v53 }
 0x332   :  { %958 = vrot.lane.b32.xlu1 %v957_v60, %s6075_s21 }
 0x334   :  { %v6525_v0 = vpop.permute.xlu0 %980 }
 0x336   :  { %967 = vrot.lane.b32.xlu1 %v5257_v61, %s7645_s29  ;;  %v5265_v61 = vld [vmem:[%s7620_s10 + $0x8] sm:$0xf]  ;;  %s7658_s29 = smov 121  }
 0x338   :  { %v6531_v2 = vpop.permute.xlu0 %1094 }
 0x33a   :  { %1158 = vrot.lane.b32.xlu1 %v5268_v62, %s7644_s18  ;;  %s7676_s18 = smov 17  }
 0x33c   :  { %v6542_v30 = vpop.permute.xlu0 %1272 }
 0x33e   :  { %1400 = vrot.lane.b32.xlu1 %v5282_v63, %s7642_s1  ;;  %s7672_s1 = smov 120  }
 0x3a4   :  { %v959_v3 = vpop.permute.xlu1 %958 }
 0x3a5   :  { %v6534_v4 = vsel %vm954_vm11, %v959_v3, %v953_v53 }
 0x3a6   :  { %v983_v5 = vmul.f32 %v6525_v0, %v6534_v4  ;;  %v1097_v9 = vmul.f32 %v6531_v2, %v6534_v4  ;;  %v1275_v35 = vmul.f32 %v6542_v30, %v6534_v4 }
 0x3a8   :  { %v6538_v6 = vpop.permute.xlu1 %967  ;;  %v986_v7 = vpack.c.bf16 %v983_v5, %v983_v5  ;;  %v1100_v34 = vpack.c.bf16 %v1097_v9, %v1097_v9  ;;  %v1278_v39 = vpack.c.bf16 %v1275_v35, %v1275_v35 }
 0x3a9   :  { %v970_v31 = vmul.f32 %v6538_v6, %v6534_v4 }
 0x3aa   :  { %988 = vrot.lane.b32.xlu0 %v986_v7, %s6082_s27 }
 0x3ab   :  { %v972_v32 = vpack.c.bf16 %v970_v31, %v970_v31 }
 0x3ac   :  { %v6547_v33 = vpop.permute.xlu1 %1158 }
 0x3ad   :  { %1039 = vrot.lane.b32.xlu1 %v972_v32, %s7664_s30  ;;  %v1161_v36 = vmul.f32 %v6547_v33, %v6534_v4 }
 0x3ae   :  { %1102 = vrot.lane.b32.xlu0 %v1100_v34, %s7660_s25 }
 0x3af   :  { %v1164_v37 = vpack.c.bf16 %v1161_v36, %v1161_v36 }
 0x3b0   :  { %v6555_v38 = vpop.permute.xlu1 %1400 }
 0x3b1   :  { %1166 = vrot.lane.b32.xlu1 %v1164_v37, %s7652_s26  ;;  %v1403_v40 = vmul.f32 %v6555_v38, %v6534_v4  ;;  %s7662_s26 = smov 119  }
 0x3b2   :  { %1280 = vrot.lane.b32.xlu0 %v1278_v39, %s7648_s20 }
 0x3b3   :  { %v1406_v41 = vpack.c.bf16 %v1403_v40, %v1403_v40  ;;  %v5269_v40 = vld [vmem:[%s7620_s10 + $0xc] sm:$0xf] }
 0x3b5   :  { %1408 = vrot.lane.b32.xlu1 %v1406_v41, %s7646_s24  ;;  %s7655_s24 = smov 7  }
 0x3b6   :  { %1524 = vrot.lane.b32.xlu0 %v6199_v11, %s7648_s20 }
 0x3b9   :  { %1526 = vrot.lane.b32.xlu1 %v1522_v42, %s7648_s20  ;;  %s7654_s20 = smov 9  }
 0x3ba   :  { %1535 = vrot.lane.b32.xlu0 %v6199_v11, %s7650_s22 }
 0x3bd   :  { %1537 = vrot.lane.b32.xlu1 %v1522_v42, %s7650_s22  ;;  %s7677_s22 = smov 15  }
 0x3be   :  { %1546 = vrot.lane.b32.xlu0 %v6199_v11, %s7656_s23 }
 0x3c1   :  { %1548 = vrot.lane.b32.xlu1 %v1522_v42, %s7656_s23  ;;  %s7678_s23 = smov 1  }
 0x3c2   :  { %1336 = vrot.lane.b32.xlu0 %v5278_v45, %s7655_s24  ;;  %s7671_s24 = smov 127  }
 0x3c5   :  { %1464 = vrot.lane.b32.xlu1 %v5286_v46, %s7654_s20  ;;  %s7670_s20 = smov 65  }
 0x41c   :  { %v989_v47 = vpop.permute.xlu0 %988 }
 0x41d   :  { %v996_v48 = vsel %vm994_vm10, %v989_v47, 0 }
 0x41e   :  { %5642 = vmatpush3.bf16.msra.mxu0 %v996_v48 }
 0x41f   :  { %v1040_v50 = vpop.permute.xlu1 %1039  ;;  %5647 = vmatprep.subr.bf16.mxu0 %v6074_v43 }
 0x420   :  { %v1045_v51 = vsel %vm994_vm10, %v1040_v50, 0  ;;  %v1103_v52 = vpop.permute.xlu0 %1102  ;;  %v1652_v50 = vld [vmem:[%s7621_s11] sm:$0xff] }
 0x421   :  { %5644 = vmatmul.mubr.msk.bf16.vlgmr.msra.gmra.mxu0 %vm990_vm13, %v5260_v49  ;;  %v1108_v58 = vsel %vm994_vm10, %v1103_v52, 0  ;;  %v5275_v52 = vld [vmem:[%s7620_s10 + $0x14] sm:$0xf] }
 0x422   :  { %5648 = vmatpush3.bf16.msra.mxu0 %v1045_v51  ;;  %5649 = vmatprep.mubr.msk.bf16.mxu0 %vm6081_vm12, %v6074_v43 }
 0x423   :  { %v1167_v53 = vpop.permute.xlu1 %1166  ;;  %5653 = vmatprep.subr.bf16.mxu0 %v6074_v43 }
 0x424   :  { %v1281_v54 = vpop.permute.xlu0 %1280  ;;  %v1172_v7 = vsel %vm994_vm10, %v1167_v53, 0 }
 0x425   :  { %v1286_v47 = vsel %vm994_vm10, %v1281_v54, 0 }
 0x427   :  { %v1409_v56 = vpop.permute.xlu1 %1408 }
 0x428   :  { %v1525_v57 = vpop.permute.xlu0 %1524  ;;  %v1414_v53 = vsel %vm994_vm10, %v1409_v56, 0 }
 0x429   :  { %5650 = vmatmul.mubr.msk.bf16.vlgmr.msra.gmra.mxu0 %vm990_vm13, %v971_v55  ;;  %v5283_v55 = vld [vmem:[%s7620_s10 + $0x1c] sm:$0xf] }
 0x42a   :  { %5654 = vmatpush3.bf16.msra.mxu0 %v1108_v58  ;;  %5655 = vmatprep.mubr.msk.bf16.mxu0 %vm6081_vm12, %v6074_v43 }
 0x42b   :  { %v1527_v59 = vpop.permute.xlu1 %1526  ;;  %5659 = vmatprep.subr.bf16.mxu0 %v6074_v43 }
 0x42c   :  { %v1536_v60 = vpop.permute.xlu0 %1535  ;;  %v1528_v62 = vsel %vm461_vm6, %v1525_v57, %v1527_v59  ;;  %v1529_v63 = vsel %vm461_vm6, %v1527_v59, %v1525_v57 }
 0x42d   :  { %v1532_v9 = vcombine.low %v1528_v62, %v1529_v63 }
 0x42f   :  { %v1538_v3 = vpop.permute.xlu1 %1537  ;;  %v1534_v37 = vadd.f32 %v1532_v9, %v6199_v11 }
 0x430   :  { %v1547_v5 = vpop.permute.xlu0 %1546  ;;  %v1539_v31 = vsel %vm617_vm8, %v1536_v60, %v1538_v3  ;;  %v1540_v32 = vsel %vm617_vm8, %v1538_v3, %v1536_v60 }
 0x431   :  { %5656 = vmatmul.mubr.msk.bf16.vlgmr.msra.gmra.mxu0 %vm990_vm13, %v5265_v61  ;;  %v1543_v39 = vcombine.low %v1539_v31, %v1540_v32 }
 0x432   :  { %5660 = vmatpush3.bf16.msra.mxu0 %v1172_v7  ;;  %5661 = vmatprep.mubr.msk.bf16.mxu0 %vm6081_vm12, %v6074_v43 }
 0x433   :  { %v1549_v34 = vpop.permute.xlu1 %1548  ;;  %5671 = vmatprep.subr.bf16.mxu0 %v6074_v43  ;;  %v1545_v11 = vadd.f32 %v1543_v39, %v1534_v37 }
 0x434   :  { %v6621_v35 = vpop.permute.xlu0 %1336  ;;  %v1550_v41 = vsel %vm695_vm9, %v1547_v5, %v1549_v34  ;;  %v1551_v42 = vsel %vm695_vm9, %v1549_v34, %v1547_v5 }
 0x435   :  { %v1339_v36 = vmul.f32 %v6621_v35, %v6534_v4  ;;  %v1554_v48 = vcombine.low %v1550_v41, %v1551_v42 }
 0x437   :  { %v6633_v44 = vpop.permute.xlu1 %1464  ;;  %v1342_v45 = vpack.c.bf16 %v1339_v36, %v1339_v36  ;;  %v1556_v51 = vadd.f32 %v1554_v48, %v1545_v11 }
 0x438   :  { %v1467_v46 = vmul.f32 %v6633_v44, %v6534_v4  ;;  %v1659_v4 = vld [vmem:[%s7622_s12] sm:$0xff] }
 0x439   :  { %5662 = vmatmul.mubr.msk.bf16.vlgmr.msra.gmra.mxu0 %vm990_vm13, %v5269_v40  ;;  %1344 = vrot.lane.b32.xlu0 %v1342_v45, %s7658_s29  ;;  %v1558_v54 = vcombine.high %v1556_v51, %v1556_v51 }
 0x43a   :  { %5672 = vmatpush3.bf16.msra.mxu0 %v1286_v47  ;;  %v1470_v49 = vpack.c.bf16 %v1467_v46, %v1467_v46  ;;  %5673 = vmatprep.mubr.msk.bf16.mxu0 %vm6081_vm12, %v6074_v43 }
 0x43b   :  { %5683 = vmatprep.subr.bf16.mxu0 %v6074_v43  ;;  %v1561_v57 = vpack.c.bf16 %v1558_v54, %v1558_v54 }
 0x43c   :  { %1472 = vrot.lane.b32.xlu1 %v1470_v49, %s7662_s26 }
 0x43d   :  { %1655 = vperm.xlu0 %6006, %v1652_v50  }
 0x440   :  { %1662 = vperm.xlu1 %6007, %v1659_v4  }
 0x441   :  { %5674 = vmatmul.mubr.msk.bf16.vlgmr.msra.gmra.mxu0 %vm990_vm13, %v5275_v52 }
 0x442   :  { %5684 = vmatpush3.bf16.msra.mxu0 %v1414_v53  ;;  %5685 = vmatprep.mubr.msk.bf16.mxu0 %vm6081_vm12, %v6074_v43 }
 0x443   :  { %5481 = vmatprep.subr.bf16.mxu0 %v6398_v10  ;;  %v1560_v10 = vpack.c.bf16 %v1556_v51, %v1556_v51 }
 0x449   :  { %5686 = vmatmul.mubr.msk.bf16.vlgmr.msra.gmra.mxu0 %vm990_vm13, %v5283_v55  ;;  %v1603_v55 = vld [vmem:[%s7614_s4] sm:$0xf] }
 0x44a   :  { %5482 = vmatpush3.bf16.msra.mxu0 %v6403_v12  ;;  %1594 = vmatprep.mubr.bf16.mxu0 %v1561_v57  ;;  %v1258_v12 = vpop.f32.mrf.mxu1 }
 0x44b   :  { %5483 = vmatprep.subr.bf16.mxu0 %v6410_v13 }
 0x44c   :  { %v5669_v13 = vpop.f32.mrf.mxu1 }
 0x44e   :  { %5484 = vmatpush3.bf16.msra.mxu0 %v6415_v14  ;;  %v1261_v14 = vpop.f32.mrf.mxu1 }
 0x44f   :  { %5485 = vmatprep.subr.bf16.mxu0 %v6422_v15 }
 0x450   :  { %v5670_v15 = vpop.f32.mrf.mxu1 }
 0x452   :  { %5486 = vmatpush3.bf16.msra.mxu0 %v6427_v16 }
 0x453   :  { %5487 = vmatprep.subr.bf16.mxu0 %v6434_v17 }
 0x456   :  { %5488 = vmatpush3.bf16.msra.mxu0 %v6439_v18  ;;  %v5279_v18 = vld [vmem:[%s7620_s10 + $0x18] sm:$0xf] }
 0x457   :  { %5489 = vmatprep.subr.bf16.mxu0 %v6446_v22 }
 0x45a   :  { %5490 = vmatpush3.bf16.msra.mxu0 %v6451_v23 }
 0x45b   :  { %5491 = vmatprep.subr.bf16.mxu0 %v6458_v24  ;;  %v5287_v24 = vld [vmem:[%s7620_s10 + $0x20] sm:$0xf] }
 0x45e   :  { %5492 = vmatpush3.bf16.msra.mxu0 %v6463_v25 }
 0x45f   :  { %5493 = vmatprep.subr.bf16.mxu0 %v6470_v26 }
 0x462   :  { %5494 = vmatpush3.bf16.msra.mxu0 %v6475_v27 }
 0x463   :  { %5495 = vmatprep.subr.bf16.mxu0 %v6482_v28 }
 0x466   :  { %5496 = vmatpush3.bf16.msra.mxu0 %v6487_v29 }
 0x467   :  { %5719 = vmatprep.subr.bf16.mxu0 %v6074_v43 }
 0x469   :  { %1595 = vmatmul.mubr.bf16.vlgmr.msra.gmra.mxu0 %v1560_v10 }
 0x46a   :  { %5721 = vmatprep.mubr.msk.bf16.mxu0 %vm6081_vm12, %v6074_v43 }
 0x4ab   :  { %v1345_v16 = vpop.permute.xlu0 %1344 }
 0x4ac   :  { %v1350_v17 = vsel %vm994_vm10, %v1345_v16, 0 }
 0x4ad   :  { %5678 = vmatpush3.bf16.msra.mxu1 %v1350_v17 }
 0x4ae   :  { %v1473_v22 = vpop.permute.xlu1 %1472  ;;  %5689 = vmatprep.subr.bf16.mxu1 %v6074_v43 }
 0x4af   :  { %v1478_v23 = vsel %vm994_vm10, %v1473_v22, 0 }
 0x4b0   :  { %5680 = vmatmul.mubr.msk.bf16.vlgmr.msra.gmra.mxu1 %vm990_vm13, %v5279_v18 }
 0x4b1   :  { %5690 = vmatpush3.bf16.msra.mxu1 %v1478_v23  ;;  %5691 = vmatprep.mubr.msk.bf16.mxu1 %vm6081_vm12, %v6074_v43 }
 0x4b2   :  { %5695 = vmatprep.subr.bf16.mxu1 %v6074_v43 }
 0x4b8   :  { %5692 = vmatmul.mubr.msk.bf16.vlgmr.msra.gmra.mxu1 %vm990_vm13, %v5287_v24 }
 0x4b9   :  { %5697 = vmatprep.mubr.msk.bf16.mxu1 %vm6081_vm12, %v6074_v43 }
 0x4e1   :  { %v1032_v25 = vpop.f32.mrf.mxu0 }
 0x4e3   :  { %v5645_v26 = vpop.f32.mrf.mxu0 }
 0x4e4   :  { %v1656_v26 = vpop.permute.xlu0 %1655 }
 0x4e5   :  { %v1035_v27 = vpop.f32.mrf.mxu0 }
 0x4e7   :  { %v5646_v28 = vpop.f32.mrf.mxu0 }
 0x4e9   :  { %v1081_v29 = vpop.f32.mrf.mxu0 }
 0x4ea   :  { %v1082_v56 = vadd.f32 %v1081_v29, %v1032_v25  ;;  %v1663_v29 = vpop.permute.xlu1 %1662 }
 0x4eb   :  { %v5651_v58 = vpop.f32.mrf.mxu0 }
 0x4ed   :  { %v1084_v59 = vpop.f32.mrf.mxu0 }
 0x4ef   :  { %v5652_v60 = vpop.f32.mrf.mxu0 }
 0x4f1   :  { %v1144_v61 = vpop.f32.mrf.mxu0 }
 0x4f2   :  { %v1150_v62 = vadd.f32 %v1144_v61, %v1082_v56 }
 0x4f3   :  { %v5657_v63 = vpop.f32.mrf.mxu0 }
 0x4f5   :  { %v1147_v3 = vpop.f32.mrf.mxu0 }
 0x4f7   :  { %v5658_v5 = vpop.f32.mrf.mxu0 }
 0x4f9   :  { %v1208_v7 = vpop.f32.mrf.mxu0 }
 0x4fa   :  { %v1214_v9 = vadd.f32 %v1208_v7, %v1150_v62 }
 0x4fb   :  { %v5663_v31 = vpop.f32.mrf.mxu0 }
 0x4fc   :  { %v1264_v36 = vadd.f32 %v1258_v12, %v1214_v9 }
 0x4fd   :  { %v1211_v32 = vpop.f32.mrf.mxu0 }
 0x4ff   :  { %v5664_v34 = vpop.f32.mrf.mxu0 }
 0x501   :  { %v1322_v37 = vpop.f32.mrf.mxu0 }
 0x502   :  { %v1328_v39 = vadd.f32 %v1322_v37, %v1264_v36 }
 0x503   :  { %v5675_v40 = vpop.f32.mrf.mxu0 }
 0x505   :  { %v1325_v41 = vpop.f32.mrf.mxu0 }
 0x507   :  { %v5676_v42 = vpop.f32.mrf.mxu0 }
 0x509   :  { %v1450_v45 = vpop.f32.mrf.mxu0 }
 0x50b   :  { %v5687_v46 = vpop.f32.mrf.mxu0 }
 0x50d   :  { %v1453_v47 = vpop.f32.mrf.mxu0 }
 0x50f   :  { %v5688_v11 = vpop.f32.mrf.mxu0 }
 0x529   :  { %v5497_v48 = vpop.f32.mrf.mxu0 }
 0x52b   :  { %v5498_v49 = vpop.f32.mrf.mxu0 }
 0x52c   :  { %v5499_v50 = vadd.f32 %v5498_v49, %v5497_v48  ;;  %v2152_v48 = vld [vmem:[%s7624_s14] sm:$0xff] }
 0x52d   :  { %v5500_v4 = vpop.f32.mrf.mxu0  ;;  %v2159_v49 = vld [vmem:[%s7625_s15] sm:$0xff] }
 0x52e   :  { %v1602_v51 = vmul.f32 0.25, %v5499_v50 }
 0x52f   :  { %v5501_v52 = vpop.f32.mrf.mxu0 }
 0x530   :  { %v1604_v53 = vpack.c.bf16 %v1602_v51, %v1602_v51  ;;  %v5290_v52 = vld [vmem:[%s7623_s13 + $0x4] sm:$0xf] }
 0x532   :  { %v1609_v54 = vsel %vm147_vm2, %v1604_v53, 0 }
 0x533   :  { %5696 = vmatpush3.bf16.msra.mxu1 %v1609_v54 }
 0x534   :  { %5701 = vmatprep.subr.bf16.mxu1 %v6074_v43 }
 0x536   :  { %5698 = vmatmul.mubr.msk.bf16.vlgmr.msra.gmra.mxu1 %vm143_vm4, %v1603_v55 }
 0x537   :  { %5703 = vmatprep.mubr.msk.bf16.mxu1 %vm6081_vm12, %v6074_v43 }
 0x570   :  { %v1386_v57 = vpop.f32.mrf.mxu1 }
 0x571   :  { %v1392_v10 = vadd.f32 %v1386_v57, %v1328_v39 }
 0x572   :  { %v5681_v12 = vpop.f32.mrf.mxu1 }
 0x573   :  { %v1456_v15 = vadd.f32 %v1450_v45, %v1392_v10  ;;  %v5295_v10 = vld [vmem:[%s7623_s13 + $0xc] sm:$0xf] }
 0x574   :  { %v1389_v13 = vpop.f32.mrf.mxu1 }
 0x576   :  { %v5682_v14 = vpop.f32.mrf.mxu1 }
 0x577   :  { %v1674_v14 = vld [vmem:[%s7623_s13] sm:$0xf] }
 0x578   :  { %v1514_v16 = vpop.f32.mrf.mxu1 }
 0x579   :  { %v1520_v17 = vadd.f32 %v1514_v16, %v1456_v15 }
 0x57a   :  { %v5693_v18 = vpop.f32.mrf.mxu1 }
 0x57c   :  { %v1517_v22 = vpop.f32.mrf.mxu1 }
 0x57e   :  { %v5694_v23 = vpop.f32.mrf.mxu1 }
 0x57f   :  { %v5293_v23 = vld [vmem:[%s7623_s13 + $0x8] sm:$0xf] }
 0x5f6   :  { %v1645_v24 = vpop.f32.mrf.mxu1 }
 0x5f7   :  { %v6704_v25 = vadd.f32 %v1645_v24, %v1520_v17  ;;  %v5299_v17 = vld [vmem:[%s7623_s13 + $0x14] sm:$0xf] }
 0x5f8   :  { %v5699_v27 = vpop.f32.mrf.mxu1 }
 0x5f9   :  { %v1658_v28 = vmul.f32 %v1656_v26, %v6704_v25  ;;  %v5303_v26 = vld [vmem:[%s7623_s13 + $0x1c] sm:$0xf] }
 0x5fa   :  { %v1648_v56 = vpop.f32.mrf.mxu1 }
 0x5fb   :  { %v1665_v58 = vadd.f32 %v1663_v29, %v1658_v28  ;;  %v5297_v28 = vld [vmem:[%s7623_s13 + $0x10] sm:$0xf] }
 0x5fc   :  { %v5700_v59 = vpop.f32.mrf.mxu1 }
 0x5fd   :  { %v6707_v60 = vmax.f32 %v1665_v58, 0.0  ;;  %v5301_v58 = vld [vmem:[%s7623_s13 + $0x18] sm:$0xf] }
 0x5ff   :  { %1667 = vrot.lane.b32.xlu0 %v6707_v60, %s6075_s21  ;;  %v1888_v22 = vpack.c.bf16 %v6707_v60, %v6707_v60 }
 0x601   :  { %v1893_v24 = vsel %vm994_vm10, %v1888_v22, 0 }
 0x671   :  { %v1668_v61 = vpop.permute.xlu0 %1667 }
 0x672   :  { %v1669_v62 = vsel %vm954_vm11, %v1668_v61, %v6707_v60 }
 0x673   :  { %1670 = vrot.lane.b32.xlu1 %v1669_v62, %s6075_s21 }
 0x6e5   :  { %v1671_v63 = vpop.permute.xlu1 %1670 }
 0x6e6   :  { %v1672_v3 = vsel %vm954_vm11, %v1671_v63, %v6707_v60  ;;  %v5305_v60 = vld [vmem:[%s7623_s13 + $0x20] sm:$0xf] }
 0x6e7   :  { %v1676_v5 = vmul.f32 %v1672_v3, %v6525_v0  ;;  %v1673_v7 = vmul.f32 %v1672_v3, %v6538_v6  ;;  %v1778_v32 = vmul.f32 %v1672_v3, %v6531_v2  ;;  %v1832_v34 = vmul.f32 %v1672_v3, %v6547_v33 }
 0x6e8   :  { %v1936_v39 = vmul.f32 %v1672_v3, %v6542_v30  ;;  %v1990_v40 = vmul.f32 %v1672_v3, %v6621_v35  ;;  %v2044_v45 = vmul.f32 %v1672_v3, %v6555_v38  ;;  %v2098_v46 = vmul.f32 %v1672_v3, %v6633_v44 }
 0x6e9   :  { %v1679_v9 = vpack.c.bf16 %v1676_v5, %v1676_v5  ;;  %v1675_v31 = vpack.c.bf16 %v1673_v7, %v1673_v7  ;;  %v1781_v36 = vpack.c.bf16 %v1778_v32, %v1778_v32  ;;  %v1835_v37 = vpack.c.bf16 %v1832_v34, %v1832_v34 }
 0x6ea   :  { %v1939_v41 = vpack.c.bf16 %v1936_v39, %v1936_v39  ;;  %v1993_v42 = vpack.c.bf16 %v1990_v40, %v1990_v40  ;;  %v2047_v47 = vpack.c.bf16 %v2044_v45, %v2044_v45  ;;  %v2101_v11 = vpack.c.bf16 %v2098_v46, %v2098_v46 }
 0x6eb   :  { %1681 = vrot.lane.b32.xlu0 %v1679_v9, %s6082_s27  ;;  %1730 = vrot.lane.b32.xlu1 %v1675_v31, %s7664_s30 }
 0x6ef   :  { %1783 = vrot.lane.b32.xlu0 %v1781_v36, %s7660_s25  ;;  %1837 = vrot.lane.b32.xlu1 %v1835_v37, %s7670_s20  ;;  %s7681_s25 = smov 111  }
 0x6f3   :  { %1941 = vrot.lane.b32.xlu0 %v1939_v41, %s7671_s24  ;;  %1995 = vrot.lane.b32.xlu1 %v1993_v42, %s7658_s29  ;;  %s7674_s29 = smov 121  }
 0x6f7   :  { %2049 = vrot.lane.b32.xlu0 %v2047_v47, %s7672_s1  ;;  %2103 = vrot.lane.b32.xlu1 %v2101_v11, %s7662_s26 }
 0x6fb   :  { %2155 = vperm.xlu0 %6006, %v2152_v48   ;;  %2162 = vperm.xlu1 %6007, %v2159_v49  }
 0x75d   :  { %v1682_v50 = vpop.permute.xlu0 %1681  ;;  %v1731_v4 = vpop.permute.xlu1 %1730 }
 0x75e   :  { %v1687_v51 = vsel %vm994_vm10, %v1682_v50, 0  ;;  %v1736_v55 = vsel %vm994_vm10, %v1731_v4, 0 }
 0x75f   :  { %5702 = vmatpush3.bf16.msra.mxu1 %v1687_v51 }
 0x760   :  { %5707 = vmatprep.subr.bf16.mxu1 %v6074_v43 }
 0x761   :  { %v1784_v53 = vpop.permute.xlu0 %1783  ;;  %v1838_v54 = vpop.permute.xlu1 %1837 }
 0x762   :  { %v1843_v57 = vsel %vm994_vm10, %v1838_v54, 0  ;;  %5704 = vmatmul.mubr.msk.bf16.vlgmr.msra.gmra.mxu1 %vm990_vm13, %v5290_v52  ;;  %v1789_v15 = vsel %vm994_vm10, %v1784_v53, 0 }
 0x763   :  { %5708 = vmatpush3.bf16.msra.mxu1 %v1736_v55  ;;  %5720 = vmatpush3.bf16.msra.mxu0 %v1843_v57 }
 0x764   :  { %5731 = vmatprep.subr.bf16.mxu0 %v6074_v43  ;;  %5709 = vmatprep.mubr.msk.bf16.mxu1 %vm6081_vm12, %v6074_v43 }
 0x765   :  { %v1942_v12 = vpop.permute.xlu0 %1941  ;;  %5713 = vmatprep.subr.bf16.mxu1 %v6074_v43  ;;  %v1996_v27 = vpop.permute.xlu1 %1995 }
 0x766   :  { %v1947_v13 = vsel %vm994_vm10, %v1942_v12, 0  ;;  %5722 = vmatmul.mubr.msk.bf16.vlgmr.msra.gmra.mxu0 %vm990_vm13, %v5295_v10  ;;  %v2001_v29 = vsel %vm994_vm10, %v1996_v27, 0 }
 0x767   :  { %5732 = vmatpush3.bf16.msra.mxu0 %v1947_v13  ;;  %5733 = vmatprep.mubr.msk.bf16.mxu0 %vm6081_vm12, %v6074_v43 }
 0x768   :  { %5743 = vmatprep.subr.bf16.mxu0 %v6074_v43 }
 0x769   :  { %v2050_v16 = vpop.permute.xlu0 %2049  ;;  %v2104_v56 = vpop.permute.xlu1 %2103 }
 0x76a   :  { %5710 = vmatmul.mubr.msk.bf16.vlgmr.msra.gmra.mxu1 %vm990_vm13, %v1674_v14  ;;  %v2055_v18 = vsel %vm994_vm10, %v2050_v16, 0  ;;  %v2109_v59 = vsel %vm994_vm10, %v2104_v56, 0 }
 0x76b   :  { %5714 = vmatpush3.bf16.msra.mxu1 %v1789_v15  ;;  %5715 = vmatprep.mubr.msk.bf16.mxu1 %vm6081_vm12, %v6074_v43 }
 0x76c   :  { %5725 = vmatprep.subr.bf16.mxu1 %v6074_v43 }
 0x76e   :  { %5734 = vmatmul.mubr.msk.bf16.vlgmr.msra.gmra.mxu0 %vm990_vm13, %v5299_v17 }
 0x76f   :  { %5744 = vmatpush3.bf16.msra.mxu0 %v2055_v18  ;;  %5745 = vmatprep.mubr.msk.bf16.mxu0 %vm6081_vm12, %v6074_v43 }
 0x770   :  { %5755 = vmatprep.subr.bf16.mxu0 %v6074_v43 }
 0x772   :  { %5716 = vmatmul.mubr.msk.bf16.vlgmr.msra.gmra.mxu1 %vm990_vm13, %v5293_v23 }
 0x773   :  { %5726 = vmatpush3.bf16.msra.mxu1 %v1893_v24  ;;  %5727 = vmatprep.mubr.msk.bf16.mxu1 %vm6081_vm12, %v6074_v43 }
 0x774   :  { %5737 = vmatprep.subr.bf16.mxu1 %v6074_v43 }
 0x776   :  { %5746 = vmatmul.mubr.msk.bf16.vlgmr.msra.gmra.mxu0 %vm990_vm13, %v5303_v26  ;;  %v2156_v26 = vpop.permute.xlu0 %2155 }
 0x777   :  { %5757 = vmatprep.mubr.msk.bf16.mxu0 %vm6081_vm12, %v6074_v43 }
 0x77a   :  { %5728 = vmatmul.mubr.msk.bf16.vlgmr.msra.gmra.mxu1 %vm990_vm13, %v5297_v28 }
 0x77b   :  { %5738 = vmatpush3.bf16.msra.mxu1 %v2001_v29  ;;  %5739 = vmatprep.mubr.msk.bf16.mxu1 %vm6081_vm12, %v6074_v43  ;;  %v2163_v29 = vpop.permute.xlu1 %2162 }
 0x77c   :  { %5749 = vmatprep.subr.bf16.mxu1 %v6074_v43 }
 0x782   :  { %5740 = vmatmul.mubr.msk.bf16.vlgmr.msra.gmra.mxu1 %vm990_vm13, %v5301_v58 }
 0x783   :  { %5750 = vmatpush3.bf16.msra.mxu1 %v2109_v59  ;;  %5751 = vmatprep.mubr.msk.bf16.mxu1 %vm6081_vm12, %v6074_v43 }
 0x784   :  { %5761 = vmatprep.subr.bf16.mxu1 %v6074_v43 }
 0x78a   :  { %5752 = vmatmul.mubr.msk.bf16.vlgmr.msra.gmra.mxu1 %vm990_vm13, %v5305_v60 }
 0x78b   :  { %5763 = vmatprep.mubr.msk.bf16.mxu1 %vm6081_vm12, %v6074_v43 }
 0x822   :  { %v1723_v61 = vpop.f32.mrf.mxu1 }
 0x824   :  { %v5705_v62 = vpop.f32.mrf.mxu1 }
 0x826   :  { %v1726_v63 = vpop.f32.mrf.mxu1  ;;  %v1879_v3 = vpop.f32.mrf.mxu0 }
 0x828   :  { %v5706_v5 = vpop.f32.mrf.mxu1  ;;  %v5723_v7 = vpop.f32.mrf.mxu0 }
 0x82a   :  { %v1772_v9 = vpop.f32.mrf.mxu1  ;;  %v1882_v31 = vpop.f32.mrf.mxu0 }
 0x82b   :  { %v1773_v48 = vadd.f32 %v1772_v9, %v1723_v61  ;;  %v2657_v61 = vld [vmem:[%s7615_s5] sm:$0xf]  ;;  %s7673_s5 = smov 71  }
 0x82c   :  { %v5711_v32 = vpop.f32.mrf.mxu1  ;;  %v5724_v34 = vpop.f32.mrf.mxu0 }
 0x82e   :  { %v1775_v36 = vpop.f32.mrf.mxu1  ;;  %v1983_v37 = vpop.f32.mrf.mxu0 }
 0x830   :  { %v5712_v39 = vpop.f32.mrf.mxu1  ;;  %v5735_v40 = vpop.f32.mrf.mxu0 }
 0x832   :  { %v1825_v41 = vpop.f32.mrf.mxu1  ;;  %v1986_v42 = vpop.f32.mrf.mxu0 }
 0x833   :  { %v1831_v4 = vadd.f32 %v1825_v41, %v1773_v48 }
 0x834   :  { %v5717_v45 = vpop.f32.mrf.mxu1  ;;  %v5736_v46 = vpop.f32.mrf.mxu0 }
 0x835   :  { %v1885_v55 = vadd.f32 %v1879_v3, %v1831_v4  ;;  %v2671_v3 = vld [vmem:[%s7616_s6] sm:$0xf]  ;;  %s7680_s6 = smov 112  }
 0x836   :  { %v1828_v47 = vpop.f32.mrf.mxu1  ;;  %v2091_v11 = vpop.f32.mrf.mxu0  ;;  %v6041_v4 = vld [vmem:[%s7619_s9] sm:$0xff] }
 0x838   :  { %v5718_v49 = vpop.f32.mrf.mxu1  ;;  %v5747_v50 = vpop.f32.mrf.mxu0 }
 0x83a   :  { %v1929_v51 = vpop.f32.mrf.mxu1  ;;  %v2094_v52 = vpop.f32.mrf.mxu0 }
 0x83b   :  { %v1935_v10 = vadd.f32 %v1929_v51, %v1885_v55  ;;  %v5307_v55 = vld [vmem:[%s7626_s16 + $0x4] sm:$0xf] }
 0x83c   :  { %v5729_v53 = vpop.f32.mrf.mxu1  ;;  %v5748_v54 = vpop.f32.mrf.mxu0 }
 0x83d   :  { %v1989_v14 = vadd.f32 %v1983_v37, %v1935_v10 }
 0x83e   :  { %v1932_v57 = vpop.f32.mrf.mxu1 }
 0x83f   :  { %v2174_v57 = vld [vmem:[%s7626_s16] sm:$0xf] }
 0x840   :  { %v5730_v12 = vpop.f32.mrf.mxu1 }
 0x842   :  { %v2037_v13 = vpop.f32.mrf.mxu1 }
 0x843   :  { %v2043_v16 = vadd.f32 %v2037_v13, %v1989_v14 }
 0x844   :  { %v5741_v15 = vpop.f32.mrf.mxu1 }
 0x845   :  { %v2097_v22 = vadd.f32 %v2091_v11, %v2043_v16 }
 0x846   :  { %v2040_v17 = vpop.f32.mrf.mxu1 }
 0x848   :  { %v5742_v18 = vpop.f32.mrf.mxu1 }
 0x849   :  { %v5310_v18 = vld [vmem:[%s7626_s16 + $0x8] sm:$0xf] }
 0x84a   :  { %v2145_v23 = vpop.f32.mrf.mxu1 }
 0x84b   :  { %v2151_v24 = vadd.f32 %v2145_v23, %v2097_v22  ;;  %v5312_v22 = vld [vmem:[%s7626_s16 + $0xc] sm:$0xf]  ;;  %v5325_v23 = vld [vmem:[%s7669_s28 + $0x2] sm:$0x3] }
 0x84c   :  { %v5753_v27 = vpop.f32.mrf.mxu1 }
 0x84d   :  { %v2158_v28 = vmul.f32 %v2156_v26, %v2151_v24 }
 0x84e   :  { %v2148_v56 = vpop.f32.mrf.mxu1 }
 0x84f   :  { %v2165_v58 = vadd.f32 %v2163_v29, %v2158_v28  ;;  %v2727_v29 = vrot.slane %v5325_v23, %v6248_v21 }
 0x850   :  { %v5754_v59 = vpop.f32.mrf.mxu1 }
 0x851   :  { %v6812_v60 = vmax.f32 %v2165_v58, 0.0  ;;  %v2723_v58 = vrot.slane %v5325_v23, %v6246_v20 }
 0x853   :  { %2167 = vrot.lane.b32.xlu0 %v6812_v60, %s6075_s21  ;;  %v2388_v16 = vpack.c.bf16 %v6812_v60, %v6812_v60 }
 0x855   :  { %v2393_v27 = vsel %vm994_vm10, %v2388_v16, 0 }
 0x857   :  { %2660 = vperm.xlu0 %6006, %v2657_v61  }
 0x8c5   :  { %v2168_v62 = vpop.permute.xlu0 %2167 }
 0x8c6   :  { %v2169_v63 = vsel %vm954_vm11, %v2168_v62, %v6812_v60 }
 0x8c7   :  { %2170 = vrot.lane.b32.xlu1 %v2169_v63, %s6075_s21  ;;  %v5314_v63 = vld [vmem:[%s7626_s16 + $0x10] sm:$0xf] }
 0x8cb   :  { %2674 = vperm.xlu1 %6007, %v2671_v3   ;;  %v5316_v3 = vld [vmem:[%s7626_s16 + $0x14] sm:$0xf] }
 0x8d2   :  { %v2661_v39 = vpop.permute.xlu0 %2660 }
 0x939   :  { %v2171_v5 = vpop.permute.xlu1 %2170 }
 0x93a   :  { %v2172_v7 = vsel %vm954_vm11, %v2171_v5, %v6812_v60  ;;  %v2695_v5 = vld [vmem:[%s7669_s28] sm:$0x3] }
 0x93b   :  { %v2176_v9 = vmul.f32 %v2172_v7, %v6525_v0  ;;  %v2173_v31 = vmul.f32 %v2172_v7, %v6538_v6  ;;  %v2278_v36 = vmul.f32 %v2172_v7, %v6531_v2  ;;  %v2332_v37 = vmul.f32 %v2172_v7, %v6547_v33  ;;  %v6841_v2 = vld [vmem:[%s7668_s0 + $0x8] sm:$0xff]  ;;  %s7675_s0 = smov 16  }
 0x93c   :  { %v2436_v42 = vmul.f32 %v2172_v7, %v6542_v30  ;;  %v2490_v45 = vmul.f32 %v2172_v7, %v6621_v35  ;;  %v2668_v0 = vrot.slane %v2661_v39, %v6193_v8  ;;  %v2544_v46 = vmul.f32 %v2172_v7, %v6555_v38 }
 0x93d   :  { %v2179_v32 = vpack.c.bf16 %v2176_v9, %v2176_v9  ;;  %v2175_v34 = vpack.c.bf16 %v2173_v31, %v2173_v31  ;;  %v2281_v40 = vpack.c.bf16 %v2278_v36, %v2278_v36  ;;  %v2335_v41 = vpack.c.bf16 %v2332_v37, %v2332_v37  ;;  %v5331_v37 = vld [vmem:[%s7669_s28 + $0x4] sm:$0x3] }
 0x93e   :  { %v2439_v6 = vpack.c.bf16 %v2436_v42, %v2436_v42  ;;  %v2493_v33 = vpack.c.bf16 %v2490_v45, %v2490_v45  ;;  %v2670_v30 = vmul.f32 %v6841_v2, %v2668_v0  ;;  %v2547_v48 = vpack.c.bf16 %v2544_v46, %v2544_v46  ;;  %v5335_v46 = vld [vmem:[%s7669_s28 + $0x6] sm:$0x3] }
 0x93f   :  { %2181 = vrot.lane.b32.xlu0 %v2179_v32, %s6082_s27  ;;  %2230 = vrot.lane.b32.xlu1 %v2175_v34, %s7664_s30  ;;  %v2598_v50 = vmul.f32 %v2172_v7, %v6633_v44  ;;  %v3510_v44 = vld [vmem:[%s7618_s8] sm:$0xff]  ;;  %v2704_v36 = vrot.slane %v2695_v5, %v6248_v21  ;;  %v2850_v42 = vrot.slane %v5331_v37, %v6248_v21  ;;  %s7683_s8 = smov 57  }
 0x940   :  { %v2700_v0 = vrot.slane %v2695_v5, %v6246_v20  ;;  %v2921_v16 = vrot.slane %v5335_v46, %v6246_v20 }
 0x943   :  { %2283 = vrot.lane.b32.xlu0 %v2281_v40, %s7673_s5  ;;  %2337 = vrot.lane.b32.xlu1 %v2335_v41, %s7670_s20 }
 0x946   :  { %v2675_v47 = vpop.permute.xlu1 %2674 }
 0x947   :  { %v2682_v35 = vrot.slane %v2675_v47, %v6193_v8  ;;  %2441 = vrot.lane.b32.xlu0 %v2439_v6, %s7671_s24  ;;  %2495 = vrot.lane.b32.xlu1 %v2493_v33, %s7674_s29  ;;  %v2601_v8 = vpack.c.bf16 %v2598_v50, %v2598_v50  ;;  %v2846_v33 = vrot.slane %v5331_v37, %v6246_v20 }
 0x949   :  { %v2684_v11 = vadd.f32 %v2682_v35, %v2670_v30  ;;  %v5318_v35 = vld [vmem:[%s7626_s16 + $0x18] sm:$0xf] }
 0x94b   :  { %v6848_v49 = vmax.f32 %v2684_v11, 0.0  ;;  %2549 = vrot.lane.b32.xlu0 %v2547_v48, %s7672_s1  ;;  %v5320_v11 = vld [vmem:[%s7626_s16 + $0x1c] sm:$0xf] }
 0x94d   :  { %2712 = vrot.lane.b32.xlu1 %v6848_v49, %s7675_s0  ;;  %v6856_v38 = vcombine.high %v6848_v49, %v6848_v49 }
 0x94f   :  { %2714 = vrot.lane.b32.xlu0 %v6856_v38, %s7675_s0 }
 0x951   :  { %2603 = vrot.lane.b32.xlu1 %v2601_v8, %s7662_s26  ;;  %s7684_s26 = smov 55  }
 0x953   :  { %2689 = vrot.lane.b32.xlu0 %v6848_v49, %s7676_s18 }
 0x955   :  { %2691 = vrot.lane.b32.xlu1 %v6856_v38, %s7676_s18 }
 0x957   :  { %2835 = vrot.lane.b32.xlu0 %v6848_v49, %s7677_s22 }
 0x959   :  { %2837 = vrot.lane.b32.xlu1 %v6856_v38, %s7677_s22 }
 0x95b   :  { %2910 = vrot.lane.b32.xlu0 %v6848_v49, %s7678_s23 }
 0x95d   :  { %2912 = vrot.lane.b32.xlu1 %v6856_v38, %s7678_s23 }
 0x95f   :  { %3040 = vrot.lane.b32.xlu0 %v6848_v49, %s7671_s24 }
 0x961   :  { %3042 = vrot.lane.b32.xlu1 %v6856_v38, %s7671_s24 }
 0x963   :  { %3115 = vrot.lane.b32.xlu0 %v6848_v49, %s7679_s19 }
 0x965   :  { %3117 = vrot.lane.b32.xlu1 %v6856_v38, %s7679_s19  ;;  %s7682_s19 = smov 56  }
 0x967   :  { %3190 = vrot.lane.b32.xlu0 %v6848_v49, %s7680_s6 }
 0x969   :  { %3192 = vrot.lane.b32.xlu1 %v6856_v38, %s7680_s6 }
 0x96b   :  { %3265 = vrot.lane.b32.xlu0 %v6848_v49, %s7681_s25 }
 0x96d   :  { %3267 = vrot.lane.b32.xlu1 %v6856_v38, %s7681_s25 }
 0x96f   :  { %3513 = vperm.xlu0 %6006, %v3510_v44  }
 0x971   :  { %3520 = vperm.xlu1 %6007, %v6041_v4  }
 0x9b1   :  { %v2231_v51 = vpop.permute.xlu1 %2230  ;;  %v2182_v52 = vpop.permute.xlu0 %2181 }
 0x9b2   :  { %v2236_v53 = vsel %vm994_vm10, %v2231_v51, 0  ;;  %v2187_v54 = vsel %vm994_vm10, %v2182_v52, 0  ;;  %v2925_v51 = vrot.slane %v5335_v46, %v6248_v21 }
 0x9b3   :  { %5756 = vmatpush3.bf16.msra.mxu0 %v2187_v54  ;;  %5762 = vmatpush3.bf16.msra.mxu1 %v2236_v53 }
 0x9b4   :  { %5767 = vmatprep.subr.bf16.mxu0 %v6074_v43  ;;  %5773 = vmatprep.subr.bf16.mxu1 %v6074_v43 }
 0x9b5   :  { %v2338_v10 = vpop.permute.xlu1 %2337  ;;  %v2284_v12 = vpop.permute.xlu0 %2283 }
 0x9b6   :  { %v2343_v13 = vsel %vm994_vm10, %v2338_v10, 0  ;;  %v2289_v14 = vsel %vm994_vm10, %v2284_v12, 0  ;;  %5758 = vmatmul.mubr.msk.bf16.vlgmr.msra.gmra.mxu0 %vm990_vm13, %v5307_v55  ;;  %5764 = vmatmul.mubr.msk.bf16.vlgmr.msra.gmra.mxu1 %vm990_vm13, %v2174_v57 }
 0x9b7   :  { %5768 = vmatpush3.bf16.msra.mxu0 %v2289_v14  ;;  %5774 = vmatpush3.bf16.msra.mxu1 %v2343_v13 }
 0x9b8   :  { %5769 = vmatprep.mubr.msk.bf16.mxu0 %vm6081_vm12, %v6074_v43  ;;  %5775 = vmatprep.mubr.msk.bf16.mxu1 %vm6081_vm12, %v6074_v43 }
 0x9b9   :  { %v2442_v15 = vpop.permute.xlu0 %2441  ;;  %5779 = vmatprep.subr.bf16.mxu0 %v6074_v43  ;;  %5785 = vmatprep.subr.bf16.mxu1 %v6074_v43  ;;  %v2496_v17 = vpop.permute.xlu1 %2495 }
 0x9ba   :  { %v2447_v26 = vsel %vm994_vm10, %v2442_v15, 0  ;;  %v2501_v31 = vsel %vm994_vm10, %v2496_v17, 0 }
 0x9bd   :  { %v2550_v24 = vpop.permute.xlu0 %2549 }
 0x9be   :  { %5770 = vmatmul.mubr.msk.bf16.vlgmr.msra.gmra.mxu0 %vm990_vm13, %v5310_v18  ;;  %5776 = vmatmul.mubr.msk.bf16.vlgmr.msra.gmra.mxu1 %vm990_vm13, %v5312_v22  ;;  %v2555_v32 = vsel %vm994_vm10, %v2550_v24, 0  ;;  %v5342_v18 = vld [vmem:[%s7669_s28 + $0xa] sm:$0x3]  ;;  %v5346_v22 = vld [vmem:[%s7669_s28 + $0xc] sm:$0x3] }
 0x9bf   :  { %5780 = vmatpush3.bf16.msra.mxu0 %v2393_v27  ;;  %5786 = vmatpush3.bf16.msra.mxu1 %v2447_v26  ;;  %v2713_v28 = vpop.permute.xlu1 %2712  ;;  %v5322_v26 = vld [vmem:[%s7626_s16 + $0x20] sm:$0xf]  ;;  %v5326_v27 = vld [vmem:[%s7617_s7 + $0x4] sm:$0xf] }
 0x9c0   :  { %5781 = vmatprep.mubr.msk.bf16.mxu0 %vm6081_vm12, %v6074_v43  ;;  %5787 = vmatprep.mubr.msk.bf16.mxu1 %vm6081_vm12, %v6074_v43 }
 0x9c1   :  { %v2715_v56 = vpop.permute.xlu0 %2714  ;;  %5797 = vmatprep.subr.bf16.mxu1 %v6074_v43  ;;  %5791 = vmatprep.subr.bf16.mxu0 %v6074_v43 }
 0x9c2   :  { %v2716_v59 = vsel %vm121_vm0, %v2713_v28, %v2715_v56  ;;  %v2717_v60 = vsel %vm121_vm0, %v2715_v56, %v2713_v28  ;;  %v3055_v28 = vrot.slane %v5342_v18, %v6248_v21  ;;  %v3130_v56 = vrot.slane %v5346_v22, %v6248_v21 }
 0x9c3   :  { %v2731_v61 = vmul.f32 %v2727_v29, %v2716_v59  ;;  %v2604_v62 = vpop.permute.xlu1 %2603  ;;  %v2730_v34 = vmul.f32 %v2723_v58, %v2717_v60  ;;  %v2987_v58 = vpack.c.bf16 %v6856_v38, %v6856_v38  ;;  %v3051_v38 = vrot.slane %v5342_v18, %v6246_v20 }
 0x9c4   :  { %v2609_v8 = vsel %vm994_vm10, %v2604_v62, 0 }
 0x9c5   :  { %v2734_v7 = vpack.c.bf16 %v2731_v61, %v2731_v61  ;;  %v2690_v9 = vpop.permute.xlu0 %2689  ;;  %v2733_v45 = vpack.c.bf16 %v2730_v34, %v2730_v34 }
 0x9c6   :  { %5782 = vmatmul.mubr.msk.bf16.vlgmr.msra.gmra.mxu0 %vm990_vm13, %v5314_v63  ;;  %5788 = vmatmul.mubr.msk.bf16.vlgmr.msra.gmra.mxu1 %vm990_vm13, %v5316_v3 }
 0x9c7   :  { %5792 = vmatpush3.bf16.msra.mxu0 %v2501_v31  ;;  %5798 = vmatpush3.bf16.msra.mxu1 %v2555_v32  ;;  %v2692_v39 = vpop.permute.xlu1 %2691  ;;  %v2739_v55 = vsel %vm147_vm2, %v2733_v45, 0  ;;  %v2986_v31 = vpack.c.bf16 %v6848_v49, %v6848_v49  ;;  %v2709_v49 = vld [vmem:[%s7617_s7] sm:$0xf]  ;;  %v5332_v45 = vld [vmem:[%s7617_s7 + $0x8] sm:$0xf] }
 0x9c8   :  { %v2693_v40 = vsel %vm97_vm1, %v2690_v9, %v2692_v39  ;;  %5327 = vmatprep.subr.msk.bf16.mxu1 %vm147_vm2, %v2734_v7  ;;  %5799 = vmatprep.mubr.msk.bf16.mxu1 %vm6081_vm12, %v6074_v43  ;;  %v2694_v47 = vsel %vm97_vm1, %v2692_v39, %v2690_v9  ;;  %v3126_v7 = vrot.slane %v5346_v22, %v6246_v20  ;;  %v5350_v39 = vld [vmem:[%s7669_s28 + $0xe] sm:$0x3] }
 0x9c9   :  { %v2836_v41 = vpop.permute.xlu0 %2835  ;;  %5793 = vmatprep.mubr.msk.bf16.mxu0 %vm6081_vm12, %v6074_v43  ;;  %5803 = vmatprep.subr.bf16.mxu0 %v6074_v43  ;;  %v2708_v6 = vmul.f32 %v2704_v36, %v2693_v40  ;;  %v2707_v52 = vmul.f32 %v2700_v0, %v2694_v47  ;;  %v5354_v40 = vld [vmem:[%s7669_s28 + $0x10] sm:$0x3] }
 0x9ca   :  { %v3280_v46 = vrot.slane %v5354_v40, %v6248_v21 }
 0x9cb   :  { %v2838_v30 = vpop.permute.xlu1 %2837  ;;  %v2711_v53 = vpack.c.bf16 %v2708_v6, %v2708_v6  ;;  %v2710_v14 = vpack.c.bf16 %v2707_v52, %v2707_v52  ;;  %v3205_v6 = vrot.slane %v5350_v39, %v6248_v21 }
 0x9cc   :  { %v2839_v48 = vsel %vm249_vm3, %v2836_v41, %v2838_v30  ;;  %v2840_v50 = vsel %vm249_vm3, %v2838_v30, %v2836_v41 }
 0x9cd   :  { %v2854_v44 = vmul.f32 %v2850_v42, %v2839_v48  ;;  %v2911_v4 = vpop.permute.xlu0 %2910  ;;  %v2853_v54 = vmul.f32 %v2846_v33, %v2840_v50  ;;  %v2789_v61 = vsel %vm147_vm2, %v2710_v14, 0  ;;  %v2992_v33 = vsel %vm147_vm2, %v2986_v31, 0  ;;  %v7185_v31 = vld [vmem:[%s7613_s3 + $0x8] sm:$0xff]  }
 0x9ce   :  { %5794 = vmatmul.mubr.msk.bf16.vlgmr.msra.gmra.mxu0 %vm990_vm13, %v5318_v35  ;;  %5800 = vmatmul.mubr.msk.bf16.vlgmr.msra.gmra.mxu1 %vm990_vm13, %v5320_v11 }
 0x9cf   :  { %v2857_v57 = vpack.c.bf16 %v2854_v44, %v2854_v44  ;;  %5804 = vmatpush3.bf16.msra.mxu0 %v2609_v8  ;;  %2759 = vmatpush1.bf16.msra.mxu1 %v2739_v55  ;;  %v2913_v10 = vpop.permute.xlu1 %2912  ;;  %v2856_v15 = vpack.c.bf16 %v2853_v54, %v2853_v54 }
 0x9d0   :  { %v2914_v12 = vsel %vm327_vm5, %v2911_v4, %v2913_v10  ;;  %5329 = vmatprep.subr.msk.bf16.mxu0 %vm147_vm2, %v2711_v53  ;;  %2776 = vmatprep.mubr.bf16.mxu1 %v6064_v1  ;;  %v2915_v23 = vsel %vm327_vm5, %v2913_v10, %v2911_v4  ;;  %v3201_v4 = vrot.slane %v5350_v39, %v6246_v20  ;;  %v5336_v10 = vld [vmem:[%s7617_s7 + $0xc] sm:$0xf] }
 0x9d1   :  { %5333 = vmatprep.subr.msk.bf16.mxu1 %vm147_vm2, %v2857_v57  ;;  %v3041_v13 = vpop.permute.xlu0 %3040  ;;  %5805 = vmatprep.mubr.msk.bf16.mxu0 %vm6081_vm12, %v6074_v43  ;;  %v2929_v17 = vmul.f32 %v2925_v51, %v2914_v12  ;;  %v2928_v59 = vmul.f32 %v2921_v16, %v2915_v23  ;;  %v2862_v62 = vsel %vm147_vm2, %v2856_v15, 0  ;;  %v3276_v51 = vrot.slane %v5354_v40, %v6246_v20  ;;  %v5339_v20 = vld [vmem:[%s7617_s7 + $0x10] sm:$0xf]  ;;  %v5343_v23 = vld [vmem:[%s7617_s7 + $0x14] sm:$0xf] }
 0x9d3   :  { %v3043_v24 = vpop.permute.xlu1 %3042  ;;  %v2932_v60 = vpack.c.bf16 %v2929_v17, %v2929_v17  ;;  %v2931_v32 = vpack.c.bf16 %v2928_v59, %v2928_v59  ;;  %v7125_v59 = vld [vmem:[%s7613_s3 + $0x30] sm:$0xff]  }
 0x9d4   :  { %v3045_v63 = vsel %vm461_vm6, %v3043_v24, %v3041_v13  ;;  %v3044_v34 = vsel %vm461_vm6, %v3041_v13, %v3043_v24  ;;  %v5347_v24 = vld [vmem:[%s7617_s7 + $0x18] sm:$0xf] }
 0x9d5   :  { %v3116_v29 = vpop.permute.xlu0 %3115  ;;  %v3059_v36 = vmul.f32 %v3055_v28, %v3045_v63  ;;  %v3058_v0 = vmul.f32 %v3051_v38, %v3044_v34  ;;  %v2937_v11 = vsel %vm147_vm2, %v2931_v32, 0  ;;  %v5351_v28 = vld [vmem:[%s7617_s7 + $0x1c] sm:$0xf]  ;;  %v7149_v63 = vld [vmem:[%s7613_s3 + $0x20] sm:$0xff]   ;;  %v7168_v38 = vld [vmem:[%s7613_s3 + $0x50] sm:$0xff]  }
 0x9d6   :  { %5806 = vmatmul.mubr.msk.bf16.vlgmr.msra.gmra.mxu0 %vm990_vm13, %v5322_v26  ;;  %5328 = vmatmul.mubr.msk.bf16.vlgmr.msra.gmra.mxu1 %vm143_vm4, %v5326_v27  ;;  %v7192_v32 = vld [vmem:[%s7613_s3 + $0x40] sm:$0xff]  }
 0x9d7   :  { %2809 = vmatpush1.bf16.msra.mxu0 %v2789_v61  ;;  %2882 = vmatpush1.bf16.msra.mxu1 %v2862_v62  ;;  %v3118_v3 = vpop.permute.xlu1 %3117  ;;  %v3062_v47 = vpack.c.bf16 %v3059_v36, %v3059_v36  ;;  %v3061_v21 = vpack.c.bf16 %v3058_v0, %v3058_v0  ;;  %v7137_v61 = vld [vmem:[%s7613_s3 + $0x28] sm:$0xff]   ;;  %v7144_v62 = vld [vmem:[%s7613_s3 + $0x60] sm:$0xff]  }
 0x9d8   :  { %v3120_v5 = vsel %vm539_vm7, %v3118_v3, %v3116_v29  ;;  %5337 = vmatprep.subr.msk.bf16.mxu0 %vm147_vm2, %v2932_v60  ;;  %5340 = vmatprep.subr.msk.bf16.mxu1 %vm147_vm2, %v2987_v58  ;;  %v3119_v41 = vsel %vm539_vm7, %v3116_v29, %v3118_v3  ;;  %v5355_v29 = vld [vmem:[%s7617_s7 + $0x20] sm:$0xf]  ;;  %v7120_v58 = vld [vmem:[%s7613_s3 + $0x70] sm:$0xff]   ;;  %v7132_v60 = vld [vmem:[%s7613_s3 + $0x68] sm:$0xff]  }
 0x9d9   :  { %v3191_v9 = vpop.permute.xlu0 %3190  ;;  %2899 = vmatprep.mubr.bf16.mxu1 %v6064_v1  ;;  %2826 = vmatprep.mubr.bf16.mxu0 %v6064_v1  ;;  %v3134_v37 = vmul.f32 %v3130_v56, %v3120_v5  ;;  %v3133_v30 = vmul.f32 %v3126_v7, %v3119_v41  ;;  %v3067_v13 = vsel %vm147_vm2, %v3061_v21, 0  ;;  %v7113_v56 = vld [vmem:[%s7613_s3 + $0x38] sm:$0xff]   ;;  %v7173_v7 = vld [vmem:[%s7613_s3 + $0x10] sm:$0xff]   ;;  %v7197_v34 = vld [vmem:[%s7613_s3] sm:$0xff]  }
 0x9da   :  { %v7156_v3 = vld [vmem:[%s7613_s3 + $0x58] sm:$0xff]  }
 0x9db   :  { %v3193_v42 = vpop.permute.xlu1 %3192  ;;  %v3137_v35 = vpack.c.bf16 %v3134_v37, %v3134_v37  ;;  %v3136_v52 = vpack.c.bf16 %v3133_v30, %v3133_v30  ;;  %v7161_v5 = vld [vmem:[%s7613_s3 + $0x18] sm:$0xff]  }
 0x9dc   :  { %v3195_v48 = vsel %vm617_vm8, %v3193_v42, %v3191_v9  ;;  %v3194_v53 = vsel %vm617_vm8, %v3191_v9, %v3193_v42  ;;  %v7180_v9 = vld [vmem:[%s7613_s3 + $0x48] sm:$0xff]  }
 0x9dd   :  { %v3266_v50 = vpop.permute.xlu0 %3265  ;;  %v3209_v54 = vmul.f32 %v3205_v6, %v3195_v48  ;;  %v3208_v12 = vmul.f32 %v3201_v4, %v3194_v53  ;;  %v3142_v17 = vsel %vm147_vm2, %v3136_v52, 0 }
 0x9de   :  { %5330 = vmatmul.mubr.msk.bf16.vlgmr.msra.gmra.mxu0 %vm143_vm4, %v2709_v49  ;;  %5334 = vmatmul.mubr.msk.bf16.vlgmr.msra.gmra.mxu1 %vm143_vm4, %v5332_v45 }
 0x9df   :  { %2957 = vmatpush1.bf16.msra.mxu0 %v2937_v11  ;;  %3012 = vmatpush1.bf16.msra.mxu1 %v2992_v33  ;;  %v3268_v8 = vpop.permute.xlu1 %3267  ;;  %v3212_v14 = vpack.c.bf16 %v3209_v54, %v3209_v54  ;;  %v3211_v18 = vpack.c.bf16 %v3208_v12, %v3208_v12 }
 0x9e0   :  { %v3270_v44 = vsel %vm695_vm9, %v3268_v8, %v3266_v50  ;;  %5344 = vmatprep.subr.msk.bf16.mxu0 %vm147_vm2, %v3062_v47  ;;  %5348 = vmatprep.subr.msk.bf16.mxu1 %vm147_vm2, %v3137_v35  ;;  %v3269_v57 = vsel %vm695_vm9, %v3266_v50, %v3268_v8 }
 0x9e1   :  { %2974 = vmatprep.mubr.bf16.mxu0 %v6064_v1  ;;  %3029 = vmatprep.mubr.bf16.mxu1 %v6064_v1  ;;  %v3284_v55 = vmul.f32 %v3280_v46, %v3270_v44  ;;  %v3283_v15 = vmul.f32 %v3276_v51, %v3269_v57  ;;  %v3217_v26 = vsel %vm147_vm2, %v3211_v18, 0 }
 0x9e3   :  { %v3287_v16 = vpack.c.bf16 %v3284_v55, %v3284_v55  ;;  %v3286_v22 = vpack.c.bf16 %v3283_v15, %v3283_v15 }
 0x9e5   :  { %v3292_v27 = vsel %vm147_vm2, %v3286_v22, 0 }
 0x9e6   :  { %5338 = vmatmul.mubr.msk.bf16.vlgmr.msra.gmra.mxu0 %vm143_vm4, %v5336_v10  ;;  %5341 = vmatmul.mubr.msk.bf16.vlgmr.msra.gmra.mxu1 %vm143_vm4, %v5339_v20 }
 0x9e7   :  { %3087 = vmatpush1.bf16.msra.mxu0 %v3067_v13  ;;  %3162 = vmatpush1.bf16.msra.mxu1 %v3142_v17 }
 0x9e8   :  { %5352 = vmatprep.subr.msk.bf16.mxu0 %vm147_vm2, %v3212_v14  ;;  %5356 = vmatprep.subr.msk.bf16.mxu1 %vm147_vm2, %v3287_v16 }
 0x9e9   :  { %3104 = vmatprep.mubr.bf16.mxu0 %v6064_v1  ;;  %3179 = vmatprep.mubr.bf16.mxu1 %v6064_v1 }
 0x9ee   :  { %5345 = vmatmul.mubr.msk.bf16.vlgmr.msra.gmra.mxu0 %vm143_vm4, %v5343_v23  ;;  %5349 = vmatmul.mubr.msk.bf16.vlgmr.msra.gmra.mxu1 %vm143_vm4, %v5347_v24 }
 0x9ef   :  { %3237 = vmatpush1.bf16.msra.mxu0 %v3217_v26  ;;  %3312 = vmatpush1.bf16.msra.mxu1 %v3292_v27 }
 0x9f0   :  { %3254 = vmatprep.mubr.bf16.mxu0 %v6064_v1  ;;  %3329 = vmatprep.mubr.bf16.mxu1 %v6064_v1  ;;  %v7108_v1 = vld [vmem:[%s7613_s3 + $0x78] sm:$0xff]   ;;  %s7690_s3 = smov 119  }
 0x9f1   :  { %5809 = vmatprep.subr.bf16.mxu1 %v6074_v43  ;;  %5541 = vmatprep.subr.bf16.mxu0 %v7108_v1 }
 0x9f6   :  { %5353 = vmatmul.mubr.msk.bf16.vlgmr.msra.gmra.mxu0 %vm143_vm4, %v5351_v28  ;;  %5357 = vmatmul.mubr.msk.bf16.vlgmr.msra.gmra.mxu1 %vm143_vm4, %v5355_v29 }
 0x9f7   :  { %5811 = vmatprep.mubr.msk.bf16.mxu1 %vm6081_vm12, %v6074_v43  ;;  %5542 = vmatpush3.bf16.msra.mxu0 %v7113_v56 }
 0x9f8   :  { %5543 = vmatprep.subr.bf16.mxu0 %v7120_v58 }
 0x9fb   :  { %5544 = vmatpush3.bf16.msra.mxu0 %v7125_v59 }
 0x9fc   :  { %5545 = vmatprep.subr.bf16.mxu0 %v7132_v60 }
 0x9ff   :  { %5546 = vmatpush3.bf16.msra.mxu0 %v7137_v61 }
 0xa00   :  { %5547 = vmatprep.subr.bf16.mxu0 %v7144_v62 }
 0xa03   :  { %5548 = vmatpush3.bf16.msra.mxu0 %v7149_v63 }
 0xa04   :  { %5549 = vmatprep.subr.bf16.mxu0 %v7156_v3 }
 0xa07   :  { %5550 = vmatpush3.bf16.msra.mxu0 %v7161_v5 }
 0xa08   :  { %5551 = vmatprep.subr.bf16.mxu0 %v7168_v38 }
 0xa0b   :  { %5552 = vmatpush3.bf16.msra.mxu0 %v7173_v7 }
 0xa0c   :  { %5553 = vmatprep.subr.bf16.mxu0 %v7180_v9 }
 0xa0f   :  { %5554 = vmatpush3.bf16.msra.mxu0 %v7185_v31 }
 0xa10   :  { %5555 = vmatprep.subr.bf16.mxu0 %v7192_v32 }
 0xa13   :  { %5556 = vmatpush3.bf16.msra.mxu0 %v7197_v34 }
 0xa14   :  { %5833 = vmatprep.subr.bf16.mxu0 %v6074_v43 }
 0xa76   :  { %v2223_v36 = vpop.f32.mrf.mxu0  ;;  %v2272_v37 = vpop.f32.mrf.mxu1 }
 0xa77   :  { %v2273_v35 = vadd.f32 %v2272_v37, %v2223_v36 }
 0xa78   :  { %v5759_v39 = vpop.f32.mrf.mxu0  ;;  %v5765_v40 = vpop.f32.mrf.mxu1 }
 0xa7a   :  { %v2226_v41 = vpop.f32.mrf.mxu0  ;;  %v2275_v42 = vpop.f32.mrf.mxu1 }
 0xa7c   :  { %v5760_v49 = vpop.f32.mrf.mxu0  ;;  %v5766_v45 = vpop.f32.mrf.mxu1 }
 0xa7e   :  { %v2325_v0 = vpop.f32.mrf.mxu0  ;;  %v2379_v6 = vpop.f32.mrf.mxu1 }
 0xa7f   :  { %v2331_v50 = vadd.f32 %v2325_v0, %v2273_v35 }
 0xa80   :  { %v5771_v33 = vpop.f32.mrf.mxu0  ;;  %v5777_v46 = vpop.f32.mrf.mxu1 }
 0xa81   :  { %v2385_v51 = vadd.f32 %v2379_v6, %v2331_v50 }
 0xa82   :  { %v2328_v47 = vpop.f32.mrf.mxu0  ;;  %v2382_v30 = vpop.f32.mrf.mxu1 }
 0xa84   :  { %v5772_v11 = vpop.f32.mrf.mxu0  ;;  %v5778_v48 = vpop.f32.mrf.mxu1 }
 0xa86   :  { %v2429_v8 = vpop.f32.mrf.mxu0  ;;  %v2483_v44 = vpop.f32.mrf.mxu1 }
 0xa87   :  { %v2435_v54 = vadd.f32 %v2429_v8, %v2385_v51 }
 0xa88   :  { %v5783_v21 = vpop.f32.mrf.mxu0  ;;  %v5789_v4 = vpop.f32.mrf.mxu1 }
 0xa89   :  { %v2489_v12 = vadd.f32 %v2483_v44, %v2435_v54 }
 0xa8a   :  { %v2432_v52 = vpop.f32.mrf.mxu0  ;;  %v2486_v53 = vpop.f32.mrf.mxu1 }
 0xa8c   :  { %v5784_v55 = vpop.f32.mrf.mxu0  ;;  %v5790_v57 = vpop.f32.mrf.mxu1 }
 0xa8e   :  { %v2537_v10 = vpop.f32.mrf.mxu0  ;;  %v2591_v20 = vpop.f32.mrf.mxu1 }
 0xa8f   :  { %v2543_v15 = vadd.f32 %v2537_v10, %v2489_v12 }
 0xa90   :  { %v5795_v13 = vpop.f32.mrf.mxu0  ;;  %v5801_v14 = vpop.f32.mrf.mxu1 }
 0xa91   :  { %v2597_v23 = vadd.f32 %v2591_v20, %v2543_v15 }
 0xa92   :  { %v2540_v16 = vpop.f32.mrf.mxu0  ;;  %v2594_v17 = vpop.f32.mrf.mxu1 }
 0xa94   :  { %v5796_v18 = vpop.f32.mrf.mxu0  ;;  %v5802_v22 = vpop.f32.mrf.mxu1 }
 0xa96   :  { %v2645_v24 = vpop.f32.mrf.mxu0  ;;  %v2778_v26 = vpop.f32.mrf.mxu1 }
 0xa97   :  { %v2651_v27 = vadd.f32 %v2645_v24, %v2597_v23 }
 0xa98   :  { %v5807_v28 = vpop.f32.mrf.mxu0  ;;  %v2780_v29 = vpop.f32.mrf.mxu1 }
 0xa99   :  { %v2652_v36 = vadd.f32 %v2651_v27, %v6704_v25 }
 0xa9a   :  { %v2648_v37 = vpop.f32.mrf.mxu0  ;;  %v2782_v39 = vpop.f32.mrf.mxu1 }
 0xa9b   :  { %2654 = vst.msk [vmem:[#allocation2] sm:$0xff] %vm2653_vm14, %v2652_v36 }
 0xa9c   :  { %v5808_v40 = vpop.f32.mrf.mxu0  ;;  %v2783_v41 = vpop.f32.mrf.mxu1 }
 0xa9e   :  { %v2828_v42 = vpop.f32.mrf.mxu0  ;;  %v2901_v49 = vpop.f32.mrf.mxu1 }
 0xa9f   :  { %v2829_v30 = vadd.f32 %v2828_v42, %v2778_v26 }
 0xaa0   :  { %v2830_v45 = vpop.f32.mrf.mxu0  ;;  %v2903_v0 = vpop.f32.mrf.mxu1 }
 0xaa1   :  { %v2831_v48 = vadd.f32 %v2830_v45, %v2780_v29  ;;  %v2908_v8 = vadd.f32 %v2901_v49, %v2829_v30  ;;  %v3514_v30 = vpop.permute.xlu0 %3513 }
 0xaa2   :  { %v2832_v6 = vpop.f32.mrf.mxu0  ;;  %v2905_v33 = vpop.f32.mrf.mxu1 }
 0xaa3   :  { %v2909_v4 = vadd.f32 %v2903_v0, %v2831_v48  ;;  %v3521_v48 = vpop.permute.xlu1 %3520 }
 0xaa4   :  { %v2833_v46 = vpop.f32.mrf.mxu0  ;;  %v2906_v47 = vpop.f32.mrf.mxu1 }
 0xaa6   :  { %v2976_v35 = vpop.f32.mrf.mxu0  ;;  %v3031_v11 = vpop.f32.mrf.mxu1 }
 0xaa7   :  { %v2983_v51 = vadd.f32 %v2976_v35, %v2908_v8 }
 0xaa8   :  { %v2978_v50 = vpop.f32.mrf.mxu0  ;;  %v3033_v25 = vpop.f32.mrf.mxu1 }
 0xaa9   :  { %v2984_v54 = vadd.f32 %v2978_v50, %v2909_v4  ;;  %v3038_v10 = vadd.f32 %v3031_v11, %v2983_v51  ;;  %v5381_v51 = vld [vmem:[%s7612_s2 + $0x2] ss:$0 sm:$0xff] }
 0xaaa   :  { %v2980_v44 = vpop.f32.mrf.mxu0  ;;  %v3035_v21 = vpop.f32.mrf.mxu1 }
 0xaab   :  { %v3039_v13 = vadd.f32 %v3033_v25, %v2984_v54  ;;  %v5376_v21 = vld [vmem:[%s7612_s2 + $0x1] ss:$0 sm:$0xff] }
 0xaac   :  { %v2981_v52 = vpop.f32.mrf.mxu0  ;;  %v3036_v53 = vpop.f32.mrf.mxu1 }
 0xaad   :  { %v5391_v52 = vld [vmem:[%s7612_s2 + $0x5] ss:$0 sm:$0xff] }
 0xaae   :  { %v3106_v55 = vpop.f32.mrf.mxu0  ;;  %v3181_v57 = vpop.f32.mrf.mxu1 }
 0xaaf   :  { %v3113_v14 = vadd.f32 %v3106_v55, %v3038_v10  ;;  %v5374_v55 = vld [vmem:[%s7612_s2] ss:$0 sm:$0xff]  ;;  %v5399_v10 = vld [vmem:[%s7612_s2 + $0x7] ss:$0 sm:$0xff] }
 0xab0   :  { %v3108_v20 = vpop.f32.mrf.mxu0  ;;  %v3183_v12 = vpop.f32.mrf.mxu1 }
 0xab1   :  { %v3114_v17 = vadd.f32 %v3108_v20, %v3039_v13  ;;  %v3188_v23 = vadd.f32 %v3181_v57, %v3113_v14  ;;  %v5385_v57 = vld [vmem:[%s7612_s2 + $0x3] ss:$0 sm:$0xff] }
 0xab2   :  { %v3110_v15 = vpop.f32.mrf.mxu0  ;;  %v3185_v16 = vpop.f32.mrf.mxu1 }
 0xab3   :  { %v3189_v27 = vadd.f32 %v3183_v12, %v3114_v17 }
 0xab4   :  { %v3111_v18 = vpop.f32.mrf.mxu0  ;;  %v3186_v22 = vpop.f32.mrf.mxu1 }
 0xab6   :  { %v3256_v24 = vpop.f32.mrf.mxu0  ;;  %v3331_v26 = vpop.f32.mrf.mxu1 }
 0xab7   :  { %v3263_v28 = vadd.f32 %v3256_v24, %v3188_v23 }
 0xab8   :  { %v3258_v29 = vpop.f32.mrf.mxu0  ;;  %v3333_v36 = vpop.f32.mrf.mxu1 }
 0xab9   :  { %v3264_v37 = vadd.f32 %v3258_v29, %v3189_v27  ;;  %v3338_v39 = vadd.f32 %v3331_v26, %v3263_v28 }
 0xaba   :  { %v3260_v40 = vpop.f32.mrf.mxu0  ;;  %v3335_v41 = vpop.f32.mrf.mxu1 }
 0xabb   :  { %v3339_v42 = vadd.f32 %v3333_v36, %v3264_v37  ;;  %v3372_v6 = vpack.c.bf16 %v3338_v39, %v3338_v39 }
 0xabc   :  { %v3261_v49 = vpop.f32.mrf.mxu0  ;;  %v3336_v45 = vpop.f32.mrf.mxu1 }
 0xabd   :  { %v3373_v0 = vpack.c.bf16 %v3339_v42, %v3339_v42  ;;  %v4075_v42 = vcombine.high %v6841_v2, %v6841_v2  ;;  %v5388_v49 = vld [vmem:[%s7620_s10 + $0x10] sm:$0xf]  ;;  %v5395_v45 = vld [vmem:[%s7612_s2 + $0x6] ss:$0 sm:$0xff] }
 0xabf   :  { %3502 = vmatprep.mubr.bf16.mxu0 %v3373_v0  ;;  %v5403_v0 = vld [vmem:[%s7612_s2 + $0x8] ss:$0 sm:$0xff] }
 0xac0   :  { %3503 = vmatmul.mubr.bf16.vlgmr.msra.gmra.mxu0 %v3372_v6 }
 0xac1   :  { %5835 = vmatprep.mubr.msk.bf16.mxu0 %vm6081_vm12, %v6074_v43 }
 0xb80   :  { %v5557_v33 = vpop.f32.mrf.mxu0 }
 0xb82   :  { %v5558_v46 = vpop.f32.mrf.mxu0 }
 0xb83   :  { %v5559_v47 = vadd.f32 %v5558_v46, %v5557_v33  ;;  %v5377_v46 = vld [vmem:[%s7620_s10 + $0x4] sm:$0xf] }
 0xb84   :  { %v5560_v35 = vpop.f32.mrf.mxu0 }
 0xb85   :  { %v3516_v11 = vmul.f32 %v5559_v47, %v3514_v30 }
 0xb86   :  { %v5561_v50 = vpop.f32.mrf.mxu0 }
 0xb87   :  { %v3523_v25 = vadd.f32 %v3521_v48, %v3516_v11  ;;  %v3541_v50 = vld [vmem:[%s7620_s10] sm:$0xf] }
 0xb89   :  { %v3524_v8 = vmax.f32 %v3523_v25, 0.0 }
 0xb8b   :  { %3525 = vrot.lane.b32.xlu0 %v3524_v8, %s6075_s21  ;;  %v3778_v44 = vpack.c.bf16 %v3524_v8, %v3524_v8 }
 0xb8d   :  { %v3783_v4 = vsel %vm994_vm10, %v3778_v44, 0 }
 0xb8e   :  { %5834 = vmatpush3.bf16.msra.mxu0 %v3783_v4 }
 0xb8f   :  { %3549 = vrot.lane.b32.xlu0 %v5376_v21, %s7682_s19  ;;  %5845 = vmatprep.subr.bf16.mxu0 %v6074_v43  ;;  %s7685_s19 = smov 63  }
 0xb91   :  { %5836 = vmatmul.mubr.msk.bf16.vlgmr.msra.gmra.mxu0 %vm990_vm13, %v5388_v49 }
 0xb92   :  { %5847 = vmatprep.mubr.msk.bf16.mxu0 %vm6081_vm12, %v6074_v43 }
 0xb93   :  { %3659 = vrot.lane.b32.xlu0 %v5381_v51, %s7683_s8  ;;  %s7687_s8 = smov 73   ;;  %v5382_v51 = vld [vmem:[%s7620_s10 + $0x8] sm:$0xf] }
 0xb97   :  { %3832 = vrot.lane.b32.xlu0 %v5391_v52, %s7678_s23  ;;  %s7686_s23 = smov 8  }
 0xbfd   :  { %v3526_v53 = vpop.permute.xlu0 %3525 }
 0xbfe   :  { %v3527_v54 = vsel %vm954_vm11, %v3526_v53, %v3524_v8 }
 0xbff   :  { %3528 = vrot.lane.b32.xlu1 %v3527_v54, %s6075_s21 }
 0xc01   :  { %v7235_v20 = vpop.permute.xlu0 %3549 }
 0xc03   :  { %3537 = vrot.lane.b32.xlu1 %v5374_v55, %s7684_s26  ;;  %s7688_s26 = smov 7  }
 0xc05   :  { %v7237_v12 = vpop.permute.xlu0 %3659 }
 0xc07   :  { %3721 = vrot.lane.b32.xlu1 %v5385_v57, %s7685_s19  ;;  %s7689_s19 = smov 9  }
 0xc09   :  { %v7248_v22 = vpop.permute.xlu0 %3832 }
 0xc0b   :  { %3956 = vrot.lane.b32.xlu1 %v5399_v10, %s7686_s23 }
 0xc71   :  { %v3529_v13 = vpop.permute.xlu1 %3528 }
 0xc72   :  { %v7240_v14 = vsel %vm954_vm11, %v3529_v13, %v3524_v8 }
 0xc73   :  { %v3552_v15 = vmul.f32 %v7235_v20, %v7240_v14  ;;  %v3662_v18 = vmul.f32 %v7237_v12, %v7240_v14  ;;  %v3835_v26 = vmul.f32 %v7248_v22, %v7240_v14 }
 0xc75   :  { %v7244_v16 = vpop.permute.xlu1 %3537  ;;  %v3554_v17 = vpack.c.bf16 %v3552_v15, %v3552_v15  ;;  %v3664_v28 = vpack.c.bf16 %v3662_v18, %v3662_v18  ;;  %v3837_v37 = vpack.c.bf16 %v3835_v26, %v3835_v26 }
 0xc76   :  { %v3540_v23 = vmul.f32 %v7244_v16, %v7240_v14 }
 0xc77   :  { %3556 = vrot.lane.b32.xlu0 %v3554_v17, %s6082_s27 }
 0xc78   :  { %v3542_v24 = vpack.c.bf16 %v3540_v23, %v3540_v23 }
 0xc79   :  { %v7255_v27 = vpop.permute.xlu1 %3721 }
 0xc7a   :  { %v3724_v29 = vmul.f32 %v7255_v27, %v7240_v14  ;;  %3605 = vrot.lane.b32.xlu1 %v3542_v24, %s7687_s8 }
 0xc7b   :  { %3666 = vrot.lane.b32.xlu0 %v3664_v28, %s7673_s5  ;;  %v5386_v28 = vld [vmem:[%s7620_s10 + $0xc] sm:$0xf] }
 0xc7c   :  { %v3726_v36 = vpack.c.bf16 %v3724_v29, %v3724_v29 }
 0xc7d   :  { %v7261_v39 = vpop.permute.xlu1 %3956 }
 0xc7e   :  { %v3959_v40 = vmul.f32 %v7261_v39, %v7240_v14  ;;  %3728 = vrot.lane.b32.xlu1 %v3726_v36, %s7670_s20 }
 0xc7f   :  { %3839 = vrot.lane.b32.xlu0 %v3837_v37, %s7671_s24 }
 0xc80   :  { %v3961_v41 = vpack.c.bf16 %v3959_v40, %v3959_v40 }
 0xc82   :  { %3963 = vrot.lane.b32.xlu1 %v3961_v41, %s7672_s1 }
 0xc83   :  { %4077 = vrot.lane.b32.xlu0 %v6841_v2, %s7671_s24 }
 0xc86   :  { %4079 = vrot.lane.b32.xlu1 %v4075_v42, %s7671_s24 }
 0xc87   :  { %4088 = vrot.lane.b32.xlu0 %v6841_v2, %s7680_s6 }
 0xc8a   :  { %4090 = vrot.lane.b32.xlu1 %v4075_v42, %s7680_s6 }
 0xc8b   :  { %4099 = vrot.lane.b32.xlu0 %v6841_v2, %s7681_s25 }
 0xc8e   :  { %4101 = vrot.lane.b32.xlu1 %v4075_v42, %s7681_s25 }
 0xc8f   :  { %3894 = vrot.lane.b32.xlu0 %v5395_v45, %s7688_s26 }
 0xc92   :  { %4018 = vrot.lane.b32.xlu1 %v5403_v0, %s7689_s19 }
 0xce9   :  { %v3557_v6 = vpop.permute.xlu0 %3556 }
 0xcea   :  { %v3562_v33 = vsel %vm994_vm10, %v3557_v6, 0  ;;  %v5392_v6 = vld [vmem:[%s7620_s10 + $0x14] sm:$0xf] }
 0xceb   :  { %5810 = vmatpush3.bf16.msra.mxu1 %v3562_v33 }
 0xcec   :  { %v3606_v47 = vpop.permute.xlu1 %3605  ;;  %5815 = vmatprep.subr.bf16.mxu1 %v6074_v43 }
 0xced   :  { %v3611_v30 = vsel %vm994_vm10, %v3606_v47, 0  ;;  %v3667_v35 = vpop.permute.xlu0 %3666  ;;  %v5400_v47 = vld [vmem:[%s7620_s10 + $0x1c] sm:$0xf] }
 0xcee   :  { %5812 = vmatmul.mubr.msk.bf16.vlgmr.msra.gmra.mxu1 %vm990_vm13, %v5377_v46  ;;  %v3672_v44 = vsel %vm994_vm10, %v3667_v35, 0 }
 0xcef   :  { %5816 = vmatpush3.bf16.msra.mxu1 %v3611_v30  ;;  %5817 = vmatprep.mubr.msk.bf16.mxu1 %vm6081_vm12, %v6074_v43 }
 0xcf0   :  { %v3729_v11 = vpop.permute.xlu1 %3728  ;;  %5821 = vmatprep.subr.bf16.mxu1 %v6074_v43 }
 0xcf1   :  { %v3840_v48 = vpop.permute.xlu0 %3839  ;;  %v3734_v57 = vsel %vm994_vm10, %v3729_v11, 0 }
 0xcf2   :  { %v3845_v42 = vsel %vm994_vm10, %v3840_v48, 0 }
 0xcf4   :  { %v3964_v25 = vpop.permute.xlu1 %3963 }
 0xcf5   :  { %v4078_v8 = vpop.permute.xlu0 %4077  ;;  %v3969_v33 = vsel %vm994_vm10, %v3964_v25, 0 }
 0xcf6   :  { %5818 = vmatmul.mubr.msk.bf16.vlgmr.msra.gmra.mxu1 %vm990_vm13, %v3541_v50 }
 0xcf7   :  { %5822 = vmatpush3.bf16.msra.mxu1 %v3672_v44  ;;  %5823 = vmatprep.mubr.msk.bf16.mxu1 %vm6081_vm12, %v6074_v43 }
 0xcf8   :  { %v4080_v21 = vpop.permute.xlu1 %4079  ;;  %5827 = vmatprep.subr.bf16.mxu1 %v6074_v43 }
 0xcf9   :  { %v4089_v4 = vpop.permute.xlu0 %4088  ;;  %v4081_v52 = vsel %vm461_vm6, %v4078_v8, %v4080_v21  ;;  %v4082_v53 = vsel %vm461_vm6, %v4080_v21, %v4078_v8 }
 0xcfa   :  { %v4085_v10 = vcombine.low %v4081_v52, %v4082_v53 }
 0xcfc   :  { %v4091_v54 = vpop.permute.xlu1 %4090  ;;  %v4087_v24 = vadd.f32 %v6841_v2, %v4085_v10 }
 0xcfd   :  { %v4100_v55 = vpop.permute.xlu0 %4099  ;;  %v4092_v13 = vsel %vm617_vm8, %v4089_v4, %v4091_v54  ;;  %v4093_v15 = vsel %vm617_vm8, %v4091_v54, %v4089_v4 }
 0xcfe   :  { %5824 = vmatmul.mubr.msk.bf16.vlgmr.msra.gmra.mxu1 %vm990_vm13, %v5382_v51  ;;  %v4096_v26 = vcombine.low %v4092_v13, %v4093_v15 }
 0xcff   :  { %5828 = vmatpush3.bf16.msra.mxu1 %v3734_v57  ;;  %5829 = vmatprep.mubr.msk.bf16.mxu1 %vm6081_vm12, %v6074_v43 }
 0xd00   :  { %v4102_v17 = vpop.permute.xlu1 %4101  ;;  %5839 = vmatprep.subr.bf16.mxu1 %v6074_v43  ;;  %v4098_v2 = vadd.f32 %v4096_v26, %v4087_v24 }
 0xd01   :  { %v7327_v18 = vpop.permute.xlu0 %3894  ;;  %v4103_v29 = vsel %vm695_vm9, %v4100_v55, %v4102_v17  ;;  %v4104_v36 = vsel %vm695_vm9, %v4102_v17, %v4100_v55 }
 0xd02   :  { %v3897_v23 = vmul.f32 %v7327_v18, %v7240_v14  ;;  %v4107_v49 = vcombine.low %v4103_v29, %v4104_v36 }
 0xd04   :  { %v3899_v37 = vpack.c.bf16 %v3897_v23, %v3897_v23  ;;  %v7339_v40 = vpop.permute.xlu1 %4018  ;;  %v4109_v0 = vadd.f32 %v4107_v49, %v4098_v2 }
 0xd05   :  { %v4021_v41 = vmul.f32 %v7339_v40, %v7240_v14  ;;  %v4212_v14 = vld [vmem:[%s7622_s12] sm:$0xff] }
 0xd06   :  { %5830 = vmatmul.mubr.msk.bf16.vlgmr.msra.gmra.mxu1 %vm990_vm13, %v5386_v28  ;;  %3901 = vrot.lane.b32.xlu0 %v3899_v37, %s7674_s29  ;;  %v4111_v46 = vcombine.high %v4109_v0, %v4109_v0 }
 0xd07   :  { %v4023_v45 = vpack.c.bf16 %v4021_v41, %v4021_v41  ;;  %5840 = vmatpush3.bf16.msra.mxu1 %v3845_v42  ;;  %5841 = vmatprep.mubr.msk.bf16.mxu1 %vm6081_vm12, %v6074_v43 }
 0xd08   :  { %5851 = vmatprep.subr.bf16.mxu1 %v6074_v43  ;;  %v4114_v30 = vpack.c.bf16 %v4111_v46, %v4111_v46 }
 0xd09   :  { %4025 = vrot.lane.b32.xlu1 %v4023_v45, %s7690_s3 }
 0xd0a   :  { %4208 = vperm.xlu0 %6006, %v4205_v19  }
 0xd0d   :  { %4215 = vperm.xlu1 %6007, %v4212_v14   ;;  %v4156_v14 = vld [vmem:[%s7614_s4] sm:$0xf] }
 0xd0e   :  { %5842 = vmatmul.mubr.msk.bf16.vlgmr.msra.gmra.mxu1 %vm990_vm13, %v5392_v6 }
 0xd0f   :  { %5852 = vmatpush3.bf16.msra.mxu1 %v3969_v33  ;;  %5853 = vmatprep.mubr.msk.bf16.mxu1 %vm6081_vm12, %v6074_v43 }
 0xd10   :  { %5581 = vmatprep.subr.bf16.mxu1 %v7108_v1  ;;  %v4113_v1 = vpack.c.bf16 %v4109_v0, %v4109_v0 }
 0xd16   :  { %5854 = vmatmul.mubr.msk.bf16.vlgmr.msra.gmra.mxu1 %vm990_vm13, %v5400_v47 }
 0xd17   :  { %5582 = vmatpush3.bf16.msra.mxu1 %v7113_v56  ;;  %4147 = vmatprep.mubr.bf16.mxu1 %v4114_v30  ;;  %v3819_v56 = vpop.f32.mrf.mxu0 }
 0xd18   :  { %5583 = vmatprep.subr.bf16.mxu1 %v7120_v58 }
 0xd19   :  { %v5837_v58 = vpop.f32.mrf.mxu0 }
 0xd1b   :  { %5584 = vmatpush3.bf16.msra.mxu1 %v7125_v59  ;;  %v3822_v59 = vpop.f32.mrf.mxu0 }
 0xd1c   :  { %5585 = vmatprep.subr.bf16.mxu1 %v7132_v60 }
 0xd1d   :  { %v5838_v60 = vpop.f32.mrf.mxu0 }
 0xd1f   :  { %5586 = vmatpush3.bf16.msra.mxu1 %v7137_v61 }
 0xd20   :  { %5587 = vmatprep.subr.bf16.mxu1 %v7144_v62 }
 0xd23   :  { %5588 = vmatpush3.bf16.msra.mxu1 %v7149_v63  ;;  %v5396_v63 = vld [vmem:[%s7620_s10 + $0x18] sm:$0xf] }
 0xd24   :  { %5589 = vmatprep.subr.bf16.mxu1 %v7156_v3 }
 0xd27   :  { %5590 = vmatpush3.bf16.msra.mxu1 %v7161_v5 }
 0xd28   :  { %5591 = vmatprep.subr.bf16.mxu1 %v7168_v38  ;;  %v5404_v38 = vld [vmem:[%s7620_s10 + $0x20] sm:$0xf] }
 0xd2b   :  { %5592 = vmatpush3.bf16.msra.mxu1 %v7173_v7 }
 0xd2c   :  { %5593 = vmatprep.subr.bf16.mxu1 %v7180_v9 }
 0xd2f   :  { %5594 = vmatpush3.bf16.msra.mxu1 %v7185_v31 }
 0xd30   :  { %5595 = vmatprep.subr.bf16.mxu1 %v7192_v32 }
 0xd33   :  { %5596 = vmatpush3.bf16.msra.mxu1 %v7197_v34 }
 0xd34   :  { %5887 = vmatprep.subr.bf16.mxu1 %v6074_v43 }
 0xd36   :  { %4148 = vmatmul.mubr.bf16.vlgmr.msra.gmra.mxu1 %v4113_v1 }
 0xd37   :  { %5889 = vmatprep.mubr.msk.bf16.mxu1 %vm6081_vm12, %v6074_v43 }
 0xd78   :  { %v3902_v61 = vpop.permute.xlu0 %3901 }
 0xd79   :  { %v3907_v62 = vsel %vm994_vm10, %v3902_v61, 0 }
 0xd7a   :  { %5846 = vmatpush3.bf16.msra.mxu0 %v3907_v62 }
 0xd7b   :  { %v4026_v3 = vpop.permute.xlu1 %4025  ;;  %5857 = vmatprep.subr.bf16.mxu0 %v6074_v43 }
 0xd7c   :  { %v4031_v5 = vsel %vm994_vm10, %v4026_v3, 0 }
 0xd7d   :  { %5848 = vmatmul.mubr.msk.bf16.vlgmr.msra.gmra.mxu0 %vm990_vm13, %v5396_v63 }
 0xd7e   :  { %5858 = vmatpush3.bf16.msra.mxu0 %v4031_v5  ;;  %5859 = vmatprep.mubr.msk.bf16.mxu0 %vm6081_vm12, %v6074_v43 }
 0xd7f   :  { %5863 = vmatprep.subr.bf16.mxu0 %v6074_v43 }
 0xd85   :  { %5860 = vmatmul.mubr.msk.bf16.vlgmr.msra.gmra.mxu0 %vm990_vm13, %v5404_v38  ;;  %v4209_v63 = vpop.permute.xlu0 %4208 }
 0xd86   :  { %5865 = vmatprep.mubr.msk.bf16.mxu0 %vm6081_vm12, %v6074_v43 }
 0xd88   :  { %v4216_v38 = vpop.permute.xlu1 %4215 }
 0xdae   :  { %v3598_v7 = vpop.f32.mrf.mxu1 }
 0xdb0   :  { %v5813_v9 = vpop.f32.mrf.mxu1 }
 0xdb2   :  { %v3601_v31 = vpop.f32.mrf.mxu1 }
 0xdb4   :  { %v5814_v32 = vpop.f32.mrf.mxu1 }
 0xdb6   :  { %v3647_v34 = vpop.f32.mrf.mxu1 }
 0xdb7   :  { %v3648_v35 = vadd.f32 %v3647_v34, %v3598_v7 }
 0xdb8   :  { %v5819_v11 = vpop.f32.mrf.mxu1 }
 0xdba   :  { %v3650_v48 = vpop.f32.mrf.mxu1 }
 0xdbc   :  { %v5820_v50 = vpop.f32.mrf.mxu1 }
 0xdbe   :  { %v3708_v25 = vpop.f32.mrf.mxu1 }
 0xdbf   :  { %v3714_v8 = vadd.f32 %v3708_v25, %v3648_v35 }
 0xdc0   :  { %v5825_v44 = vpop.f32.mrf.mxu1 }
 0xdc2   :  { %v3711_v21 = vpop.f32.mrf.mxu1 }
 0xdc4   :  { %v5826_v4 = vpop.f32.mrf.mxu1 }
 0xdc6   :  { %v3770_v51 = vpop.f32.mrf.mxu1 }
 0xdc7   :  { %v3776_v52 = vadd.f32 %v3770_v51, %v3714_v8 }
 0xdc8   :  { %v5831_v53 = vpop.f32.mrf.mxu1 }
 0xdc9   :  { %v3825_v57 = vadd.f32 %v3819_v56, %v3776_v52 }
 0xdca   :  { %v3773_v54 = vpop.f32.mrf.mxu1 }
 0xdcc   :  { %v5832_v55 = vpop.f32.mrf.mxu1 }
 0xdce   :  { %v3881_v10 = vpop.f32.mrf.mxu1 }
 0xdcf   :  { %v3887_v13 = vadd.f32 %v3881_v10, %v3825_v57 }
 0xdd0   :  { %v5843_v15 = vpop.f32.mrf.mxu1 }
 0xdd2   :  { %v3884_v17 = vpop.f32.mrf.mxu1 }
 0xdd4   :  { %v5844_v23 = vpop.f32.mrf.mxu1 }
 0xdd5   :  { %v4697_v23 = vld [vmem:[%s7624_s14] sm:$0xff] }
 0xdd6   :  { %v4005_v24 = vpop.f32.mrf.mxu1 }
 0xdd8   :  { %v5855_v26 = vpop.f32.mrf.mxu1 }
 0xdda   :  { %v4008_v28 = vpop.f32.mrf.mxu1 }
 0xddc   :  { %v5856_v29 = vpop.f32.mrf.mxu1 }
 0xdf6   :  { %v5597_v36 = vpop.f32.mrf.mxu1 }
 0xdf8   :  { %v5598_v37 = vpop.f32.mrf.mxu1 }
 0xdf9   :  { %v5599_v41 = vadd.f32 %v5598_v37, %v5597_v36  ;;  %v5407_v36 = vld [vmem:[%s7623_s13 + $0x4] sm:$0xf] }
 0xdfa   :  { %v5600_v42 = vpop.f32.mrf.mxu1 }
 0xdfb   :  { %v4155_v2 = vmul.f32 0.25, %v5599_v41 }
 0xdfc   :  { %v5601_v49 = vpop.f32.mrf.mxu1 }
 0xdfd   :  { %v4157_v45 = vpack.c.bf16 %v4155_v2, %v4155_v2  ;;  %v5412_v49 = vld [vmem:[%s7623_s13 + $0xc] sm:$0xf] }
 0xdff   :  { %v4162_v19 = vsel %vm147_vm2, %v4157_v45, 0 }
 0xe00   :  { %5864 = vmatpush3.bf16.msra.mxu0 %v4162_v19 }
 0xe01   :  { %5869 = vmatprep.subr.bf16.mxu0 %v6074_v43 }
 0xe03   :  { %5866 = vmatmul.mubr.msk.bf16.vlgmr.msra.gmra.mxu0 %vm143_vm4, %v4156_v14  ;;  %v4227_v14 = vld [vmem:[%s7623_s13] sm:$0xf] }
 0xe04   :  { %5871 = vmatprep.mubr.msk.bf16.mxu0 %vm6081_vm12, %v6074_v43 }
 0xe3d   :  { %v3943_v0 = vpop.f32.mrf.mxu0 }
 0xe3e   :  { %v3949_v6 = vadd.f32 %v3943_v0, %v3887_v13 }
 0xe3f   :  { %v5849_v33 = vpop.f32.mrf.mxu0 }
 0xe40   :  { %v4011_v30 = vadd.f32 %v4005_v24, %v3949_v6  ;;  %v4704_v24 = vld [vmem:[%s7625_s15] sm:$0xff]  ;;  %v5416_v33 = vld [vmem:[%s7623_s13 + $0x14] sm:$0xf] }
 0xe41   :  { %v3946_v46 = vpop.f32.mrf.mxu0 }
 0xe43   :  { %v5850_v47 = vpop.f32.mrf.mxu0 }
 0xe45   :  { %v4067_v1 = vpop.f32.mrf.mxu0 }
 0xe46   :  { %v4073_v56 = vadd.f32 %v4067_v1, %v4011_v30  ;;  %v5410_v30 = vld [vmem:[%s7623_s13 + $0x8] sm:$0xf] }
 0xe47   :  { %v5861_v58 = vpop.f32.mrf.mxu0 }
 0xe49   :  { %v4070_v59 = vpop.f32.mrf.mxu0 }
 0xe4a   :  { %v5414_v59 = vld [vmem:[%s7623_s13 + $0x10] sm:$0xf] }
 0xe4b   :  { %v5862_v60 = vpop.f32.mrf.mxu0 }
 0xec3   :  { %v4198_v61 = vpop.f32.mrf.mxu0 }
 0xec4   :  { %v7410_v62 = vadd.f32 %v4198_v61, %v4073_v56  ;;  %v5420_v56 = vld [vmem:[%s7623_s13 + $0x1c] sm:$0xf] }
 0xec5   :  { %v5867_v3 = vpop.f32.mrf.mxu0 }
 0xec6   :  { %v4211_v5 = vmul.f32 %v4209_v63, %v7410_v62  ;;  %v5418_v63 = vld [vmem:[%s7623_s13 + $0x18] sm:$0xf] }
 0xec7   :  { %v4201_v7 = vpop.f32.mrf.mxu0 }
 0xec8   :  { %v4218_v9 = vadd.f32 %v4216_v38, %v4211_v5  ;;  %v5422_v5 = vld [vmem:[%s7623_s13 + $0x20] sm:$0xf] }
 0xec9   :  { %v5868_v31 = vpop.f32.mrf.mxu0 }
 0xeca   :  { %v7413_v32 = vmax.f32 %v4218_v9, 0.0 }
 0xecc   :  { %4220 = vrot.lane.b32.xlu0 %v7413_v32, %s6075_s21  ;;  %v4437_v47 = vpack.c.bf16 %v7413_v32, %v7413_v32 }
 0xece   :  { %v4442_v1 = vsel %vm994_vm10, %v4437_v47, 0 }
 0xf3e   :  { %v4221_v34 = vpop.permute.xlu0 %4220 }
 0xf3f   :  { %v4222_v35 = vsel %vm954_vm11, %v4221_v34, %v7413_v32 }
 0xf40   :  { %4223 = vrot.lane.b32.xlu1 %v4222_v35, %s6075_s21 }
 0xfb2   :  { %v4224_v11 = vpop.permute.xlu1 %4223 }
 0xfb3   :  { %v4225_v48 = vsel %vm954_vm11, %v4224_v11, %v7413_v32 }
 0xfb4   :  { %v4229_v50 = vmul.f32 %v4225_v48, %v7235_v20  ;;  %v4226_v25 = vmul.f32 %v4225_v48, %v7244_v16  ;;  %v4330_v21 = vmul.f32 %v4225_v48, %v7237_v12  ;;  %v4383_v4 = vmul.f32 %v4225_v48, %v7255_v27 }
 0xfb5   :  { %v4485_v53 = vmul.f32 %v4225_v48, %v7248_v22  ;;  %v4538_v54 = vmul.f32 %v4225_v48, %v7327_v18  ;;  %v4591_v10 = vmul.f32 %v4225_v48, %v7261_v39  ;;  %v4644_v13 = vmul.f32 %v4225_v48, %v7339_v40 }
 0xfb6   :  { %v4231_v8 = vpack.c.bf16 %v4229_v50, %v4229_v50  ;;  %v4228_v44 = vpack.c.bf16 %v4226_v25, %v4226_v25  ;;  %v4332_v51 = vpack.c.bf16 %v4330_v21, %v4330_v21  ;;  %v4385_v52 = vpack.c.bf16 %v4383_v4, %v4383_v4 }
 0xfb7   :  { %v4487_v55 = vpack.c.bf16 %v4485_v53, %v4485_v53  ;;  %v4540_v57 = vpack.c.bf16 %v4538_v54, %v4538_v54  ;;  %v4593_v15 = vpack.c.bf16 %v4591_v10, %v4591_v10  ;;  %v4646_v17 = vpack.c.bf16 %v4644_v13, %v4644_v13 }
 0xfb8   :  { %4233 = vrot.lane.b32.xlu0 %v4231_v8, %s6082_s27  ;;  %4282 = vrot.lane.b32.xlu1 %v4228_v44, %s7687_s8 }
 0xfbc   :  { %4334 = vrot.lane.b32.xlu0 %v4332_v51, %s7673_s5  ;;  %4387 = vrot.lane.b32.xlu1 %v4385_v52, %s7670_s20 }
 0xfc0   :  { %4489 = vrot.lane.b32.xlu0 %v4487_v55, %s7671_s24  ;;  %4542 = vrot.lane.b32.xlu1 %v4540_v57, %s7674_s29 }
 0xfc4   :  { %4595 = vrot.lane.b32.xlu0 %v4593_v15, %s7672_s1  ;;  %4648 = vrot.lane.b32.xlu1 %v4646_v17, %s7690_s3 }
 0xfc8   :  { %4700 = vperm.xlu0 %6006, %v4697_v23   ;;  %4707 = vperm.xlu1 %6007, %v4704_v24  }
0x102a   :  { %v4234_v26 = vpop.permute.xlu0 %4233  ;;  %v4283_v28 = vpop.permute.xlu1 %4282 }
0x102b   :  { %v4239_v29 = vsel %vm994_vm10, %v4234_v26, 0  ;;  %v4288_v42 = vsel %vm994_vm10, %v4283_v28, 0 }
0x102c   :  { %5870 = vmatpush3.bf16.msra.mxu0 %v4239_v29 }
0x102d   :  { %5875 = vmatprep.subr.bf16.mxu0 %v6074_v43 }
0x102e   :  { %v4335_v37 = vpop.permute.xlu0 %4334  ;;  %v4388_v41 = vpop.permute.xlu1 %4387 }
0x102f   :  { %v4393_v2 = vsel %vm994_vm10, %v4388_v41, 0  ;;  %5872 = vmatmul.mubr.msk.bf16.vlgmr.msra.gmra.mxu0 %vm990_vm13, %v5407_v36  ;;  %v4340_v0 = vsel %vm994_vm10, %v4335_v37, 0 }
0x1030   :  { %5876 = vmatpush3.bf16.msra.mxu0 %v4288_v42  ;;  %5888 = vmatpush3.bf16.msra.mxu1 %v4393_v2 }
0x1031   :  { %5899 = vmatprep.subr.bf16.mxu1 %v6074_v43  ;;  %5877 = vmatprep.mubr.msk.bf16.mxu0 %vm6081_vm12, %v6074_v43 }
0x1032   :  { %v4490_v45 = vpop.permute.xlu0 %4489  ;;  %5881 = vmatprep.subr.bf16.mxu0 %v6074_v43  ;;  %v4543_v58 = vpop.permute.xlu1 %4542 }
0x1033   :  { %v4495_v19 = vsel %vm994_vm10, %v4490_v45, 0  ;;  %5890 = vmatmul.mubr.msk.bf16.vlgmr.msra.gmra.mxu1 %vm990_vm13, %v5412_v49  ;;  %v4548_v60 = vsel %vm994_vm10, %v4543_v58, 0 }
0x1034   :  { %5900 = vmatpush3.bf16.msra.mxu1 %v4495_v19  ;;  %5901 = vmatprep.mubr.msk.bf16.mxu1 %vm6081_vm12, %v6074_v43 }
0x1035   :  { %5911 = vmatprep.subr.bf16.mxu1 %v6074_v43 }
0x1036   :  { %v4596_v6 = vpop.permute.xlu0 %4595  ;;  %v4649_v61 = vpop.permute.xlu1 %4648 }
0x1037   :  { %5878 = vmatmul.mubr.msk.bf16.vlgmr.msra.gmra.mxu0 %vm990_vm13, %v4227_v14  ;;  %v4601_v46 = vsel %vm994_vm10, %v4596_v6, 0  ;;  %v4654_v3 = vsel %vm994_vm10, %v4649_v61, 0 }
0x1038   :  { %5882 = vmatpush3.bf16.msra.mxu0 %v4340_v0  ;;  %5883 = vmatprep.mubr.msk.bf16.mxu0 %vm6081_vm12, %v6074_v43 }
0x1039   :  { %5893 = vmatprep.subr.bf16.mxu0 %v6074_v43 }
0x103b   :  { %5902 = vmatmul.mubr.msk.bf16.vlgmr.msra.gmra.mxu1 %vm990_vm13, %v5416_v33 }
0x103c   :  { %5912 = vmatpush3.bf16.msra.mxu1 %v4601_v46  ;;  %5913 = vmatprep.mubr.msk.bf16.mxu1 %vm6081_vm12, %v6074_v43 }
0x103d   :  { %5923 = vmatprep.subr.bf16.mxu1 %v6074_v43 }
0x103f   :  { %5884 = vmatmul.mubr.msk.bf16.vlgmr.msra.gmra.mxu0 %vm990_vm13, %v5410_v30 }
0x1040   :  { %5894 = vmatpush3.bf16.msra.mxu0 %v4442_v1  ;;  %5895 = vmatprep.mubr.msk.bf16.mxu0 %vm6081_vm12, %v6074_v43 }
0x1041   :  { %5905 = vmatprep.subr.bf16.mxu0 %v6074_v43 }
0x1043   :  { %5914 = vmatmul.mubr.msk.bf16.vlgmr.msra.gmra.mxu1 %vm990_vm13, %v5420_v56  ;;  %v4701_v33 = vpop.permute.xlu0 %4700  ;;  %v4708_v30 = vpop.permute.xlu1 %4707 }
0x1044   :  { %5925 = vmatprep.mubr.msk.bf16.mxu1 %vm6081_vm12, %v6074_v43 }
0x1047   :  { %5896 = vmatmul.mubr.msk.bf16.vlgmr.msra.gmra.mxu0 %vm990_vm13, %v5414_v59 }
0x1048   :  { %5906 = vmatpush3.bf16.msra.mxu0 %v4548_v60  ;;  %5907 = vmatprep.mubr.msk.bf16.mxu0 %vm6081_vm12, %v6074_v43 }
0x1049   :  { %5917 = vmatprep.subr.bf16.mxu0 %v6074_v43 }
0x104f   :  { %5908 = vmatmul.mubr.msk.bf16.vlgmr.msra.gmra.mxu0 %vm990_vm13, %v5418_v63 }
0x1050   :  { %5918 = vmatpush3.bf16.msra.mxu0 %v4654_v3  ;;  %5919 = vmatprep.mubr.msk.bf16.mxu0 %vm6081_vm12, %v6074_v43 }
0x1051   :  { %5929 = vmatprep.subr.bf16.mxu0 %v6074_v43 }
0x1057   :  { %5920 = vmatmul.mubr.msk.bf16.vlgmr.msra.gmra.mxu0 %vm990_vm13, %v5422_v5 }
0x1058   :  { %5931 = vmatprep.mubr.msk.bf16.mxu0 %vm6081_vm12, %v6074_v43 }
0x10ef   :  { %v4275_v38 = vpop.f32.mrf.mxu0 }
0x10f1   :  { %v5873_v7 = vpop.f32.mrf.mxu0 }
0x10f3   :  { %v4278_v9 = vpop.f32.mrf.mxu0  ;;  %v4429_v31 = vpop.f32.mrf.mxu1 }
0x10f5   :  { %v5874_v32 = vpop.f32.mrf.mxu0  ;;  %v5891_v34 = vpop.f32.mrf.mxu1 }
0x10f7   :  { %v4324_v35 = vpop.f32.mrf.mxu0  ;;  %v4432_v11 = vpop.f32.mrf.mxu1 }
0x10f8   :  { %v4325_v57 = vadd.f32 %v4324_v35, %v4275_v38 }
0x10f9   :  { %v5879_v48 = vpop.f32.mrf.mxu0  ;;  %v5892_v50 = vpop.f32.mrf.mxu1 }
0x10fb   :  { %v4327_v25 = vpop.f32.mrf.mxu0  ;;  %v4531_v8 = vpop.f32.mrf.mxu1 }
0x10fd   :  { %v5880_v44 = vpop.f32.mrf.mxu0  ;;  %v5903_v21 = vpop.f32.mrf.mxu1 }
0x10ff   :  { %v4376_v4 = vpop.f32.mrf.mxu0  ;;  %v4534_v51 = vpop.f32.mrf.mxu1 }
0x1100   :  { %v4382_v15 = vadd.f32 %v4376_v4, %v4325_v57  ;;  %v5429_v57 = vld [vmem:[%s7626_s16 + $0xc] sm:$0xf] }
0x1101   :  { %v5885_v52 = vpop.f32.mrf.mxu0  ;;  %v5904_v53 = vpop.f32.mrf.mxu1 }
0x1102   :  { %v4435_v28 = vadd.f32 %v4429_v31, %v4382_v15 }
0x1103   :  { %v4379_v54 = vpop.f32.mrf.mxu0  ;;  %v4637_v55 = vpop.f32.mrf.mxu1 }
0x1105   :  { %v5886_v10 = vpop.f32.mrf.mxu0  ;;  %v5915_v13 = vpop.f32.mrf.mxu1 }
0x1107   :  { %v4478_v17 = vpop.f32.mrf.mxu0  ;;  %v4640_v23 = vpop.f32.mrf.mxu1 }
0x1108   :  { %v4484_v36 = vadd.f32 %v4478_v17, %v4435_v28  ;;  %v5431_v23 = vld [vmem:[%s7626_s16 + $0x10] sm:$0xf] }
0x1109   :  { %v5897_v24 = vpop.f32.mrf.mxu0  ;;  %v5916_v26 = vpop.f32.mrf.mxu1 }
0x110a   :  { %v4537_v42 = vadd.f32 %v4531_v8, %v4484_v36  ;;  %v5433_v24 = vld [vmem:[%s7626_s16 + $0x14] sm:$0xf]  ;;  %v5435_v36 = vld [vmem:[%s7626_s16 + $0x18] sm:$0xf] }
0x110b   :  { %v4481_v29 = vpop.f32.mrf.mxu0 }
0x110d   :  { %v5898_v37 = vpop.f32.mrf.mxu0 }
0x110e   :  { %v5437_v37 = vld [vmem:[%s7626_s16 + $0x1c] sm:$0xf] }
0x110f   :  { %v4584_v41 = vpop.f32.mrf.mxu0 }
0x1110   :  { %v4590_v49 = vadd.f32 %v4584_v41, %v4537_v42  ;;  %v5439_v42 = vld [vmem:[%s7626_s16 + $0x20] sm:$0xf] }
0x1111   :  { %v5909_v2 = vpop.f32.mrf.mxu0 }
0x1112   :  { %v4643_v14 = vadd.f32 %v4637_v55, %v4590_v49  ;;  %v5427_v55 = vld [vmem:[%s7626_s16 + $0x8] sm:$0xf] }
0x1113   :  { %v4587_v45 = vpop.f32.mrf.mxu0 }
0x1115   :  { %v5910_v19 = vpop.f32.mrf.mxu0 }
0x1117   :  { %v4690_v0 = vpop.f32.mrf.mxu0 }
0x1118   :  { %v4696_v6 = vadd.f32 %v4690_v0, %v4643_v14 }
0x1119   :  { %v5921_v46 = vpop.f32.mrf.mxu0 }
0x111a   :  { %v4703_v47 = vmul.f32 %v4701_v33, %v4696_v6 }
0x111b   :  { %v4693_v1 = vpop.f32.mrf.mxu0 }
0x111c   :  { %v4710_v56 = vadd.f32 %v4708_v30, %v4703_v47 }
0x111d   :  { %v5922_v58 = vpop.f32.mrf.mxu0 }
0x111e   :  { %v4711_v59 = vmax.f32 %v4710_v56, 0.0 }
0x1120   :  { %4712 = vrot.lane.b32.xlu0 %v4711_v59, %s6075_s21  ;;  %v4929_v53 = vpack.c.bf16 %v4711_v59, %v4711_v59 }
0x1122   :  { %v4934_v13 = vsel %vm994_vm10, %v4929_v53, 0 }
0x1192   :  { %v4713_v60 = vpop.permute.xlu0 %4712 }
0x1193   :  { %v4714_v61 = vsel %vm954_vm11, %v4713_v60, %v4711_v59 }
0x1194   :  { %4715 = vrot.lane.b32.xlu1 %v4714_v61, %s6075_s21 }
0x1206   :  { %v4716_v63 = vpop.permute.xlu1 %4715 }
0x1207   :  { %v4717_v3 = vsel %vm954_vm11, %v4716_v63, %v4711_v59 }
0x1208   :  { %v4721_v5 = vmul.f32 %v4717_v3, %v7235_v20  ;;  %v4718_v38 = vmul.f32 %v4717_v3, %v7244_v16  ;;  %v4822_v31 = vmul.f32 %v4717_v3, %v7237_v12  ;;  %v4875_v32 = vmul.f32 %v4717_v3, %v7255_v27 }
0x1209   :  { %v4977_v11 = vmul.f32 %v4717_v3, %v7248_v22  ;;  %v5030_v48 = vmul.f32 %v4717_v3, %v7327_v18  ;;  %v5083_v12 = vmul.f32 %v4717_v3, %v7261_v39  ;;  %v5136_v27 = vmul.f32 %v4717_v3, %v7339_v40  ;;  %v5424_v39 = vld [vmem:[%s7626_s16 + $0x4] sm:$0xf]  ;;  %v4719_v40 = vld [vmem:[%s7626_s16] sm:$0xf]  ;;  %s6091_s16 = smov [#allocation2]  }
0x120a   :  { %v4723_v7 = vpack.c.bf16 %v4721_v5, %v4721_v5  ;;  %v4720_v9 = vpack.c.bf16 %v4718_v38, %v4718_v38  ;;  %v4824_v34 = vpack.c.bf16 %v4822_v31, %v4822_v31  ;;  %v4877_v35 = vpack.c.bf16 %v4875_v32, %v4875_v32  ;;  %s5197_s12 = sshll.u32 %s6091_s16, 4  ;;  %s5198_s12 = int_to_ptr.vmem [resolvable:$true] %s5197_s12 }
0x120b   :  { %v4979_v20 = vpack.c.bf16 %v4977_v11, %v4977_v11  ;;  %v5032_v16 = vpack.c.bf16 %v5030_v48, %v5030_v48  ;;  %v5085_v50 = vpack.c.bf16 %v5083_v12, %v5083_v12  ;;  %v5138_v25 = vpack.c.bf16 %v5136_v27, %v5136_v27  ;;  %s6042_s25 = scalar_lea.vmem %s5198_s12, 256  ;;  %p6047_p1 = scmp.lt.s32.totalorder %s5198_s12, %s5198_s12 }
0x120c   :  { %4725 = vrot.lane.b32.xlu0 %v4723_v7, %s6082_s27  ;;  %4774 = vrot.lane.b32.xlu1 %v4720_v9, %s7687_s8  ;;  %p6043_p0 = scmp.ne.s32.totalorder %s5198_s12, %s6042_s25  ;;  %p6048_p2 = scmp.lt.s32.totalorder %s6042_s25, %s6042_s25 }
0x120e   :  { %p6049_p3 = por %p6048_p2, %p6047_p1 }
0x1210   :  { %4826 = vrot.lane.b32.xlu0 %v4824_v34, %s7673_s5  ;;  %4879 = vrot.lane.b32.xlu1 %v4877_v35, %s7670_s20  ;;  %p6050_p4 = pnand %p6049_p3, %p6043_p0 }
0x1214   :  { %4981 = vrot.lane.b32.xlu0 %v4979_v20, %s7671_s24  ;;  %5034 = vrot.lane.b32.xlu1 %v5032_v16, %s7674_s29 }
0x1218   :  { %5087 = vrot.lane.b32.xlu0 %v5085_v50, %s7672_s1  ;;  %5140 = vrot.lane.b32.xlu1 %v5138_v25, %s7690_s3 }
0x127e   :  { %v4726_v22 = vpop.permute.xlu0 %4725  ;;  %v4775_v18 = vpop.permute.xlu1 %4774 }
0x127f   :  { %v4731_v8 = vsel %vm994_vm10, %v4726_v22, 0  ;;  %v4780_v44 = vsel %vm994_vm10, %v4775_v18, 0 }
0x1280   :  { %5924 = vmatpush3.bf16.msra.mxu1 %v4731_v8  ;;  %5930 = vmatpush3.bf16.msra.mxu0 %v4780_v44 }
0x1281   :  { %5935 = vmatprep.subr.bf16.mxu1 %v6074_v43  ;;  %5941 = vmatprep.subr.bf16.mxu0 %v6074_v43 }
0x1282   :  { %v4827_v21 = vpop.permute.xlu0 %4826  ;;  %v4880_v4 = vpop.permute.xlu1 %4879 }
0x1283   :  { %v4832_v51 = vsel %vm994_vm10, %v4827_v21, 0  ;;  %v4885_v52 = vsel %vm994_vm10, %v4880_v4, 0  ;;  %5926 = vmatmul.mubr.msk.bf16.vlgmr.msra.gmra.mxu1 %vm990_vm13, %v5424_v39  ;;  %5932 = vmatmul.mubr.msk.bf16.vlgmr.msra.gmra.mxu0 %vm990_vm13, %v4719_v40 }
0x1284   :  { %5936 = vmatpush3.bf16.msra.mxu1 %v4832_v51  ;;  %5942 = vmatpush3.bf16.msra.mxu0 %v4885_v52 }
0x1285   :  { %5937 = vmatprep.mubr.msk.bf16.mxu1 %vm6081_vm12, %v6074_v43  ;;  %5947 = vmatprep.subr.bf16.mxu1 %v6074_v43 }
0x1286   :  { %5943 = vmatprep.mubr.msk.bf16.mxu0 %vm6081_vm12, %v6074_v43  ;;  %5953 = vmatprep.subr.bf16.mxu0 %v6074_v43  ;;  %v4982_v54 = vpop.permute.xlu0 %4981  ;;  %v5035_v15 = vpop.permute.xlu1 %5034 }
0x1287   :  { %v4987_v10 = vsel %vm994_vm10, %v4982_v54, 0  ;;  %v5040_v26 = vsel %vm994_vm10, %v5035_v15, 0 }
0x128a   :  { %v5088_v17 = vpop.permute.xlu0 %5087  ;;  %v5141_v29 = vpop.permute.xlu1 %5140 }
0x128b   :  { %5938 = vmatmul.mubr.msk.bf16.vlgmr.msra.gmra.mxu1 %vm990_vm13, %v5427_v55  ;;  %5944 = vmatmul.mubr.msk.bf16.vlgmr.msra.gmra.mxu0 %vm990_vm13, %v5429_v57  ;;  %v5093_v28 = vsel %vm994_vm10, %v5088_v17, 0  ;;  %v5146_v41 = vsel %vm994_vm10, %v5141_v29, 0 }
0x128c   :  { %5948 = vmatpush3.bf16.msra.mxu1 %v4934_v13  ;;  %5954 = vmatpush3.bf16.msra.mxu0 %v4987_v10 }
0x128d   :  { %5949 = vmatprep.mubr.msk.bf16.mxu1 %vm6081_vm12, %v6074_v43  ;;  %5955 = vmatprep.mubr.msk.bf16.mxu0 %vm6081_vm12, %v6074_v43 }
0x128e   :  { %5959 = vmatprep.subr.bf16.mxu1 %v6074_v43  ;;  %5965 = vmatprep.subr.bf16.mxu0 %v6074_v43 }
0x1293   :  { %5950 = vmatmul.mubr.msk.bf16.vlgmr.msra.gmra.mxu1 %vm990_vm13, %v5431_v23  ;;  %5956 = vmatmul.mubr.msk.bf16.vlgmr.msra.gmra.mxu0 %vm990_vm13, %v5433_v24 }
0x1294   :  { %5960 = vmatpush3.bf16.msra.mxu1 %v5040_v26  ;;  %5966 = vmatpush3.bf16.msra.mxu0 %v5093_v28 }
0x1295   :  { %5961 = vmatprep.mubr.msk.bf16.mxu1 %vm6081_vm12, %v6074_v43  ;;  %5971 = vmatprep.subr.bf16.mxu1 %v6074_v43 }
0x1296   :  { %5967 = vmatprep.mubr.msk.bf16.mxu0 %vm6081_vm12, %v6074_v43 }
0x129b   :  { %5962 = vmatmul.mubr.msk.bf16.vlgmr.msra.gmra.mxu1 %vm990_vm13, %v5435_v36  ;;  %5968 = vmatmul.mubr.msk.bf16.vlgmr.msra.gmra.mxu0 %vm990_vm13, %v5437_v37 }
0x129c   :  { %5972 = vmatpush3.bf16.msra.mxu1 %v5146_v41  ;;  %5973 = vmatprep.mubr.msk.bf16.mxu1 %vm6081_vm12, %v6074_v43 }
0x12a3   :  { %5974 = vmatmul.mubr.msk.bf16.vlgmr.msra.gmra.mxu1 %vm990_vm13, %v5439_v42 }
0x1343   :  { %v4767_v2 = vpop.f32.mrf.mxu1  ;;  %v4816_v49 = vpop.f32.mrf.mxu0 }
0x1344   :  { %v4817_v58 = vadd.f32 %v4816_v49, %v4767_v2 }
0x1345   :  { %v5927_v45 = vpop.f32.mrf.mxu1  ;;  %v5933_v19 = vpop.f32.mrf.mxu0 }
0x1347   :  { %v4770_v14 = vpop.f32.mrf.mxu1  ;;  %v4819_v0 = vpop.f32.mrf.mxu0 }
0x1349   :  { %v5928_v6 = vpop.f32.mrf.mxu1  ;;  %v5934_v33 = vpop.f32.mrf.mxu0 }
0x134b   :  { %v4868_v46 = vpop.f32.mrf.mxu1  ;;  %v4921_v47 = vpop.f32.mrf.mxu0 }
0x134c   :  { %v4874_v61 = vadd.f32 %v4868_v46, %v4817_v58 }
0x134d   :  { %v5939_v30 = vpop.f32.mrf.mxu1  ;;  %v5945_v1 = vpop.f32.mrf.mxu0 }
0x134e   :  { %v4927_v7 = vadd.f32 %v4921_v47, %v4874_v61 }
0x134f   :  { %v4871_v56 = vpop.f32.mrf.mxu1  ;;  %v4924_v43 = vpop.f32.mrf.mxu0 }
0x1351   :  { %v5940_v59 = vpop.f32.mrf.mxu1  ;;  %v5946_v60 = vpop.f32.mrf.mxu0 }
0x1353   :  { %v4970_v63 = vpop.f32.mrf.mxu1  ;;  %v5023_v3 = vpop.f32.mrf.mxu0 }
0x1354   :  { %v4976_v32 = vadd.f32 %v4970_v63, %v4927_v7 }
0x1355   :  { %v5951_v5 = vpop.f32.mrf.mxu1  ;;  %v5957_v38 = vpop.f32.mrf.mxu0 }
0x1356   :  { %v5029_v20 = vadd.f32 %v5023_v3, %v4976_v32 }
0x1357   :  { %v4973_v9 = vpop.f32.mrf.mxu1  ;;  %v5026_v31 = vpop.f32.mrf.mxu0 }
0x1359   :  { %v5952_v34 = vpop.f32.mrf.mxu1  ;;  %v5958_v35 = vpop.f32.mrf.mxu0 }
0x135b   :  { %v5076_v11 = vpop.f32.mrf.mxu1  ;;  %v5129_v48 = vpop.f32.mrf.mxu0 }
0x135c   :  { %v5082_v27 = vadd.f32 %v5076_v11, %v5029_v20 }
0x135d   :  { %v5963_v16 = vpop.f32.mrf.mxu1  ;;  %v5969_v12 = vpop.f32.mrf.mxu0 }
0x135e   :  { %v5135_v8 = vadd.f32 %v5129_v48, %v5082_v27 }
0x135f   :  { %v5079_v50 = vpop.f32.mrf.mxu1  ;;  %v5132_v25 = vpop.f32.mrf.mxu0 }
0x1361   :  { %v5964_v22 = vpop.f32.mrf.mxu1  ;;  %v5970_v18 = vpop.f32.mrf.mxu0 }
0x1363   :  { %v5182_v44 = vpop.f32.mrf.mxu1 }
0x1364   :  { %v5188_v39 = vadd.f32 %v5182_v44, %v5135_v8 }
0x1365   :  { %v5975_v40 = vpop.f32.mrf.mxu1 }
0x1366   :  { %v5189_v21 = vadd.f32 %v5188_v39, %v7410_v62 }
0x1367   :  { %v5185_v4 = vpop.f32.mrf.mxu1 }
0x1368   :  { %5191 = vst.msk [vmem:[#allocation2 + $0x8] sm:$0xff] %vm2653_vm14, %v5189_v21 }
0x1369   :  { %v5976_v51 = vpop.f32.mrf.mxu1 }
0x136a   :  { %6053 = shalt.err (!%p6050_p4)
}
0x136b   :  { %s6092_s0 = smov 128  }
0x136c   :  { %5203 = dma.vmem_to_hbm [thread:$0]  %s5198_s12, 256, %s7627_s17, [#allocation3], %s6092_s0, %s6092_s0, %s7686_s23  }
0x136d   :  { %6062 = dma.done.wait [#allocation3], 256  }
0x136e   :  { %6063 = vsyncadd [#allocation3], 4294967040 }
0x136f   :  { %5207 = vsyncpa [#allocation3], 1 }

</bundles_post_ra>
